<compile_context>
chip_gen: v5e
topology: v5e:2x2
jax: 0.10.0
libtpu: 0.0.40
codegen_flags: <defaults>
</compile_context>

<pallas_src>
import math

import jax
import jax.numpy as jnp
from jax.experimental import pallas as pl
from jax.experimental.pallas import tpu as pltpu

# ----------------------------- problem dims (small) --------------------------
T = 8            # MAML tasks folded into one kernel call (query batches)
B = 2            # query batch size per task
S = 16           # sequence length
H = 32           # hidden size
FF = 64          # FFN intermediate size
L = 4            # num_labels (LOC / PER / ORG / O)
VOCAB = 64

LANE = 128                       # TPU lane width
SEQ_PER_STEP = 8                 # (task, batch) sequences per grid step
RPS = SEQ_PER_STEP * S           # 128 rows per step -> fills the MXU row height
TOTAL_ROWS = T * B * S           # 256
NSTEPS = TOTAL_ROWS // RPS       # 2 (parallel grid axis -> 2 TCs on v7x)
assert TOTAL_ROWS % RPS == 0
SEG_SHIFT = int(math.log2(S))    # row index -> (task,batch) segment id
assert (1 << SEG_SHIFT) == S

# slab 1 (row dim H, +1 bias row); each segment lane-aligned to 128:
#   lanes 0:128 Wq | 128:256 Wk | 256:384 Wv | 384:512 W1 | 512:640 Wc
W_IN_COLS = 5 * LANE
# slab 2 (lane dim H): Wo padded to 128 rows | W2 padded to 128 rows | biases/LN
_WO0, _WO1 = 0, LANE
_W20, _W21 = LANE, 2 * LANE
_BO = 2 * LANE          # 256
_B2 = 2 * LANE + 1      # 257
_G1 = 2 * LANE + 2      # 258
_BE1 = 2 * LANE + 3     # 259
_G2 = 2 * LANE + 4      # 260
_BE2 = 2 * LANE + 5     # 261
W2S_ROWS = 2 * LANE + 6  # 262

OUT_W = 128              # lane-dense combined output width


def _gelu(x):
    # tanh-approx GELU (BERT-style), VPU/EUP friendly; gelu(0) == 0 so the
    # zero-padded FFN lanes stay exactly zero.
    c = math.sqrt(2.0 / math.pi)
    return 0.5 * x * (1.0 + jnp.tanh(c * (x + 0.044715 * x * x * x)))


def _layernorm(x, gamma, beta, eps=1e-12):
    mu = jnp.mean(x, axis=-1, keepdims=True)
    var = jnp.mean((x - mu) * (x - mu), axis=-1, keepdims=True)
    return (x - mu) * jax.lax.rsqrt(var + eps) * gamma + beta


# ------------------------------- Pallas kernel -------------------------------
def token_cls_kernel(x_ref, valid_ref, win_ref, w2s_ref, out_ref):
    x = x_ref[...]                                    # [RPS, H]

    def dot(a, b):
        return jnp.dot(a, b, preferred_element_type=jnp.float32)

    # ---- segment structure + key mask built IN-KERNEL (no O(R^2) HBM mask) ---
    ri = jax.lax.broadcasted_iota(jnp.int32, (RPS, RPS), 0)
    ci = jax.lax.broadcasted_iota(jnp.int32, (RPS, RPS), 1)
    same_seg = jnp.right_shift(ri, SEG_SHIFT) == jnp.right_shift(ci, SEG_SHIFT)
    key_valid = valid_ref[0:1, :] > 0.5               # [1, RPS] key validity row
    mask_add = jnp.where(same_seg & key_valid, 0.0, -1e9)
    sel = same_seg.astype(jnp.float32)                # classifier segment selector

    # ---- self-attention: fused, lane-aligned QKV projection ----
    qkv = dot(x, win_ref[0:H, 0:3 * LANE]) + win_ref[H:H + 1, 0:3 * LANE]
    q = qkv[:, 0:LANE]                                # lanes >= H are exact zeros
    k = qkv[:, LANE:2 * LANE]
    v = qkv[:, 2 * LANE:3 * LANE]

    # q @ k^T without an explicit transpose; zero-padded lanes add exact zeros
    scores = jax.lax.dot_general(
        q, k, dimension_numbers=(((1,), (1,)), ((), ())),
        preferred_element_type=jnp.float32) * (1.0 / math.sqrt(H))
    scores = scores + mask_add
    scores = scores - jnp.max(scores, axis=-1, keepdims=True)
    e = jnp.exp(scores)
    attn = e / jnp.sum(e, axis=-1, keepdims=True)     # exact divide (review)
    ctx = dot(attn, v)                                # [RPS, 128], lanes >= H zero
    attn_out = dot(ctx, w2s_ref[_WO0:_WO1, :]) + w2s_ref[_BO:_BO + 1, :]

    g1 = w2s_ref[_G1:_G1 + 1, :]
    be1 = w2s_ref[_BE1:_BE1 + 1, :]
    g2 = w2s_ref[_G2:_G2 + 1, :]
    be2 = w2s_ref[_BE2:_BE2 + 1, :]

    h1 = _layernorm(x + attn_out, g1, be1)

    # ---- feed-forward ----
    f = _gelu(dot(h1, win_ref[0:H, 3 * LANE:4 * LANE])
              + win_ref[H:H + 1, 3 * LANE:4 * LANE])  # [RPS,128], lanes >= FF zero
    ffn = dot(f, w2s_ref[_W20:_W21, :]) + w2s_ref[_B2:_B2 + 1, :]
    h2 = _layernorm(h1 + ffn, g2, be2)

    # ---- token classifier ----
    logits = (dot(h2, win_ref[0:H, 4 * LANE:5 * LANE])
              + win_ref[H:H + 1, 4 * LANE:5 * LANE])[:, 0:L]      # [RPS, L]

    # F.softmax(logits, dim=1): softmax along the SEQUENCE axis per
    # (task, batch) segment (as in the reference), then argmax over labels.
    # Vectorized over all 8 segments: subtracting a per-column constant leaves
    # every per-segment softmax unchanged; the per-segment denominators are
    # broadcast back to every row by one MXU matmul with the 0/1 selector.
    colmax = jnp.max(logits, axis=0, keepdims=True)
    e2 = jnp.exp(logits - colmax)
    seg_sum = dot(sel, e2)                            # [RPS, L]
    probs = e2 / seg_sum                              # exact divide (review)

    # first-occurrence argmax over labels (torch.argmax semantics)
    maxv = jnp.max(probs, axis=1, keepdims=True)
    ids = jax.lax.broadcasted_iota(jnp.int32, (RPS, L), 1)
    cand = jnp.where(probs >= maxv, ids, jnp.int32(L))
    pred = jnp.min(cand, axis=1, keepdims=True).astype(jnp.float32)

    # one lane-dense width-128 unmasked store: probs lanes 0..L-1, pred lane L
    pad = jnp.zeros((RPS, OUT_W - L - 1), jnp.float32)
    out_ref[...] = jnp.concatenate([probs, pred, pad], axis=1)    # [RPS, OUT_W]


# --------------------------------- wrapper -----------------------------------
def token_classify(x_emb, attn_mask, W_in, W2S):
    """x_emb [T,B,S,H], attn_mask [T,B,S] -> probs [T,B,S,L], pred [T,B,S]."""
    x_flat = x_emb.reshape(TOTAL_ROWS, H).astype(jnp.float32)
    valid = attn_mask.reshape(NSTEPS, RPS).astype(jnp.float32)
    # replicate each step's validity row across 8 sublanes -> (8,128) blocks
    valid_blocked = jnp.repeat(valid, 8, axis=0)                  # [NSTEPS*8, RPS]

    flops = NSTEPS * 2 * (RPS * H * 3 * LANE          # fused QKV
                          + 2 * RPS * RPS * LANE      # scores + ctx
                          + 4 * RPS * H * LANE        # Wo, W1, W2, Wc
                          + RPS * RPS * L)            # classifier segment-sum
    transcendentals = NSTEPS * (RPS * RPS + RPS * LANE + RPS * L)
    bytes_accessed = 4 * (x_flat.size + valid_blocked.size + W_in.size
                          + W2S.size + TOTAL_ROWS * OUT_W)

    out = pl.pallas_call(
        token_cls_kernel,
        out_shape=jax.ShapeDtypeStruct((TOTAL_ROWS, OUT_W), jnp.float32),
        grid=(NSTEPS,),
        in_specs=[
            pl.BlockSpec((RPS, H), lambda t: (t, 0)),             # activations
            pl.BlockSpec((8, RPS), lambda t: (t, 0)),             # key validity
            pl.BlockSpec((H + 1, W_IN_COLS), lambda t: (0, 0)),   # slab 1 (resident)
            pl.BlockSpec((W2S_ROWS, H), lambda t: (0, 0)),        # slab 2 (resident)
        ],
        out_specs=pl.BlockSpec((RPS, OUT_W), lambda t: (t, 0)),
        compiler_params=pltpu.CompilerParams(
            dimension_semantics=("parallel",)),       # v7x: split steps over 2 TCs
        cost_estimate=pl.CostEstimate(flops=flops,
                                      transcendentals=transcendentals,
                                      bytes_accessed=bytes_accessed),
    )(x_flat, valid_blocked, W_in, W2S)

    probs = out[:, :L].reshape(T, B, S, L)
    # pred rides a float32 lane; exact for label ids < 2^24 (L = 4 here).
    pred = out[:, L].astype(jnp.int32).reshape(T, B, S)
    return probs, pred


# ------------------------------ plain-JAX reference --------------------------
def reference(x_emb, attn_mask, params):
    (wq, bq, wk, bk, wv, bv, wo, bo, g1, be1,
     w1, b1, w2, b2, g2, be2, wc, bc) = params

    def hdot(a, b):
        return jnp.dot(a, b, precision=jax.lax.Precision.HIGHEST)

    def one(x, m):                                    # x [S,H], m [S]
        q = hdot(x, wq) + bq
        k = hdot(x, wk) + bk
        v = hdot(x, wv) + bv
        s = hdot(q, k.T) / math.sqrt(H) + (m[None, :] - 1.0) * 1e9
        a = jax.nn.softmax(s, axis=-1)
        h1 = _layernorm(x + hdot(hdot(a, v), wo) + bo, g1, be1)
        f = _gelu(hdot(h1, w1) + b1)
        h2 = _layernorm(h1 + hdot(f, w2) + b2, g2, be2)
        logits = hdot(h2, wc) + bc
        probs = jax.nn.softmax(logits, axis=0)        # torch dim=1 (sequence)
        return probs, jnp.argmax(probs, axis=1)       # torch dim=2 (labels)

    xs = x_emb.reshape(T * B, S, H)
    ms = attn_mask.reshape(T * B, S)
    probs, pred = jax.vmap(one)(xs, ms)
    return probs.reshape(T, B, S, L), pred.reshape(T, B, S)


# ------------------------------------ main ------------------------------------
if __name__ == "__main__":
    key = jax.random.PRNGKey(0)
    ks = jax.random.split(key, 24)

    def w(k, shape, scale=0.05):
        return (scale * jax.random.normal(k, shape)).astype(jnp.float32)

    # deterministic synthetic "BERT-like" parameters (shared across tasks)
    emb_table = w(ks[0], (VOCAB, H), 0.1)
    pos_table = w(ks[1], (S, H), 0.1)
    params = (
        w(ks[2], (H, H)),  w(ks[3], (1, H)),      # Wq, bq
        w(ks[4], (H, H)),  w(ks[5], (1, H)),      # Wk, bk
        w(ks[6], (H, H)),  w(ks[7], (1, H)),      # Wv, bv
        w(ks[8], (H, H)),  w(ks[9], (1, H)),      # Wo, bo
        jnp.ones((1, H), jnp.float32), jnp.zeros((1, H), jnp.float32),  # ln1
        w(ks[10], (H, FF)), w(ks[11], (1, FF)),   # W1, b1
        w(ks[12], (FF, H)), w(ks[13], (1, H)),    # W2, b2
        jnp.ones((1, H), jnp.float32), jnp.zeros((1, H), jnp.float32),  # ln2
        w(ks[14], (H, L)), w(ks[15], (1, L)),     # Wc, bc
    )
    (wq, bq, wk, bk, wv, bv, wo, bo, g1, be1,
     w1, b1, w2, b2, g2, be2, wc, bc) = params

    # ---- pack the 18 arrays into TWO aligned slabs (fewer DMA descriptors) ----
    def lane_pad(a):
        return jnp.pad(a, ((0, 0), (0, LANE - a.shape[1])))

    W_in = jnp.concatenate([
        jnp.concatenate([lane_pad(wq), lane_pad(wk), lane_pad(wv),
                         lane_pad(w1), lane_pad(wc)], axis=1),
        jnp.concatenate([lane_pad(bq), lane_pad(bk), lane_pad(bv),
                         lane_pad(b1), lane_pad(bc)], axis=1),
    ], axis=0)                                                    # [H+1, 640]
    W2S = jnp.concatenate([
        jnp.pad(wo, ((0, LANE - H), (0, 0))),                     # rows 0:128
        jnp.pad(w2, ((0, LANE - FF), (0, 0))),                    # rows 128:256
        bo, b2, g1, be1, g2, be2,                                 # rows 256:262
    ], axis=0)                                                    # [262, H]

    # ---- synthetic query batches for T MAML tasks ----
    q_input_ids = jax.random.randint(ks[16], (T, B, S), 0, VOCAB, dtype=jnp.int32)
    valid_len = jax.random.randint(ks[18], (T, B), 6, S + 1)
    q_attention_mask = (jnp.arange(S)[None, None, :] < valid_len[..., None]
                        ).astype(jnp.float32)
    q_label_id = jax.random.randint(ks[17], (T, B, S), 0, L, dtype=jnp.int32)
    q_label_id = jnp.where(q_attention_mask > 0, q_label_id, jnp.int32(-100))

    # glue: embedding lookup + positional embedding (host-side)
    x_emb = (emb_table[q_input_ids] + pos_table[None, None, :, :]).astype(jnp.float32)

    probs, pred = token_classify(x_emb, q_attention_mask, W_in, W2S)
    probs, pred = jax.block_until_ready((probs, pred))

    # sanity check against the plain-JAX per-sequence reference (unpacked params)
    ref_probs, ref_pred = reference(x_emb, q_attention_mask, params)
    assert jnp.allclose(probs, ref_probs, atol=1e-3, rtol=1e-3), "probs mismatch"
    # exact divides everywhere -> only MXU/transcendental rounding remains; a
    # label flip is only possible at true near-ties, so require agreement except
    # where the reference top-2 probability gap is below 1e-4.
    srt = jnp.sort(ref_probs, axis=-1)
    top2_gap = srt[..., -1] - srt[..., -2]
    assert bool(jnp.all((pred == ref_pred) | (top2_gap < 1e-4))), "argmax mismatch"

    # reference semantics, per task: mask row 0 where label == -100, then
    # accuracy_score(q_label_id[0], pre_label_id[0]); mean over tasks.
    b_mask = (q_label_id != -100)
    pre0 = jnp.where(b_mask[:, 0, :], pred[:, 0, :], jnp.int32(-100))
    task_accs = jnp.mean((pre0 == q_label_id[:, 0, :]).astype(jnp.float32), axis=1)
    _ = jax.block_until_ready(jnp.mean(task_accs))

    print("KERNEL_OK")
</pallas_src>

<mosaic_0001>
module attributes {stable_mosaic.version = 11 : i64} {
  func.func @token_cls_kernel(%arg0: i32, %arg1: memref<128x32xf32, #tpu.memory_space<vmem>>, %arg2: memref<8x128xf32, #tpu.memory_space<vmem>>, %arg3: memref<33x640xf32, #tpu.memory_space<vmem>>, %arg4: memref<262x32xf32, #tpu.memory_space<vmem>>, %arg5: memref<128x128xf32, #tpu.memory_space<vmem>>) attributes {dimension_semantics = [#tpu.dimension_semantics<parallel>], iteration_bounds = array<i64: 2>, scalar_prefetch = 0 : i64, scratch_operands = 0 : i64, tpu.core_type = #tpu.core_type<tc>, window_params = [{transform_indices = @transform_0, window_bounds = array<i64: 128, 32>}, {transform_indices = @transform_1, window_bounds = array<i64: 8, 128>}, {pipeline_mode = #tpu.pipeline_mode<synchronous>, transform_indices = @transform_2, window_bounds = array<i64: 33, 640>}, {pipeline_mode = #tpu.pipeline_mode<synchronous>, transform_indices = @transform_3, window_bounds = array<i64: 262, 32>}, {transform_indices = @transform_4, window_bounds = array<i64: 128, 128>}]} {
    %c0 = arith.constant 0 : index
    %c0_0 = arith.constant 0 : index
    %0 = vector.load %arg1[%c0, %c0_0] : memref<128x32xf32, #tpu.memory_space<vmem>>, vector<128x32xf32>
    %1 = tpu.iota {dimensions = array<i32: 0>} : vector<128x128xi32>
    %2 = tpu.iota {dimensions = array<i32: 1>} : vector<128x128xi32>
    %c4_i32 = arith.constant 4 : i32
    %3 = vector.broadcast %c4_i32 : i32 to vector<128x128xi32>
    %4 = arith.shrsi %1, %3 : vector<128x128xi32>
    %c4_i32_1 = arith.constant 4 : i32
    %5 = vector.broadcast %c4_i32_1 : i32 to vector<128x128xi32>
    %6 = arith.shrsi %2, %5 : vector<128x128xi32>
    %7 = arith.cmpi eq, %4, %6 : vector<128x128xi32>
    %c0_2 = arith.constant 0 : index
    %c0_3 = arith.constant 0 : index
    %8 = vector.load %arg2[%c0_2, %c0_3] : memref<8x128xf32, #tpu.memory_space<vmem>>, vector<1x128xf32>
    %cst = arith.constant 5.000000e-01 : f32
    %9 = vector.broadcast %cst : f32 to vector<1x128xf32>
    %10 = arith.cmpf ogt, %8, %9 : vector<1x128xf32>
    %11 = vector.broadcast %10 : vector<1x128xi1> to vector<128x128xi1>
    %12 = arith.andi %7, %11 : vector<128x128xi1>
    %cst_4 = arith.constant 0.000000e+00 : f32
    %cst_5 = arith.constant -1.000000e+09 : f32
    %13 = vector.broadcast %cst_4 : f32 to vector<128x128xf32>
    %14 = vector.broadcast %cst_5 : f32 to vector<128x128xf32>
    %15 = arith.select %12, %13, %14 : vector<128x128xi1>, vector<128x128xf32>
    %16 = arith.extui %7 : vector<128x128xi1> to vector<128x128xi32>
    %17 = arith.sitofp %16 : vector<128x128xi32> to vector<128x128xf32>
    %c0_6 = arith.constant 0 : index
    %c0_7 = arith.constant 0 : index
    %18 = vector.load %arg3[%c0_6, %c0_7] : memref<33x640xf32, #tpu.memory_space<vmem>>, vector<32x384xf32>
    %cst_8 = arith.constant dense<0.000000e+00> : vector<128x384xf32>
    %19 = tpu.matmul %0, %18, %cst_8 {dimension_numbers = #tpu.dot_dimension_numbers<[1], [0], [0], [1], [0, 0, 1, 1], [], []>} : vector<128x32xf32>, vector<32x384xf32>, vector<128x384xf32> -> vector<128x384xf32>
    %c32 = arith.constant 32 : index
    %c0_9 = arith.constant 0 : index
    %20 = vector.load %arg3[%c32, %c0_9] : memref<33x640xf32, #tpu.memory_space<vmem>>, vector<1x384xf32>
    %21 = vector.broadcast %20 : vector<1x384xf32> to vector<128x384xf32>
    %22 = arith.addf %19, %21 : vector<128x384xf32>
    %23 = vector.extract_strided_slice %22 {offsets = [0, 0], sizes = [128, 128], strides = [1, 1]} : vector<128x384xf32> to vector<128x128xf32>
    %24 = vector.extract_strided_slice %22 {offsets = [0, 128], sizes = [128, 128], strides = [1, 1]} : vector<128x384xf32> to vector<128x128xf32>
    %25 = vector.extract_strided_slice %22 {offsets = [0, 256], sizes = [128, 128], strides = [1, 1]} : vector<128x384xf32> to vector<128x128xf32>
    %cst_10 = arith.constant dense<0.000000e+00> : vector<128x128xf32>
    %26 = tpu.matmul %23, %24, %cst_10 {dimension_numbers = #tpu.dot_dimension_numbers<[1], [1], [0], [0], [0, 0, 1, 0], [], []>} : vector<128x128xf32>, vector<128x128xf32>, vector<128x128xf32> -> vector<128x128xf32>
    %cst_11 = arith.constant 0.176776692 : f32
    %27 = vector.broadcast %cst_11 : f32 to vector<128x128xf32>
    %28 = arith.mulf %26, %27 : vector<128x128xf32>
    %29 = arith.addf %28, %15 : vector<128x128xf32>
    %cst_12 = arith.constant dense<0xFF800000> : vector<128xf32>
    %30 = vector.multi_reduction <maximumf>, %29, %cst_12 [1] : vector<128x128xf32> to vector<128xf32>
    %31 = vector.shape_cast %30 : vector<128xf32> to vector<128x1xf32>
    %32 = vector.broadcast %31 : vector<128x1xf32> to vector<128x128xf32>
    %33 = arith.subf %29, %32 : vector<128x128xf32>
    %34 = math.exp %33 : vector<128x128xf32>
    %cst_13 = arith.constant dense<0.000000e+00> : vector<128xf32>
    %35 = vector.multi_reduction <add>, %34, %cst_13 [1] : vector<128x128xf32> to vector<128xf32>
    %36 = vector.shape_cast %35 : vector<128xf32> to vector<128x1xf32>
    %37 = vector.broadcast %36 : vector<128x1xf32> to vector<128x128xf32>
    %38 = arith.divf %34, %37 : vector<128x128xf32>
    %cst_14 = arith.constant dense<0.000000e+00> : vector<128x128xf32>
    %39 = tpu.matmul %38, %25, %cst_14 {dimension_numbers = #tpu.dot_dimension_numbers<[1], [0], [0], [1], [0, 0, 1, 1], [], []>} : vector<128x128xf32>, vector<128x128xf32>, vector<128x128xf32> -> vector<128x128xf32>
    %c0_15 = arith.constant 0 : index
    %c0_16 = arith.constant 0 : index
    %40 = vector.load %arg4[%c0_15, %c0_16] : memref<262x32xf32, #tpu.memory_space<vmem>>, vector<128x32xf32>
    %cst_17 = arith.constant dense<0.000000e+00> : vector<128x32xf32>
    %41 = tpu.matmul %39, %40, %cst_17 {dimension_numbers = #tpu.dot_dimension_numbers<[1], [0], [0], [1], [0, 0, 1, 1], [], []>} : vector<128x128xf32>, vector<128x32xf32>, vector<128x32xf32> -> vector<128x32xf32>
    %c256 = arith.constant 256 : index
    %c0_18 = arith.constant 0 : index
    %42 = vector.load %arg4[%c256, %c0_18] : memref<262x32xf32, #tpu.memory_space<vmem>>, vector<1x32xf32>
    %43 = vector.broadcast %42 : vector<1x32xf32> to vector<128x32xf32>
    %44 = arith.addf %41, %43 : vector<128x32xf32>
    %c258 = arith.constant 258 : index
    %c0_19 = arith.constant 0 : index
    %45 = vector.load %arg4[%c258, %c0_19] : memref<262x32xf32, #tpu.memory_space<vmem>>, vector<1x32xf32>
    %c259 = arith.constant 259 : index
    %c0_20 = arith.constant 0 : index
    %46 = vector.load %arg4[%c259, %c0_20] : memref<262x32xf32, #tpu.memory_space<vmem>>, vector<1x32xf32>
    %c260 = arith.constant 260 : index
    %c0_21 = arith.constant 0 : index
    %47 = vector.load %arg4[%c260, %c0_21] : memref<262x32xf32, #tpu.memory_space<vmem>>, vector<1x32xf32>
    %c261 = arith.constant 261 : index
    %c0_22 = arith.constant 0 : index
    %48 = vector.load %arg4[%c261, %c0_22] : memref<262x32xf32, #tpu.memory_space<vmem>>, vector<1x32xf32>
    %49 = arith.addf %0, %44 : vector<128x32xf32>
    %cst_23 = arith.constant dense<0.000000e+00> : vector<128xf32>
    %50 = vector.multi_reduction <add>, %49, %cst_23 [1] : vector<128x32xf32> to vector<128xf32>
    %51 = vector.shape_cast %50 : vector<128xf32> to vector<128x1xf32>
    %cst_24 = arith.constant 3.200000e+01 : f32
    %52 = vector.broadcast %cst_24 : f32 to vector<128x1xf32>
    %53 = arith.divf %51, %52 : vector<128x1xf32>
    %54 = vector.broadcast %53 : vector<128x1xf32> to vector<128x32xf32>
    %55 = arith.subf %49, %54 : vector<128x32xf32>
    %56 = vector.broadcast %53 : vector<128x1xf32> to vector<128x32xf32>
    %57 = arith.subf %49, %56 : vector<128x32xf32>
    %58 = arith.mulf %55, %57 : vector<128x32xf32>
    %cst_25 = arith.constant dense<0.000000e+00> : vector<128xf32>
    %59 = vector.multi_reduction <add>, %58, %cst_25 [1] : vector<128x32xf32> to vector<128xf32>
    %60 = vector.shape_cast %59 : vector<128xf32> to vector<128x1xf32>
    %cst_26 = arith.constant 3.200000e+01 : f32
    %61 = vector.broadcast %cst_26 : f32 to vector<128x1xf32>
    %62 = arith.divf %60, %61 : vector<128x1xf32>
    %63 = vector.broadcast %53 : vector<128x1xf32> to vector<128x32xf32>
    %64 = arith.subf %49, %63 : vector<128x32xf32>
    %cst_27 = arith.constant 9.99999996E-13 : f32
    %65 = vector.broadcast %cst_27 : f32 to vector<128x1xf32>
    %66 = arith.addf %62, %65 : vector<128x1xf32>
    %67 = math.rsqrt %66 : vector<128x1xf32>
    %68 = vector.broadcast %67 : vector<128x1xf32> to vector<128x32xf32>
    %69 = arith.mulf %64, %68 : vector<128x32xf32>
    %70 = vector.broadcast %45 : vector<1x32xf32> to vector<128x32xf32>
    %71 = arith.mulf %69, %70 : vector<128x32xf32>
    %72 = vector.broadcast %46 : vector<1x32xf32> to vector<128x32xf32>
    %73 = arith.addf %71, %72 : vector<128x32xf32>
    %c0_28 = arith.constant 0 : index
    %c384 = arith.constant 384 : index
    %74 = vector.load %arg3[%c0_28, %c384] : memref<33x640xf32, #tpu.memory_space<vmem>>, vector<32x128xf32>
    %cst_29 = arith.constant dense<0.000000e+00> : vector<128x128xf32>
    %75 = tpu.matmul %73, %74, %cst_29 {dimension_numbers = #tpu.dot_dimension_numbers<[1], [0], [0], [1], [0, 0, 1, 1], [], []>} : vector<128x32xf32>, vector<32x128xf32>, vector<128x128xf32> -> vector<128x128xf32>
    %c32_30 = arith.constant 32 : index
    %c384_31 = arith.constant 384 : index
    %76 = vector.load %arg3[%c32_30, %c384_31] : memref<33x640xf32, #tpu.memory_space<vmem>>, vector<1x128xf32>
    %77 = vector.broadcast %76 : vector<1x128xf32> to vector<128x128xf32>
    %78 = arith.addf %75, %77 : vector<128x128xf32>
    %cst_32 = arith.constant 5.000000e-01 : f32
    %79 = vector.broadcast %cst_32 : f32 to vector<128x128xf32>
    %80 = arith.mulf %79, %78 : vector<128x128xf32>
    %cst_33 = arith.constant 4.471500e-02 : f32
    %81 = vector.broadcast %cst_33 : f32 to vector<128x128xf32>
    %82 = arith.mulf %81, %78 : vector<128x128xf32>
    %83 = arith.mulf %82, %78 : vector<128x128xf32>
    %84 = arith.mulf %83, %78 : vector<128x128xf32>
    %85 = arith.addf %78, %84 : vector<128x128xf32>
    %cst_34 = arith.constant 0.797884583 : f32
    %86 = vector.broadcast %cst_34 : f32 to vector<128x128xf32>
    %87 = arith.mulf %86, %85 : vector<128x128xf32>
    %88 = math.tanh %87 : vector<128x128xf32>
    %cst_35 = arith.constant 1.000000e+00 : f32
    %89 = vector.broadcast %cst_35 : f32 to vector<128x128xf32>
    %90 = arith.addf %89, %88 : vector<128x128xf32>
    %91 = arith.mulf %80, %90 : vector<128x128xf32>
    %c128 = arith.constant 128 : index
    %c0_36 = arith.constant 0 : index
    %92 = vector.load %arg4[%c128, %c0_36] : memref<262x32xf32, #tpu.memory_space<vmem>>, vector<128x32xf32>
    %cst_37 = arith.constant dense<0.000000e+00> : vector<128x32xf32>
    %93 = tpu.matmul %91, %92, %cst_37 {dimension_numbers = #tpu.dot_dimension_numbers<[1], [0], [0], [1], [0, 0, 1, 1], [], []>} : vector<128x128xf32>, vector<128x32xf32>, vector<128x32xf32> -> vector<128x32xf32>
    %c257 = arith.constant 257 : index
    %c0_38 = arith.constant 0 : index
    %94 = vector.load %arg4[%c257, %c0_38] : memref<262x32xf32, #tpu.memory_space<vmem>>, vector<1x32xf32>
    %95 = vector.broadcast %94 : vector<1x32xf32> to vector<128x32xf32>
    %96 = arith.addf %93, %95 : vector<128x32xf32>
    %97 = arith.addf %73, %96 : vector<128x32xf32>
    %cst_39 = arith.constant dense<0.000000e+00> : vector<128xf32>
    %98 = vector.multi_reduction <add>, %97, %cst_39 [1] : vector<128x32xf32> to vector<128xf32>
    %99 = vector.shape_cast %98 : vector<128xf32> to vector<128x1xf32>
    %cst_40 = arith.constant 3.200000e+01 : f32
    %100 = vector.broadcast %cst_40 : f32 to vector<128x1xf32>
    %101 = arith.divf %99, %100 : vector<128x1xf32>
    %102 = vector.broadcast %101 : vector<128x1xf32> to vector<128x32xf32>
    %103 = arith.subf %97, %102 : vector<128x32xf32>
    %104 = vector.broadcast %101 : vector<128x1xf32> to vector<128x32xf32>
    %105 = arith.subf %97, %104 : vector<128x32xf32>
    %106 = arith.mulf %103, %105 : vector<128x32xf32>
    %cst_41 = arith.constant dense<0.000000e+00> : vector<128xf32>
    %107 = vector.multi_reduction <add>, %106, %cst_41 [1] : vector<128x32xf32> to vector<128xf32>
    %108 = vector.shape_cast %107 : vector<128xf32> to vector<128x1xf32>
    %cst_42 = arith.constant 3.200000e+01 : f32
    %109 = vector.broadcast %cst_42 : f32 to vector<128x1xf32>
    %110 = arith.divf %108, %109 : vector<128x1xf32>
    %111 = vector.broadcast %101 : vector<128x1xf32> to vector<128x32xf32>
    %112 = arith.subf %97, %111 : vector<128x32xf32>
    %cst_43 = arith.constant 9.99999996E-13 : f32
    %113 = vector.broadcast %cst_43 : f32 to vector<128x1xf32>
    %114 = arith.addf %110, %113 : vector<128x1xf32>
    %115 = math.rsqrt %114 : vector<128x1xf32>
    %116 = vector.broadcast %115 : vector<128x1xf32> to vector<128x32xf32>
    %117 = arith.mulf %112, %116 : vector<128x32xf32>
    %118 = vector.broadcast %47 : vector<1x32xf32> to vector<128x32xf32>
    %119 = arith.mulf %117, %118 : vector<128x32xf32>
    %120 = vector.broadcast %48 : vector<1x32xf32> to vector<128x32xf32>
    %121 = arith.addf %119, %120 : vector<128x32xf32>
    %c0_44 = arith.constant 0 : index
    %c512 = arith.constant 512 : index
    %122 = vector.load %arg3[%c0_44, %c512] : memref<33x640xf32, #tpu.memory_space<vmem>>, vector<32x128xf32>
    %cst_45 = arith.constant dense<0.000000e+00> : vector<128x128xf32>
    %123 = tpu.matmul %121, %122, %cst_45 {dimension_numbers = #tpu.dot_dimension_numbers<[1], [0], [0], [1], [0, 0, 1, 1], [], []>} : vector<128x32xf32>, vector<32x128xf32>, vector<128x128xf32> -> vector<128x128xf32>
    %c32_46 = arith.constant 32 : index
    %c512_47 = arith.constant 512 : index
    %124 = vector.load %arg3[%c32_46, %c512_47] : memref<33x640xf32, #tpu.memory_space<vmem>>, vector<1x128xf32>
    %125 = vector.broadcast %124 : vector<1x128xf32> to vector<128x128xf32>
    %126 = arith.addf %123, %125 : vector<128x128xf32>
    %127 = vector.extract_strided_slice %126 {offsets = [0, 0], sizes = [128, 4], strides = [1, 1]} : vector<128x128xf32> to vector<128x4xf32>
    %cst_48 = arith.constant dense<0xFF800000> : vector<4xf32>
    %128 = vector.multi_reduction <maximumf>, %127, %cst_48 [0] : vector<128x4xf32> to vector<4xf32>
    %129 = vector.shape_cast %128 : vector<4xf32> to vector<1x4xf32>
    %130 = vector.broadcast %129 : vector<1x4xf32> to vector<128x4xf32>
    %131 = arith.subf %127, %130 : vector<128x4xf32>
    %132 = math.exp %131 : vector<128x4xf32>
    %cst_49 = arith.constant dense<0.000000e+00> : vector<128x4xf32>
    %133 = tpu.matmul %17, %132, %cst_49 {dimension_numbers = #tpu.dot_dimension_numbers<[1], [0], [0], [1], [0, 0, 1, 1], [], []>} : vector<128x128xf32>, vector<128x4xf32>, vector<128x4xf32> -> vector<128x4xf32>
    %134 = arith.divf %132, %133 : vector<128x4xf32>
    %cst_50 = arith.constant dense<0xFF800000> : vector<128xf32>
    %135 = vector.multi_reduction <maximumf>, %134, %cst_50 [1] : vector<128x4xf32> to vector<128xf32>
    %136 = vector.shape_cast %135 : vector<128xf32> to vector<128x1xf32>
    %137 = tpu.iota {dimensions = array<i32: 1>} : vector<128x4xi32>
    %138 = vector.broadcast %136 : vector<128x1xf32> to vector<128x4xf32>
    %139 = arith.cmpf oge, %134, %138 : vector<128x4xf32>
    %c4_i32_51 = arith.constant 4 : i32
    %140 = vector.broadcast %c4_i32_51 : i32 to vector<128x4xi32>
    %141 = arith.select %139, %137, %140 : vector<128x4xi1>, vector<128x4xi32>
    %cst_52 = arith.constant dense<2147483647> : vector<128xi32>
    %142 = vector.multi_reduction <minsi>, %141, %cst_52 [1] : vector<128x4xi32> to vector<128xi32>
    %143 = vector.shape_cast %142 : vector<128xi32> to vector<128x1xi32>
    %144 = arith.sitofp %143 : vector<128x1xi32> to vector<128x1xf32>
    %cst_53 = arith.constant 0.000000e+00 : f32
    %145 = vector.broadcast %cst_53 : f32 to vector<128x123xf32>
    %146 = tpu.concatenate %134, %144, %145 in 1 : vector<128x4xf32>, vector<128x1xf32>, vector<128x123xf32> -> vector<128x128xf32>
    %c0_54 = arith.constant 0 : index
    %c0_55 = arith.constant 0 : index
    %147 = vector.load %arg5[%c0_54, %c0_55] : memref<128x128xf32, #tpu.memory_space<vmem>>, vector<128x128xf32>
    tpu.vector_store %arg5[%c0_54, %c0_55], %146 {strides = array<i32>} : memref<128x128xf32, #tpu.memory_space<vmem>>, vector<128x128xf32>,
    return
  }
  func.func @transform_0(%arg0: i32) -> (i32, i32) {
    %c0_i32 = arith.constant 0 : i32
    %c0_i32_0 = arith.constant 0 : i32
    return %arg0, %c0_i32 : i32, i32
  }
  func.func @transform_1(%arg0: i32) -> (i32, i32) {
    %c0_i32 = arith.constant 0 : i32
    %c0_i32_0 = arith.constant 0 : i32
    return %arg0, %c0_i32 : i32, i32
  }
  func.func @transform_2(%arg0: i32) -> (i32, i32) {
    %c0_i32 = arith.constant 0 : i32
    %c0_i32_0 = arith.constant 0 : i32
    %c0_i32_1 = arith.constant 0 : i32
    return %c0_i32, %c0_i32_0 : i32, i32
  }
  func.func @transform_3(%arg0: i32) -> (i32, i32) {
    %c0_i32 = arith.constant 0 : i32
    %c0_i32_0 = arith.constant 0 : i32
    %c0_i32_1 = arith.constant 0 : i32
    return %c0_i32, %c0_i32_0 : i32, i32
  }
  func.func @transform_4(%arg0: i32) -> (i32, i32) {
    %c0_i32 = arith.constant 0 : i32
    %c0_i32_0 = arith.constant 0 : i32
    return %arg0, %c0_i32 : i32, i32
  }
}

</mosaic_0001>

<bundles_post_ra>
// kernel: tpu_custom_call.1
= control target key start
LH: loop header
LB: loop body
LE: loop exit
PB: predicated region body
PF: predicated region fallthrough
CT: control target
= control target key end

     0   :  { %9 = vsyncpa [#allocation3], 0  ;;  %s5978_s0 = inlined_call_operand.vmem [shape: f32[256,32], index: 0, kind: input, shape index: {}]   ;;  %s5979_s1 = inlined_call_operand.vmem [shape: f32[16,128], index: 1, kind: input, shape index: {}]   ;;  %s5980_s2 = inlined_call_operand.vmem [shape: f32[33,640], index: 2, kind: input, shape index: {}]   ;;  %s5981_s3 = inlined_call_operand.vmem [shape: f32[262,32], index: 3, kind: input, shape index: {}]   ;;  %s5982_s4 = inlined_call_operand.hbm [shape: f32[256,128], index: 4, kind: output, shape index: {}]  }
   0x1   :  { %11 = vsyncpa [#allocation3 + $0x1], 0  ;;  %s3886_s15 = smov 0   ;;  %s3888_s16 = smov 0  }
   0x2   :  { %s3890_s17 = smov 0   ;;  %s3892_s18 = smov 0  }
   0x3 LB: > { %s3907_s19 = sadd.s32 4294967295, %s3853_s18   ;;  %s3359_s20 = sadd.s32 4294967294, %s3853_s18   ;;  %s3853_s18 = sphi %s3892_s18, %s6176_s18   ;;  %s3849_s17 = sphi %s3890_s17, %s6175_s17   ;;  %s3845_s16 = sphi %s3888_s16, %s6174_s16   ;;  %s3841_s15 = sphi %s3886_s15, %s6173_s15  }
   0x4   : > { %s3911_s21 = sadd.s32 1, %s3853_s18   ;;  %s118_s22 = sadd.s32 1, %s3849_s17 }
   0x5   : > { %s115_s23 = ssub.s32 %s3853_s18, %s3911_s21  ;;  %p128_p0 = scmp.ne.s32.totalorder %s3849_s17, %s3845_s16 }
   0x6   : > { %p116_p1 = scmp.eq.s32.totalorder %s115_s23, 0  ;;  %p129_p2 = scmp.eq.s32.totalorder %s3907_s19, 1 }
   0x7   : > { %p134_p3 = scmp.ne.s32.totalorder %s3845_s16, %s3841_s15  ;;  %p135_p4 = scmp.eq.s32.totalorder %s3359_s20, 1 }
   0x8   : > { %s3922_s24 = scalar_select %p116_p1, %s3849_s17, %s118_s22  }
   0x9   : > { %p3924_p5 = por %p129_p2, %p128_p0  ;;  %p3928_p6 = por %p135_p4, %p134_p3 }
   0xa   : > { %p3362_p7 = scmp.ge.s32.totalorder %s3853_s18, 1  ;;  %p175_p8 = scmp.lt.s32.totalorder %s3853_s18, 3 }
   0xc   : > { %p176_p9 = pnand %p3362_p7, %p175_p8 }
   0xd   : > { %s3364_s5 = sshll.u32 (!%p176_p9), %s3907_s19, 4  ;;  %p211_p11 = scmp.lt.s32.totalorder (!%p176_p9), %s3907_s19, 1 }
   0xe   : > { %179 = sbr.rel (%p176_p9) target bundleno = 2861 (0xb2d), region = 36  ;;  %p206_p10 = scmp.lt.s32.totalorder (!%p176_p9), %s3364_s5, 31 }
   0xf   : > { %s202_s23 = sand.u32 (!%p176_p9), 1, %s3845_s16   ;;  %s3811_s13 = scalar_lea.hbm (!%p176_p9), %s5982_s4, 256 }
  0x13   : > { %v362_v0 = vld [vmem:[%s5980_s2 + $0x78] sm:$0xff]  ;;  %v359_v1 = vld [vmem:[%s5980_s2 + $0x50] sm:$0xff]  ;;  %v363_v2 = vld [vmem:[%s5980_s2 + $0x80] sm:$0xff]  ;;  %s6178_s5 = smov (!%p206_p10, %s3364_s5), 31  ;;  %vm5983_vm0 = vcmask 261120  }
  0x14   : > { %3486 = vmatpush.msra.mxu2 %v362_v0  ;;  %435 = vmatpush.msra.mxu0 %v362_v0  ;;  %v356_v3 = vld [vmem:[%s5980_s2 + $0x28] sm:$0xff]  ;;  %v353_v4 = vld [vmem:[%s5980_s2] sm:$0xff]  ;;  %v360_v5 = vld [vmem:[%s5980_s2 + $0x58] sm:$0xff]  ;;  %s3365_s14 = sshll.u32 %s6178_s5, 3 }
  0x15   : > { %500 = vmatpush.msra.mxu1 %v363_v2  ;;  %3487 = vmatpush.msra.mxu3 %v362_v0  ;;  %v357_v6 = vld [vmem:[%s5980_s2 + $0x30] sm:$0xff]  ;;  %s3959_s28 = scalar_lea.vmem %s5978_s0, %s3365_s14  ;;  %v354_v8 = vld [vmem:[%s5980_s2 + $0x8] sm:$0xff]  ;;  %v361_v36 = vld [vmem:[%s5980_s2 + $0x60] sm:$0xff] }
  0x16   : > { %3488 = vmatpush.msra.mxu2 %v359_v1  ;;  %436 = vmatpush.msra.mxu0 %v359_v1  ;;  %v3962_v7 = vld [vmem:[%s3959_s28 + $0x48] sm:$0xff]  ;;  %v3970_v9 = vld [vmem:[%s3959_s28] sm:$0xff]  ;;  %v3975_v10 = vld [vmem:[%s3959_s28 + $0x50] sm:$0xff]  ;;  %s212_s20 = scalar_select %p211_p11, %s3907_s19, 1 }
  0x17   : > { %501 = vmatpush.msra.mxu1 %v360_v5  ;;  %3489 = vmatpush.msra.mxu3 %v359_v1  ;;  %v3982_v11 = vld [vmem:[%s3959_s28 + $0x8] sm:$0xff]  ;;  %v3989_v12 = vld [vmem:[%s3959_s28 + $0x58] sm:$0xff]  ;;  %v3996_v13 = vld [vmem:[%s3959_s28 + $0x10] sm:$0xff] }
  0x18   : > { %3490 = vmatpush.msra.mxu2 %v356_v3  ;;  %437 = vmatpush.msra.mxu0 %v356_v3  ;;  %v4003_v14 = vld [vmem:[%s3959_s28 + $0x60] sm:$0xff]  ;;  %v4010_v15 = vld [vmem:[%s3959_s28 + $0x18] sm:$0xff]  ;;  %v4017_v16 = vld [vmem:[%s3959_s28 + $0x68] sm:$0xff]  ;;  %s3366_s22 = sshll.u32 %s212_s20, 3 }
  0x19   : > { %502 = vmatpush.msra.mxu1 %v357_v6  ;;  %3491 = vmatpush.msra.mxu3 %v356_v3  ;;  %v4024_v17 = vld [vmem:[%s3959_s28 + $0x20] sm:$0xff]  ;;  %v4031_v18 = vld [vmem:[%s3959_s28 + $0x70] sm:$0xff]  ;;  %v4038_v19 = vld [vmem:[%s3959_s28 + $0x28] sm:$0xff]  ;;  %s214_s29 = scalar_lea.vmem %s5979_s1, %s3366_s22 }
  0x1a   : > { %3492 = vmatpush.msra.mxu2 %v353_v4  ;;  %438 = vmatpush.msra.mxu0 %v353_v4  ;;  %v4045_v20 = vld [vmem:[%s3959_s28 + $0x78] sm:$0xff]  ;;  %v4052_v21 = vld [vmem:[%s3959_s28 + $0x30] sm:$0xff]  ;;  %v4070_v23 = vld [vmem:[%s3959_s28 + $0x40] sm:$0xff] }
  0x1b   : > { %3393 = vmatmul.msk.f32.vlgmr.msra.gmra.mxu2 %vm5983_vm0, %v3962_v7  ;;  %503 = vmatpush.msra.mxu1 %v354_v8  ;;  %v4061_v22 = vld [vmem:[%s3959_s28 + $0x38] sm:$0xff]  ;;  %v364_v35 = vld [vmem:[%s5980_s2 + $0x88] sm:$0xff]  ;;  %v355_v40 = vld [vmem:[%s5980_s2 + $0x10] sm:$0xff] }
  0x1c   : > { %3494 = vmatpush.msrb.mxu2 %v363_v2  ;;  %3400 = vmatmul.msk.f32.vlgmr.msra.gmra.mxu1 %vm5983_vm0, %v3970_v9  ;;  %v358_v37 = vld [vmem:[%s5980_s2 + $0x38] sm:$0xff]  ;;  %v4097_v41 = vld [vmem:[%s5980_s2 + $0xa0] ss:$8 sm:$0x7] }
  0x1d   : > { %3384 = vmatmul.msk.f32.vlgmr.msra.gmra.mxu0 %vm5983_vm0, %v3970_v9  ;;  %3493 = vmatpush.msra.mxu3 %v353_v4  ;;  %v369_v42 = vperm.slane %v4097_v41, 1  ;;  %v4115_v0 = vperm.slane %v4097_v41, 0 }
  0x1e   : > { %3495 = vmatpush.msrb.mxu2 %v360_v5  ;;  %3394 = vmatmul.msk.f32.vlgmr.msra.gmra.mxu3 %vm5983_vm0, %v3975_v10 }
  0x20   : > { %3496 = vmatpush.msrb.mxu2 %v357_v6 }
  0x22   : > { %3497 = vmatpush.msrb.mxu2 %v354_v8 }
  0x23   : > { %3409 = vmatmul.msk.f32.vlgmr.msrb.gmra.mxu2 %vm5983_vm0, %v3962_v7 }
  0x24   : > { %3401 = vmatmul.msk.f32.gmra.mxu1 %vm5983_vm0, %v3982_v11  ;;  %565 = vmatpush.msra.mxu2 %v364_v35 }
  0x25   : > { %3385 = vmatmul.msk.f32.gmra.mxu0 %vm5983_vm0, %v3982_v11 }
  0x26   : > { %3395 = vmatmul.msk.f32.gmra.mxu3 %vm5983_vm0, %v3989_v12  ;;  %566 = vmatpush.msra.mxu2 %v361_v36  ;;  %v284_v36 = vld [vmem:[%s214_s29] sm:$0x1]  ;;  %s3485_s29 = sshll.u32 %s3907_s19, 7  ;;  %s3270_s19 = scalar_lea.sflag [#allocation3], %s202_s23 }
  0x27   : > { %vm285_vm1 = vcmp.gt.f32.partialorder %v284_v36, 0.5  ;;  %s3281_s6 = scalar_lea.hbm %s5982_s4, %s3485_s29 }
  0x28   : > { %567 = vmatpush.msra.mxu2 %v358_v37  ;;  %s3284_s8 = sshll.u32 %s3281_s6, 4  ;;  %s3285_s8 = int_to_ptr.hbm [resolvable:$true] %s3284_s8 }
  0x29   : > { %s3805_s9 = sshra.s32 %s3285_s8, 4  ;;  %s3806_s9 = int_to_ptr.hbm [resolvable:$true] %s3805_s9 }
  0x2a   : > { %568 = vmatpush.msra.mxu2 %v355_v40  ;;  %s3807_s10 = scalar_lea.hbm %s3806_s9, 128  ;;  %p3812_p1 = scmp.lt.s32.totalorder %s3806_s9, %s5982_s4 }
  0x2b   : > { %3410 = vmatmul.msk.f32.gmra.mxu2 %vm5983_vm0, %v3975_v10  ;;  %p3808_p12 = scmp.ne.s32.totalorder %s3806_s9, %s3807_s10  ;;  %p3813_p2 = scmp.lt.s32.totalorder %s3811_s13, %s3807_s10 }
  0x2c   : > { %3402 = vmatmul.msk.f32.gmra.mxu1 %vm5983_vm0, %v3996_v13 }
  0x2d   : > { %3386 = vmatmul.msk.f32.gmra.mxu0 %vm5983_vm0, %v3996_v13  ;;  %p3809_p13 = pnand %p3808_p12, %p3924_p5  ;;  %p3814_p3 = por %p3813_p2, %p3812_p1 }
  0x2e   : > { %3396 = vmatmul.msk.f32.gmra.mxu3 %vm5983_vm0, %v4003_v14 }
  0x2f   : > { %p3810_p0 = pneg %p3809_p13 }
  0x31   : > { %p3815_p4 = pnand %p3814_p3, %p3810_p0 }
  0x33   : > { %3411 = vmatmul.msk.f32.gmra.mxu2 %vm5983_vm0, %v3989_v12 }
  0x34   : > { %3403 = vmatmul.msk.f32.gmra.mxu1 %vm5983_vm0, %v4010_v15 }
  0x35   : > { %3387 = vmatmul.msk.f32.gmra.mxu0 %vm5983_vm0, %v4010_v15 }
  0x36   : > { %3397 = vmatmul.msk.f32.gmra.mxu3 %vm5983_vm0, %v4017_v16 }
  0x3b   : > { %3412 = vmatmul.msk.f32.gmra.mxu2 %vm5983_vm0, %v4003_v14 }
  0x3c   : > { %3404 = vmatmul.msk.f32.gmra.mxu1 %vm5983_vm0, %v4024_v17 }
  0x3d   : > { %3388 = vmatmul.msk.f32.gmra.mxu0 %vm5983_vm0, %v4024_v17 }
  0x3e   : > { %3398 = vmatmul.msk.f32.gmra.mxu3 %vm5983_vm0, %v4031_v18 }
  0x43   : > { %3413 = vmatmul.msk.f32.gmra.mxu2 %vm5983_vm0, %v4017_v16 }
  0x44   : > { %3405 = vmatmul.msk.f32.gmra.mxu1 %vm5983_vm0, %v4038_v19 }
  0x45   : > { %3389 = vmatmul.msk.f32.gmra.mxu0 %vm5983_vm0, %v4038_v19 }
  0x46   : > { %3399 = vmatmul.msk.f32.gmra.mxu3 %vm5983_vm0, %v4045_v20 }
  0x4b   : > { %3414 = vmatmul.msk.f32.gmra.mxu2 %vm5983_vm0, %v4031_v18 }
  0x4c   : > { %3406 = vmatmul.msk.f32.gmra.mxu1 %vm5983_vm0, %v4052_v21 }
  0x4d   : > { %3390 = vmatmul.msk.f32.gmra.mxu0 %vm5983_vm0, %v4052_v21 }
  0x53   : > { %3415 = vmatmul.msk.f32.gmra.mxu2 %vm5983_vm0, %v4045_v20 }
  0x54   : > { %3407 = vmatmul.msk.f32.gmra.mxu1 %vm5983_vm0, %v4061_v22 }
  0x55   : > { %3391 = vmatmul.msk.f32.gmra.mxu0 %vm5983_vm0, %v4061_v22 }
  0x5b   : > { %3416 = vmatmul.msk.f32.vlgmr.msra.gmra.mxu2 %vm5983_vm0, %v3970_v9 }
  0x5c   : > { %3408 = vmatmul.msk.f32.gmra.mxu1 %vm5983_vm0, %v4070_v23 }
  0x5d   : > { %3392 = vmatmul.msk.f32.gmra.mxu0 %vm5983_vm0, %v4070_v23 }
  0x63   : > { %3417 = vmatmul.msk.f32.gmra.mxu2 %vm5983_vm0, %v3982_v11 }
  0x6b   : > { %3418 = vmatmul.msk.f32.gmra.mxu2 %vm5983_vm0, %v3996_v13 }
  0x73   : > { %3419 = vmatmul.msk.f32.gmra.mxu2 %vm5983_vm0, %v4010_v15 }
  0x7b   : > { %3420 = vmatmul.msk.f32.gmra.mxu2 %vm5983_vm0, %v4024_v17 }
  0x83   : > { %3421 = vmatmul.msk.f32.gmra.mxu2 %vm5983_vm0, %v4038_v19 }
  0x8b   : > { %3422 = vmatmul.msk.f32.gmra.mxu2 %vm5983_vm0, %v4052_v21 }
  0x93   : > { %3423 = vmatmul.msk.f32.gmra.mxu2 %vm5983_vm0, %v4061_v22 }
  0x99   : > { %v4078_v25 = vpop.f32.mrf.mxu1 }
  0x9a   : > { %v440_v58 = vpop.f32.mrf.mxu0  ;;  %v506_v1 = vadd.f32 %v4078_v25, %v369_v42 }
  0x9b   : > { %3424 = vmatmul.msk.f32.gmra.mxu2 %vm5983_vm0, %v4070_v23  ;;  %v441_v2 = vadd.f32 %v440_v58, %v4115_v0 }
  0x9e   : > { %v4076_v24 = vpop.f32.mrf.mxu2 }
  0xa1   : > { %v508_v27 = vpop.f32.mrf.mxu1  ;;  %v470_v21 = vpop.f32.mrf.mxu3 }
  0xa2   : > { %v443_v62 = vpop.f32.mrf.mxu0  ;;  %v509_v63 = vadd.f32 %v508_v27, %v369_v42 }
  0xa3   : > { %3425 = vmatmul.msk.f32.gmra.mxu2 %vm5983_vm0, %v3962_v7  ;;  %v444_v4 = vadd.f32 %v443_v62, %v4115_v0 }
  0xa6   : > { %v532_v26 = vpop.f32.mrf.mxu2 }
  0xa7   : > { %v533_v53 = vadd.f32 %v532_v26, %v369_v42 }
  0xa9   : > { %v511_v29 = vpop.f32.mrf.mxu1  ;;  %v473_v23 = vpop.f32.mrf.mxu3 }
  0xaa   : > { %v512_v61 = vadd.f32 %v511_v29, %v369_v42  ;;  %v446_v3 = vpop.f32.mrf.mxu0  ;;  %v474_v27 = vadd.f32 %v473_v23, %v4115_v0 }
  0xab   : > { %3426 = vmatmul.msk.f32.gmra.mxu2 %vm5983_vm0, %v3975_v10  ;;  %v447_v6 = vadd.f32 %v446_v3, %v4115_v0 }
  0xae   : > { %v535_v28 = vpop.f32.mrf.mxu2 }
  0xaf   : > { %v536_v51 = vadd.f32 %v535_v28, %v369_v42 }
  0xb1   : > { %v514_v31 = vpop.f32.mrf.mxu1  ;;  %v476_v26 = vpop.f32.mrf.mxu3 }
  0xb2   : > { %v515_v60 = vadd.f32 %v514_v31, %v369_v42  ;;  %v449_v5 = vpop.f32.mrf.mxu0  ;;  %v477_v29 = vadd.f32 %v476_v26, %v4115_v0 }
  0xb3   : > { %3427 = vmatmul.msk.f32.gmra.mxu2 %vm5983_vm0, %v3989_v12  ;;  %v450_v9 = vadd.f32 %v449_v5, %v4115_v0 }
  0xb6   : > { %v538_v30 = vpop.f32.mrf.mxu2 }
  0xb7   : > { %v539_v50 = vadd.f32 %v538_v30, %v369_v42 }
  0xb9   : > { %v517_v34 = vpop.f32.mrf.mxu1  ;;  %v479_v30 = vpop.f32.mrf.mxu3 }
  0xba   : > { %v518_v59 = vadd.f32 %v517_v34, %v369_v42  ;;  %v452_v8 = vpop.f32.mrf.mxu0  ;;  %v480_v31 = vadd.f32 %v479_v30, %v4115_v0 }
  0xbb   : > { %3428 = vmatmul.msk.f32.gmra.mxu2 %vm5983_vm0, %v4003_v14  ;;  %v453_v7 = vadd.f32 %v452_v8, %v4115_v0 }
  0xbe   : > { %v541_v32 = vpop.f32.mrf.mxu2 }
  0xbf   : > { %v542_v48 = vadd.f32 %v541_v32, %v369_v42 }
  0xc1   : > { %v520_v39 = vpop.f32.mrf.mxu1 }
  0xc2   : > { %v521_v57 = vadd.f32 %v520_v39, %v369_v42  ;;  %v455_v11 = vpop.f32.mrf.mxu0 }
  0xc3   : > { %3429 = vmatmul.msk.f32.gmra.mxu2 %vm5983_vm0, %v4017_v16  ;;  %v456_v10 = vadd.f32 %v455_v11, %v4115_v0 }
  0xc6   : > { %v544_v33 = vpop.f32.mrf.mxu2 }
  0xc7   : > { %v545_v47 = vadd.f32 %v544_v33, %v369_v42  ;;  %v482_v33 = vpop.f32.mrf.mxu3 }
  0xc8   : > { %v483_v34 = vadd.f32 %v482_v33, %v4115_v0 }
  0xc9   : > { %v523_v45 = vpop.f32.mrf.mxu1 }
  0xca   : > { %v524_v56 = vadd.f32 %v523_v45, %v369_v42  ;;  %v458_v13 = vpop.f32.mrf.mxu0 }
  0xcb   : > { %3430 = vmatmul.msk.f32.gmra.mxu2 %vm5983_vm0, %v4031_v18  ;;  %v459_v12 = vadd.f32 %v458_v13, %v4115_v0  ;;  %v468_v18 = vadd.f32 %v4076_v24, %v4115_v0 }
  0xce   : > { %v547_v38 = vpop.f32.mrf.mxu2 }
  0xcf   : > { %v548_v46 = vadd.f32 %v547_v38, %v369_v42  ;;  %v485_v37 = vpop.f32.mrf.mxu3  ;;  %v232_v38 = vlaneseq }
  0xd0   : > { %v486_v39 = vadd.f32 %v485_v37, %v4115_v0 }
  0xd1   : > { %v526_v49 = vpop.f32.mrf.mxu1  ;;  %v4170_v40 = vshrl.u32 %v232_v38, 7 }
  0xd2   : > { %v527_v55 = vadd.f32 %v526_v49, %v369_v42  ;;  %v461_v15 = vpop.f32.mrf.mxu0 }
  0xd3   : > { %3431 = vmatmul.msk.f32.gmra.mxu2 %vm5983_vm0, %v4045_v20  ;;  %v462_v14 = vadd.f32 %v461_v15, %v4115_v0  ;;  %v471_v20 = vadd.f32 %v470_v21, %v4115_v0  ;;  %v236_v3 = vadd.s32 24, %v4170_v40  ;;  %v239_v33 = vadd.s32 48, %v4170_v40 }
  0xd5   : > { %v257_v37 = vshra.s32 %v239_v33, 4  ;;  %v242_v33 = vadd.s32 72, %v4170_v40 }
  0xd6   : > { %v550_v43 = vpop.f32.mrf.mxu2 }
  0xd7   : > { %v551_v44 = vadd.f32 %v550_v43, %v369_v42  ;;  %v3855_v43 = vmov 0  }
  0xd9   : > { %618 = vmatpush.xpose.msrb.mxu3 %v551_v44  ;;  %v529_v52 = vpop.f32.mrf.mxu1  ;;  %v286_v44 = vsel %vm285_vm1, 1, %v3855_v43 }
  0xda   : > { %v530_v54 = vadd.f32 %v529_v52, %v369_v42  ;;  %v464_v17 = vpop.f32.mrf.mxu0  ;;  %v4172_v42 = vand.u32 127, %v232_v38 }
  0xdb   : > { %v465_v16 = vadd.f32 %v464_v17, %v4115_v0 }
  0xdd   : > { %619 = vmatpush.xpose.msrb.mxu3 %v548_v46  ;;  %v251_v46 = vshra.s32 %v4170_v40, 4 }
  0xde   : > { %v4143_v19 = vpop.f32.mrf.mxu2 }
  0xe1   : > { %620 = vmatpush.xpose.msrb.mxu3 %v545_v47  ;;  %v4178_v47 = vshra.s32 %v4172_v42, 4 }
  0xe3   : > { %vm4181_vm2 = vcmp.eq.s32.totalorder %v251_v46, %v4178_v47  ;;  %vm4272_vm15 = vcmp.eq.s32.totalorder %v257_v37, %v4178_v47  ;;  %v240_v46 = vadd.s32 56, %v4170_v40 }
  0xe5   : > { %621 = vmatpush.xpose.msrb.mxu3 %v542_v48  ;;  %v287_v48 = vperm.slane %v286_v44, 0 }
  0xe6   : > { %v4147_v22 = vpop.f32.mrf.mxu2 }
  0xe7   : > { %vm4185_vm3 = vcmp.eq.s32.totalorder %v287_v48, 1 }
  0xe8   : > { %vm289_vm4 = vmand %vm4181_vm2, %vm4185_vm3 }
  0xe9   : > { %622 = vmatpush.xpose.msrb.mxu3 %v539_v50  ;;  %vm295_vm1 = vmand %vm4272_vm15, %vm4185_vm3 }
  0xed   : > { %623 = vmatpush.xpose.msrb.mxu3 %v536_v51  ;;  %v234_v51 = vadd.s32 8, %v4170_v40 }
  0xee   : > { %v4150_v25 = vpop.f32.mrf.mxu2 }
  0xf1   : > { %624 = vmatpush.xpose.msrb.mxu3 %v533_v53  ;;  %v252_v53 = vshra.s32 %v234_v51, 4 }
  0xf3   : > { %vm4198_vm5 = vcmp.eq.s32.totalorder %v252_v53, %v4178_v47  ;;  %v258_v53 = vshra.s32 %v240_v46, 4 }
  0xf4   : > { %vm290_vm6 = vmand %vm4198_vm5, %vm4185_vm3 }
  0xf5   : > { %625 = vmatpush.xpose.msrb.mxu3 %v530_v54 }
  0xf6   : > { %v4153_v28 = vpop.f32.mrf.mxu2 }
  0xf9   : > { %626 = vmatpush.xpose.msrb.mxu3 %v527_v55  ;;  %v3856_v55 = vmov -1e+09  }
  0xfa   : > { %v306_v0 = vsel %vm290_vm6, 0.0, %v3856_v55 }
  0xfd   : > { %627 = vmatpush.xpose.msrb.mxu3 %v524_v56  ;;  %v305_v56 = vsel %vm289_vm4, 0.0, %v3856_v55  ;;  %vm4287_vm4 = vcmp.eq.s32.totalorder %v258_v53, %v4178_v47  ;;  %v6014_v53 = vmov 0 }
  0xfe   : > { %v4156_v24 = vpop.f32.mrf.mxu2  ;;  %vm296_vm6 = vmand %vm4287_vm4, %vm4185_vm3 }
 0x101   : > { %628 = vmatpush.xpose.msrb.mxu3 %v521_v57 }
 0x105   : > { %629 = vmatpush.xpose.msrb.mxu3 %v518_v59  ;;  %v235_v59 = vadd.s32 16, %v4170_v40 }
 0x106   : > { %v4160_v32 = vpop.f32.mrf.mxu2 }
 0x107   : > { %v253_v62 = vshra.s32 %v235_v59, 4 }
 0x109   : > { %630 = vmatpush.xpose.msrb.mxu3 %v515_v60  ;;  %vm4214_vm7 = vcmp.eq.s32.totalorder %v253_v62, %v4178_v47 }
 0x10a   : > { %vm291_vm8 = vmand %vm4214_vm7, %vm4185_vm3 }
 0x10d   : > { %631 = vmatpush.xpose.msrb.mxu3 %v512_v61 }
 0x10e   : > { %v4167_v35 = vpop.f32.mrf.mxu2 }
 0x111   : > { %632 = vmatpush.xpose.msrb.mxu3 %v509_v63 }
 0x115   : > { %633 = vmatpush.xpose.msrb.mxu3 %v506_v1 }
 0x116   : > { %v4174_v45 = vpop.f32.mrf.mxu2 }
 0x118   : > { %634 = vmatmul.f32.vlgmr.msrb.gmra.mxu3 %v441_v2 }
 0x11e   : > { %v4190_v52 = vpop.f32.mrf.mxu2 }
 0x120   : > { %637 = vmatmul.f32.gmra.mxu3 %v444_v4 }
 0x126   : > { %v4205_v61 = vpop.f32.mrf.mxu2 }
 0x128   : > { %640 = vmatmul.f32.gmra.mxu3 %v447_v6  ;;  %v254_v6 = vshra.s32 %v236_v3, 4 }
 0x12a   : > { %vm4230_vm9 = vcmp.eq.s32.totalorder %v254_v6, %v4178_v47 }
 0x12b   : > { %vm292_vm10 = vmand %vm4230_vm9, %vm4185_vm3 }
 0x12c   : > { %v308_v17 = vsel %vm292_vm10, 0.0, %v3856_v55 }
 0x12e   : > { %v4221_v5 = vpop.f32.mrf.mxu2 }
 0x130   : > { %643 = vmatmul.f32.gmra.mxu3 %v450_v9  ;;  %v307_v9 = vsel %vm291_vm8, 0.0, %v3856_v55 }
 0x138   : > { %646 = vmatmul.f32.gmra.mxu3 %v453_v7 }
 0x140   : > { %649 = vmatmul.f32.gmra.mxu3 %v456_v10  ;;  %v237_v10 = vadd.s32 32, %v4170_v40 }
 0x142   : > { %v255_v15 = vshra.s32 %v237_v10, 4 }
 0x144   : > { %vm4244_vm11 = vcmp.eq.s32.totalorder %v255_v15, %v4178_v47 }
 0x145   : > { %vm293_vm12 = vmand %vm4244_vm11, %vm4185_vm3 }
 0x148   : > { %652 = vmatmul.f32.gmra.mxu3 %v459_v12  ;;  %v603_v12 = vpop.f32.mrf.mxu2 }
 0x150   : > { %655 = vmatmul.f32.gmra.mxu3 %v462_v14 }
 0x158   : > { %658 = vmatmul.f32.gmra.mxu3 %v465_v16 }
 0x160   : > { %661 = vmatmul.f32.gmra.mxu3 %v468_v18  ;;  %v238_v18 = vadd.s32 40, %v4170_v40 }
 0x162   : > { %v256_v26 = vshra.s32 %v238_v18, 4 }
 0x164   : > { %vm4258_vm13 = vcmp.eq.s32.totalorder %v256_v26, %v4178_v47 }
 0x165   : > { %vm294_vm14 = vmand %vm4258_vm13, %vm4185_vm3 }
 0x168   : > { %664 = vmatmul.f32.gmra.mxu3 %v471_v20  ;;  %v606_v20 = vpop.f32.mrf.mxu2 }
 0x170   : > { %667 = vmatmul.f32.gmra.mxu3 %v474_v27  ;;  %v609_v36 = vpop.f32.mrf.mxu2 }
 0x178   : > { %670 = vmatmul.f32.gmra.mxu3 %v477_v29  ;;  %v309_v29 = vsel %vm293_vm12, 0.0, %v3856_v55  ;;  %v612_v51 = vpop.f32.mrf.mxu2 }
 0x180   : > { %673 = vmatmul.f32.gmra.mxu3 %v480_v31 }
 0x188   : > { %676 = vmatmul.f32.gmra.mxu3 %v483_v34 }
 0x190   : > { %679 = vmatmul.f32.gmra.mxu3 %v486_v39  ;;  %v310_v39 = vsel %vm294_vm14, 0.0, %v3856_v55 }
 0x19b   : > { %v635_v54 = vpop.f32.mrf.mxu3 }
 0x19c   : > { %v683_v57 = vmul.f32 0.17677669, %v635_v54  ;;  %v370_v54 = vperm.slane %v4097_v41, 2 }
 0x19e   : > { %v4203_v60 = vadd.f32 %v683_v57, %v305_v56  ;;  %v311_v57 = vsel %vm295_vm1, 0.0, %v3856_v55  ;;  %v610_v41 = vadd.f32 %v609_v36, %v370_v54  ;;  %v604_v10 = vadd.f32 %v603_v12, %v370_v54 }
 0x19f   : > { %v592_v18 = vadd.f32 %v4174_v45, %v370_v54  ;;  %v589_v12 = vadd.f32 %v4167_v35, %v370_v54  ;;  %v580_v26 = vadd.f32 %v4153_v28, %v370_v54  ;;  %v571_v45 = vadd.f32 %v4143_v19, %v370_v54 }
 0x1a0   : > { %715 = vmax.xlane.f32.xlu0 %v4203_v60 }
 0x1a3   : > { %v638_v63 = vpop.f32.mrf.mxu3 }
 0x1a4   : > { %v684_v1 = vmul.f32 0.17677669, %v638_v63 }
 0x1a6   : > { %v4219_v4 = vadd.f32 %v684_v1, %v306_v0  ;;  %v615_v0 = vpop.f32.mrf.mxu2  ;;  %v613_v1 = vadd.f32 %v612_v51, %v370_v54 }
 0x1a7   : > { %v616_v3 = vadd.f32 %v615_v0, %v370_v54 }
 0x1a8   : > { %717 = vmax.xlane.f32.xlu0 %v4219_v4 }
 0x1a9   : > { %1067 = vmatpush.msrb.mxu0 %v616_v3 }
 0x1ab   : > { %v641_v8 = vpop.f32.mrf.mxu3  ;;  %1068 = vmatpush.msrb.mxu0 %v613_v1 }
 0x1ac   : > { %v685_v11 = vmul.f32 0.17677669, %v641_v8  ;;  %v607_v8 = vadd.f32 %v606_v20, %v370_v54  ;;  %v586_v20 = vadd.f32 %v4160_v32, %v370_v54  ;;  %v241_v32 = vadd.s32 64, %v4170_v40 }
 0x1ad   : > { %1069 = vmatpush.msrb.mxu0 %v610_v41  ;;  %v6016_v41 = vmov 0 }
 0x1ae   : > { %v4235_v13 = vadd.f32 %v685_v11, %v307_v9  ;;  %v312_v9 = vsel %vm296_vm6, 0.0, %v3856_v55 }
 0x1af   : > { %1070 = vmatpush.msrb.mxu0 %v607_v8 }
 0x1b0   : > { %719 = vmax.xlane.f32.xlu1 %v4235_v13 }
 0x1b1   : > { %1071 = vmatpush.msrb.mxu0 %v604_v10 }
 0x1b3   : > { %v644_v14 = vpop.f32.mrf.mxu3 }
 0x1b4   : > { %v686_v16 = vmul.f32 0.17677669, %v644_v14  ;;  %v601_v14 = vadd.f32 %v4221_v5, %v370_v54  ;;  %v583_v5 = vadd.f32 %v4156_v24, %v370_v54 }
 0x1b6   : > { %v4249_v23 = vadd.f32 %v686_v16, %v308_v17  ;;  %v598_v17 = vadd.f32 %v4205_v61, %v370_v54  ;;  %v595_v16 = vadd.f32 %v4190_v52, %v370_v54  ;;  %1072 = vmatpush.msrb.mxu0 %v601_v14  ;;  %v577_v61 = vadd.f32 %v4150_v25, %v370_v54 }
 0x1b7   : > { %v574_v52 = vadd.f32 %v4147_v22, %v370_v54  ;;  %v243_v54 = vadd.s32 80, %v4170_v40 }
 0x1b8   : > { %721 = vmax.xlane.f32.xlu1 %v4249_v23  ;;  %1073 = vmatpush.msrb.mxu0 %v598_v17 }
 0x1ba   : > { %1074 = vmatpush.msrb.mxu0 %v595_v16 }
 0x1bb   : > { %v647_v27 = vpop.f32.mrf.mxu3 }
 0x1bc   : > { %v687_v30 = vmul.f32 0.17677669, %v647_v27  ;;  %1075 = vmatpush.msrb.mxu0 %v592_v18 }
 0x1be   : > { %v4263_v34 = vadd.f32 %v687_v30, %v309_v29  ;;  %1076 = vmatpush.msrb.mxu0 %v589_v12  ;;  %v259_v30 = vshra.s32 %v241_v32, 4  ;;  %v6018_v12 = vmov 0 }
 0x1c0   : > { %723 = vmax.xlane.f32.xlu2 %v4263_v34  ;;  %1077 = vmatpush.msrb.mxu0 %v586_v20  ;;  %vm4316_vm8 = vcmp.eq.s32.totalorder %v259_v30, %v4178_v47  ;;  %v245_v20 = vadd.s32 96, %v4170_v40 }
 0x1c1   : > { %vm297_vm10 = vmand %vm4316_vm8, %vm4185_vm3 }
 0x1c2   : > { %1078 = vmatpush.msrb.mxu0 %v583_v5 }
 0x1c3   : > { %v650_v38 = vpop.f32.mrf.mxu3 }
 0x1c4   : > { %v688_v43 = vmul.f32 0.17677669, %v650_v38  ;;  %1079 = vmatpush.msrb.mxu0 %v580_v26  ;;  %v313_v38 = vsel %vm297_vm10, 0.0, %v3856_v55 }
 0x1c6   : > { %v4277_v48 = vadd.f32 %v688_v43, %v310_v39  ;;  %1080 = vmatpush.msrb.mxu0 %v577_v61  ;;  %v260_v39 = vshra.s32 %v242_v33, 4 }
 0x1c8   : > { %725 = vmax.xlane.f32.xlu2 %v4277_v48  ;;  %1081 = vmatpush.msrb.mxu0 %v574_v52  ;;  %vm4334_vm12 = vcmp.eq.s32.totalorder %v260_v39, %v4178_v47  ;;  %v263_v52 = vshra.s32 %v245_v20, 4  ;;  %v6022_v39 = vmov 0 }
 0x1c9   : > { %v6015_v53 = vsel %vm4334_vm12, 4294967295, %v6014_v53  ;;  %vm298_vm14 = vmand %vm4334_vm12, %vm4185_vm3  ;;  %vm6067_vm12 = vcmask 261120  }
 0x1ca   : > { %1082 = vmatpush.msrb.mxu0 %v571_v45  ;;  %v314_v0 = vsel %vm298_vm14, 0.0, %v3856_v55 }
 0x1cb   : > { %v653_v56 = vpop.f32.mrf.mxu3 }
 0x1cc   : > { %v689_v59 = vmul.f32 0.17677669, %v653_v56 }
 0x1ce   : > { %v4291_v63 = vadd.f32 %v689_v59, %v311_v57 }
 0x1d0   : > { %727 = vmax.xlane.f32.xlu0 %v4291_v63 }
 0x1d3   : > { %v656_v6 = vpop.f32.mrf.mxu3 }
 0x1d4   : > { %v690_v11 = vmul.f32 0.17677669, %v656_v6  ;;  %v244_v6 = vadd.s32 88, %v4170_v40 }
 0x1d6   : > { %v4299_v15 = vadd.f32 %v690_v11, %v312_v9 }
 0x1d8   : > { %729 = vmax.xlane.f32.xlu2 %v4299_v15 }
 0x1db   : > { %v659_v35 = vpop.f32.mrf.mxu3 }
 0x1dc   : > { %v691_v37 = vmul.f32 0.17677669, %v659_v35 }
 0x1de   : > { %v4330_v46 = vadd.f32 %v691_v37, %v313_v38 }
 0x1e3   : > { %v662_v28 = vpop.f32.mrf.mxu3 }
 0x1e4   : > { %v692_v59 = vmul.f32 0.17677669, %v662_v28 }
 0x1e6   : > { %v4355_v8 = vadd.f32 %v692_v59, %v314_v0 }
 0x213   : > { %v716_v27 = vpop.xlane.xlu0 %715 }
 0x214   : > { %v747_v24 = vsub.f32 %v4203_v60, %v716_v27 }
 0x216   : > { %v763_v29 = vmul.f32 1.442695, %v747_v24  ;;  %v6020_v24 = vmov 0 }
 0x218   : > { %3549 = vpow2.f32 %v763_v29  ;;  %v246_v29 = vadd.s32 104, %v4170_v40 }
 0x21b   : > { %v718_v22 = vpop.xlane.xlu0 %717 }
 0x21c   : > { %v748_v19 = vsub.f32 %v4219_v4, %v718_v22  ;;  %v665_v4 = vpop.f32.mrf.mxu3 }
 0x21d   : > { %v693_v14 = vmul.f32 0.17677669, %v665_v4 }
 0x21e   : > { %v4326_v60 = vpop.eup %3549  ;;  %v765_v36 = vmul.f32 1.442695, %v748_v19 }
 0x21f   : > { %795 = vadd.xlane.f32.xlu1 %v4326_v60 }
 0x220   : > { %3551 = vpow2.f32 %v765_v36 }
 0x223   : > { %v720_v43 = vpop.xlane.xlu1 %719 }
 0x224   : > { %v749_v51 = vsub.f32 %v4235_v13, %v720_v43  ;;  %v261_v13 = vshra.s32 %v243_v54, 4  ;;  %v668_v11 = vpop.f32.mrf.mxu3  ;;  %v247_v43 = vadd.s32 112, %v4170_v40 }
 0x225   : > { %v694_v45 = vmul.f32 0.17677669, %v668_v11 }
 0x226   : > { %v4339_v56 = vpop.eup %3551  ;;  %v767_v57 = vmul.f32 1.442695, %v749_v51  ;;  %vm4350_vm1 = vcmp.eq.s32.totalorder %v261_v13, %v4178_v47 }
 0x227   : > { %797 = vadd.xlane.f32.xlu0 %v4339_v56  ;;  %731 = vmax.xlane.f32.xlu1 %v4330_v46  ;;  %v6017_v41 = vsel %vm4350_vm1, 4294967295, %v6016_v41  ;;  %vm299_vm6 = vmand %vm4350_vm1, %vm4185_vm3 }
 0x228   : > { %3553 = vpow2.f32 %v767_v57  ;;  %v315_v17 = vsel %vm299_vm6, 0.0, %v3856_v55  ;;  %vm4386_vm6 = vcmp.eq.s32.totalorder %v263_v52, %v4178_v47 }
 0x229   : > { %v4373_v5 = vadd.f32 %v693_v14, %v315_v17  ;;  %v6021_v24 = vsel %vm4386_vm6, 4294967295, %v6020_v24 }
 0x22b   : > { %v722_v1 = vpop.xlane.xlu1 %721 }
 0x22c   : > { %v750_v3 = vsub.f32 %v4249_v23, %v722_v1  ;;  %v262_v23 = vshra.s32 %v244_v6, 4  ;;  %v248_v6 = vadd.s32 120, %v4170_v40  ;;  %v6026_v40 = vmov 0 }
 0x22e   : > { %v4357_v9 = vpop.eup %3553  ;;  %v769_v10 = vmul.f32 1.442695, %v750_v3  ;;  %vm4368_vm10 = vcmp.eq.s32.totalorder %v262_v23, %v4178_v47  ;;  %v6024_v3 = vmov 0 }
 0x22f   : > { %799 = vadd.xlane.f32.xlu2 %v4357_v9  ;;  %733 = vmax.xlane.f32.xlu0 %v4355_v8  ;;  %v6019_v12 = vsel %vm4368_vm10, 4294967295, %v6018_v12  ;;  %vm300_vm14 = vmand %vm4368_vm10, %vm4185_vm3 }
 0x230   : > { %3555 = vpow2.f32 %v769_v10  ;;  %v316_v35 = vsel %vm300_vm14, 0.0, %v3856_v55  ;;  %vm301_vm14 = vmand %vm4386_vm6, %vm4185_vm3 }
 0x231   : > { %v4391_v30 = vadd.f32 %v694_v45, %v316_v35  ;;  %v317_v36 = vsel %vm301_vm14, 0.0, %v3856_v55 }
 0x233   : > { %v724_v16 = vpop.xlane.xlu2 %723 }
 0x234   : > { %v751_v18 = vsub.f32 %v4263_v34, %v724_v16  ;;  %v671_v34 = vpop.f32.mrf.mxu3 }
 0x235   : > { %v695_v19 = vmul.f32 0.17677669, %v671_v34 }
 0x236   : > { %v4375_v26 = vpop.eup %3555  ;;  %v771_v61 = vmul.f32 1.442695, %v751_v18 }
 0x237   : > { %801 = vadd.xlane.f32.xlu1 %v4375_v26  ;;  %735 = vmax.xlane.f32.xlu2 %v4373_v5  ;;  %v4409_v4 = vadd.f32 %v695_v19, %v317_v36 }
 0x238   : > { %3557 = vpow2.f32 %v771_v61 }
 0x23b   : > { %v726_v32 = vpop.xlane.xlu2 %725 }
 0x23c   : > { %v752_v27 = vsub.f32 %v4277_v48, %v726_v32  ;;  %v264_v48 = vshra.s32 %v246_v29, 4  ;;  %v674_v33 = vpop.f32.mrf.mxu3 }
 0x23d   : > { %v696_v57 = vmul.f32 0.17677669, %v674_v33 }
 0x23e   : > { %v4393_v22 = vpop.eup %3557  ;;  %v773_v28 = vmul.f32 1.442695, %v752_v27  ;;  %vm4404_vm0 = vcmp.eq.s32.totalorder %v264_v48, %v4178_v47 }
 0x23f   : > { %803 = vadd.xlane.f32.xlu0 %v4393_v22  ;;  %737 = vmax.xlane.f32.xlu1 %v4391_v30  ;;  %v6023_v39 = vsel %vm4404_vm0, 4294967295, %v6022_v39  ;;  %vm302_vm14 = vmand %vm4404_vm0, %vm4185_vm3 }
 0x240   : > { %3559 = vpow2.f32 %v773_v28  ;;  %v318_v13 = vsel %vm302_vm14, 0.0, %v3856_v55 }
 0x241   : > { %v4427_v11 = vadd.f32 %v696_v57, %v318_v13 }
 0x243   : > { %v728_v37 = vpop.xlane.xlu0 %727 }
 0x244   : > { %v753_v38 = vsub.f32 %v4291_v63, %v728_v37  ;;  %v265_v63 = vshra.s32 %v247_v43, 4  ;;  %v677_v0 = vpop.f32.mrf.mxu3 }
 0x245   : > { %v697_v14 = vmul.f32 0.17677669, %v677_v0 }
 0x246   : > { %v4411_v51 = vpop.eup %3559  ;;  %v775_v54 = vmul.f32 1.442695, %v753_v38  ;;  %vm4422_vm6 = vcmp.eq.s32.totalorder %v265_v63, %v4178_v47 }
 0x247   : > { %805 = vadd.xlane.f32.xlu2 %v4411_v51  ;;  %739 = vmax.xlane.f32.xlu0 %v4409_v4  ;;  %v6025_v3 = vsel %vm4422_vm6, 4294967295, %v6024_v3  ;;  %vm303_vm14 = vmand %vm4422_vm6, %vm4185_vm3 }
 0x248   : > { %3561 = vpow2.f32 %v775_v54  ;;  %v319_v17 = vsel %vm303_vm14, 0.0, %v3856_v55 }
 0x249   : > { %v4443_v16 = vadd.f32 %v697_v14, %v319_v17 }
 0x24b   : > { %v730_v59 = vpop.xlane.xlu2 %729 }
 0x24c   : > { %v754_v1 = vsub.f32 %v4299_v15, %v730_v59  ;;  %v266_v15 = vshra.s32 %v248_v6, 4  ;;  %v680_v20 = vpop.f32.mrf.mxu3 }
 0x24d   : > { %v698_v61 = vmul.f32 0.17677669, %v680_v20 }
 0x24e   : > { %v4429_v10 = vpop.eup %3561  ;;  %v777_v23 = vmul.f32 1.442695, %v754_v1  ;;  %vm4439_vm0 = vcmp.eq.s32.totalorder %v266_v15, %v4178_v47 }
 0x24f   : > { %807 = vadd.xlane.f32.xlu1 %v4429_v10  ;;  %741 = vmax.xlane.f32.xlu2 %v4427_v11  ;;  %v6027_v40 = vsel %vm4439_vm0, 4294967295, %v6026_v40  ;;  %vm304_vm6 = vmand %vm4439_vm0, %vm4185_vm3 }
 0x250   : > { %3563 = vpow2.f32 %v777_v23  ;;  %v320_v47 = vsel %vm304_vm6, 0.0, %v3856_v55 }
 0x251   : > { %v4454_v34 = vadd.f32 %v698_v61, %v320_v47 }
 0x256   : > { %v4445_v18 = vpop.eup %3563 }
 0x257   : > { %809 = vadd.xlane.f32.xlu0 %v4445_v18  ;;  %743 = vmax.xlane.f32.xlu1 %v4443_v16 }
 0x25f   : > { %745 = vmax.xlane.f32.xlu0 %v4454_v34 }
 0x292   : > { %v796_v52 = vpop.xlane.xlu1 %795 }
 0x293   : > { %3565 = vrcp.f32 %v796_v52  ;;  %v838_v28 = vand.u32 2147483648, %v796_v52  ;;  %v836_v33 = vand.u32 2147483647, %v796_v52  ;;  %vm832_vm6 = vweird.f32 %v796_v52 }
 0x295   : > { %v839_v37 = vor.u32 1.1754944e-38, %v838_v28  ;;  %vm837_vm0 = vcmp.eq.f32.partialorder %v836_v33, 8.507059e+37 }
 0x299   : > { %v3566_v45 = vpop.eup %3565 }
 0x29a   : > { %v828_v35 = vmul.f32 %v3566_v45, %v796_v52  ;;  %v798_v32 = vpop.xlane.xlu0 %797  ;;  %v732_v27 = vpop.xlane.xlu1 %731  ;;  %vm833_vm3 = vweird.f32 %v3566_v45 }
 0x29b   : > { %3567 = vrcp.f32 %v798_v32  ;;  %v755_v29 = vsub.f32 %v4330_v46, %v732_v27  ;;  %vm834_vm14 = vmor %vm832_vm6, %vm833_vm3  ;;  %v853_v6 = vand.u32 2147483648, %v798_v32  ;;  %v851_v15 = vand.u32 2147483647, %v798_v32 }
 0x29c   : > { %v829_v50 = vsub.f32 1.0, %v828_v35  ;;  %vm847_vm6 = vweird.f32 %v798_v32 }
 0x29d   : > { %v779_v48 = vmul.f32 1.442695, %v755_v29 }
 0x29e   : > { %v830_v19 = vmul.f32 %v3566_v45, %v829_v50 }
 0x29f   : > { %3569 = vpow2.f32 %v779_v48 }
 0x2a0   : > { %v831_v55 = vadd.f32 %v3566_v45, %v830_v19 }
 0x2a1   : > { %v3568_v36 = vpop.eup %3567 }
 0x2a2   : > { %v843_v38 = vmul.f32 %v3568_v36, %v798_v32  ;;  %v800_v43 = vpop.xlane.xlu2 %799  ;;  %v734_v54 = vpop.xlane.xlu0 %733  ;;  %v835_v63 = vsel %vm834_vm14, %v3566_v45, %v831_v55  ;;  %vm848_vm3 = vweird.f32 %v3568_v36 }
 0x2a3   : > { %3571 = vrcp.f32 %v800_v43  ;;  %v756_v46 = vsub.f32 %v4355_v8, %v734_v54  ;;  %v840_v57 = vsel %vm837_vm0, %v839_v37, %v835_v63  ;;  %vm849_vm14 = vmor %vm847_vm6, %vm848_vm3  ;;  %v854_v8 = vor.u32 1.1754944e-38, %v853_v6 }
 0x2a4   : > { %v844_v13 = vsub.f32 1.0, %v843_v38  ;;  %v841_v59 = vmul.f32 %v4326_v60, %v840_v57  ;;  %vm852_vm0 = vcmp.eq.f32.partialorder %v851_v15, 8.507059e+37  ;;  %v868_v28 = vand.u32 2147483648, %v800_v43 }
 0x2a5   : > { %v4460_v0 = vpop.eup %3569  ;;  %v781_v1 = vmul.f32 1.442695, %v756_v46  ;;  %v866_v48 = vand.u32 2147483647, %v800_v43  ;;  %vm862_vm6 = vweird.f32 %v800_v43 }
 0x2a6   : > { %v845_v23 = vmul.f32 %v3568_v36, %v844_v13  ;;  %1083 = vmatmul.f32.vlgmr.msrb.gmra.mxu0 %v841_v59  ;;  %811 = vadd.xlane.f32.xlu2 %v4460_v0 }
 0x2a7   : > { %3573 = vpow2.f32 %v781_v1 }
 0x2a8   : > { %v846_v14 = vadd.f32 %v3568_v36, %v845_v23 }
 0x2a9   : > { %v3572_v17 = vpop.eup %3571 }
 0x2aa   : > { %v858_v20 = vmul.f32 %v3572_v17, %v800_v43  ;;  %v802_v61 = vpop.xlane.xlu1 %801  ;;  %v736_v47 = vpop.xlane.xlu2 %735  ;;  %v850_v60 = vsel %vm849_vm14, %v3568_v36, %v846_v14  ;;  %vm863_vm3 = vweird.f32 %v3572_v17 }
 0x2ab   : > { %3575 = vrcp.f32 %v802_v61  ;;  %v757_v52 = vsub.f32 %v4373_v5, %v736_v47  ;;  %v855_v45 = vsel %vm852_vm0, %v854_v8, %v850_v60  ;;  %vm864_vm14 = vmor %vm862_vm6, %vm863_vm3  ;;  %v869_v5 = vor.u32 1.1754944e-38, %v868_v28  ;;  %v1145_v28 = vld [vmem:[%s5981_s3 + $0x68] sm:$0xff] }
 0x2ac   : > { %v859_v35 = vsub.f32 1.0, %v858_v20  ;;  %v856_v27 = vmul.f32 %v4339_v56, %v855_v45  ;;  %vm867_vm0 = vcmp.eq.f32.partialorder %v866_v48, 8.507059e+37  ;;  %v883_v59 = vand.u32 2147483648, %v802_v61 }
 0x2ad   : > { %v4465_v29 = vpop.eup %3573  ;;  %v783_v50 = vmul.f32 1.442695, %v757_v52  ;;  %v881_v1 = vand.u32 2147483647, %v802_v61  ;;  %vm877_vm6 = vweird.f32 %v802_v61 }
 0x2ae   : > { %v860_v32 = vmul.f32 %v3572_v17, %v859_v35  ;;  %1086 = vmatmul.f32.gmra.mxu0 %v856_v27  ;;  %813 = vadd.xlane.f32.xlu1 %v4465_v29 }
 0x2af   : > { %3577 = vpow2.f32 %v783_v50  ;;  %v1147_v50 = vld [vmem:[%s5981_s3 + $0x78] sm:$0xff] }
 0x2b0   : > { %v861_v19 = vadd.f32 %v3572_v17, %v860_v32  ;;  %1150 = vmatpush.msrb.mxu1 %v1147_v50 }
 0x2b1   : > { %v3576_v33 = vpop.eup %3575 }
 0x2b2   : > { %v873_v55 = vmul.f32 %v3576_v33, %v802_v61  ;;  %v804_v36 = vpop.xlane.xlu0 %803  ;;  %v738_v37 = vpop.xlane.xlu1 %737  ;;  %v865_v56 = vsel %vm864_vm14, %v3572_v17, %v861_v19  ;;  %vm878_vm3 = vweird.f32 %v3576_v33 }
 0x2b3   : > { %3579 = vrcp.f32 %v804_v36  ;;  %v758_v38 = vsub.f32 %v4391_v30, %v738_v37  ;;  %v870_v54 = vsel %vm867_vm0, %v869_v5, %v865_v56  ;;  %vm879_vm14 = vmor %vm877_vm6, %vm878_vm3  ;;  %v884_v30 = vor.u32 1.1754944e-38, %v883_v59  ;;  %v1144_v37 = vld [vmem:[%s5981_s3 + $0x60] sm:$0xff] }
 0x2b4   : > { %v874_v63 = vsub.f32 1.0, %v873_v55  ;;  %v871_v46 = vmul.f32 %v4357_v9, %v870_v54  ;;  %vm882_vm0 = vcmp.eq.f32.partialorder %v881_v1, 8.507059e+37  ;;  %v898_v45 = vand.u32 2147483648, %v804_v36 }
 0x2b5   : > { %v4470_v57 = vpop.eup %3577  ;;  %v785_v13 = vmul.f32 1.442695, %v758_v38  ;;  %v896_v27 = vand.u32 2147483647, %v804_v36  ;;  %vm892_vm6 = vweird.f32 %v804_v36 }
 0x2b6   : > { %v875_v43 = vmul.f32 %v3576_v33, %v874_v63  ;;  %1089 = vmatmul.f32.gmra.mxu0 %v871_v46  ;;  %815 = vadd.xlane.f32.xlu2 %v4470_v57  ;;  %v899_v48 = vor.u32 1.1754944e-38, %v898_v45  ;;  %v1143_v63 = vld [vmem:[%s5981_s3 + $0x58] sm:$0xff] }
 0x2b7   : > { %3581 = vpow2.f32 %v785_v13  ;;  %v1139_v45 = vld [vmem:[%s5981_s3 + $0x38] sm:$0xff] }
 0x2b8   : > { %v876_v6 = vadd.f32 %v3576_v33, %v875_v43 }
 0x2b9   : > { %v3580_v23 = vpop.eup %3579 }
 0x2ba   : > { %v888_v15 = vmul.f32 %v3580_v23, %v804_v36  ;;  %v4473_v14 = vpop.xlane.xlu2 %805  ;;  %v740_v9 = vpop.xlane.xlu0 %739  ;;  %v880_v17 = vsel %vm879_vm14, %v3576_v33, %v876_v6  ;;  %vm893_vm3 = vweird.f32 %v3580_v23  ;;  %v1141_v6 = vld [vmem:[%s5981_s3 + $0x48] sm:$0xff] }
 0x2bb   : > { %3583 = vrcp.f32 %v4473_v14  ;;  %v759_v8 = vsub.f32 %v4409_v4, %v740_v9  ;;  %v885_v20 = vsel %vm882_vm0, %v884_v30, %v880_v17  ;;  %v1146_v4 = vld [vmem:[%s5981_s3 + $0x70] sm:$0xff]  ;;  %vm894_vm14 = vmor %vm892_vm6, %vm893_vm3  ;;  %vm897_vm0 = vcmp.eq.f32.partialorder %v896_v27, 8.507059e+37 }
 0x2bc   : > { %v889_v47 = vsub.f32 1.0, %v888_v15  ;;  %v886_v60 = vmul.f32 %v4375_v26, %v885_v20  ;;  %1151 = vmatpush.msrb.mxu1 %v1146_v4  ;;  %v913_v59 = vand.u32 2147483648, %v4473_v14  ;;  %vm907_vm6 = vweird.f32 %v4473_v14  ;;  %v1140_v20 = vld [vmem:[%s5981_s3 + $0x40] sm:$0xff] }
 0x2bd   : > { %v4478_v52 = vpop.eup %3581  ;;  %v787_v61 = vmul.f32 1.442695, %v759_v8 }
 0x2be   : > { %v890_v35 = vmul.f32 %v3580_v23, %v889_v47  ;;  %1092 = vmatmul.f32.gmra.mxu0 %v886_v60  ;;  %817 = vadd.xlane.f32.xlu0 %v4478_v52  ;;  %v914_v30 = vor.u32 1.1754944e-38, %v913_v59 }
 0x2bf   : > { %3585 = vpow2.f32 %v787_v61  ;;  %1152 = vmatpush.msrb.mxu1 %v1145_v28  ;;  %v1137_v28 = vld [vmem:[%s5981_s3 + $0x28] sm:$0xff] }
 0x2c0   : > { %v891_v26 = vadd.f32 %v3580_v23, %v890_v35 }
 0x2c1   : > { %v3584_v32 = vpop.eup %3583  ;;  %1153 = vmatpush.msrb.mxu1 %v1144_v37 }
 0x2c2   : > { %v903_v19 = vmul.f32 %v3584_v32, %v4473_v14  ;;  %v4491_v33 = vpop.xlane.xlu1 %807  ;;  %v742_v5 = vpop.xlane.xlu2 %741  ;;  %v895_v55 = vsel %vm894_vm14, %v3580_v23, %v891_v26  ;;  %vm908_vm3 = vweird.f32 %v3584_v32 }
 0x2c3   : > { %3587 = vrcp.f32 %v4491_v33  ;;  %v760_v36 = vsub.f32 %v4427_v11, %v742_v5  ;;  %v900_v56 = vsel %vm897_vm0, %v899_v48, %v895_v55  ;;  %v911_v11 = vand.u32 2147483647, %v4473_v14  ;;  %1154 = vmatpush.msrb.mxu1 %v1143_v63  ;;  %vm909_vm14 = vmor %vm907_vm6, %vm908_vm3 }
 0x2c4   : > { %v904_v38 = vsub.f32 1.0, %v903_v19  ;;  %v901_v54 = vmul.f32 %v4393_v22, %v900_v56  ;;  %v1142_v22 = vld [vmem:[%s5981_s3 + $0x50] sm:$0xff]  ;;  %v928_v50 = vand.u32 2147483648, %v4491_v33  ;;  %vm922_vm6 = vweird.f32 %v4491_v33 }
 0x2c5   : > { %v4502_v46 = vpop.eup %3585  ;;  %v789_v13 = vmul.f32 1.442695, %v760_v36  ;;  %1155 = vmatpush.msrb.mxu1 %v1142_v22  ;;  %vm912_vm0 = vcmp.eq.f32.partialorder %v911_v11, 8.507059e+37 }
 0x2c6   : > { %v905_v43 = vmul.f32 %v3584_v32, %v904_v38  ;;  %1095 = vmatmul.f32.gmra.mxu0 %v901_v54  ;;  %819 = vadd.xlane.f32.xlu1 %v4502_v46  ;;  %v929_v48 = vor.u32 1.1754944e-38, %v928_v50 }
 0x2c7   : > { %3589 = vpow2.f32 %v789_v13  ;;  %1156 = vmatpush.msrb.mxu1 %v1141_v6  ;;  %v1136_v6 = vld [vmem:[%s5981_s3 + $0x20] sm:$0xff] }
 0x2c8   : > { %v906_v1 = vadd.f32 %v3584_v32, %v905_v43 }
 0x2c9   : > { %v3588_v23 = vpop.eup %3587  ;;  %1157 = vmatpush.msrb.mxu1 %v1140_v20 }
 0x2ca   : > { %v918_v15 = vmul.f32 %v3588_v23, %v4491_v33  ;;  %v810_v9 = vpop.xlane.xlu0 %809  ;;  %v744_v17 = vpop.xlane.xlu1 %743  ;;  %v910_v8 = vsel %vm909_vm14, %v3584_v32, %v906_v1  ;;  %vm923_vm3 = vweird.f32 %v3588_v23 }
 0x2cb   : > { %3591 = vrcp.f32 %v810_v9  ;;  %v761_v14 = vsub.f32 %v4443_v16, %v744_v17  ;;  %v915_v47 = vsel %vm912_vm0, %v914_v30, %v910_v8  ;;  %v926_v16 = vand.u32 2147483647, %v4491_v33  ;;  %1158 = vmatpush.msrb.mxu1 %v1139_v45  ;;  %vm924_vm14 = vmor %vm922_vm6, %vm923_vm3  ;;  %v1134_v30 = vld [vmem:[%s5981_s3 + $0x10] sm:$0xff] }
 0x2cc   : > { %v919_v60 = vsub.f32 1.0, %v918_v15  ;;  %v916_v61 = vmul.f32 %v4411_v51, %v915_v47  ;;  %v1138_v51 = vld [vmem:[%s5981_s3 + $0x30] sm:$0xff]  ;;  %v943_v63 = vand.u32 2147483648, %v810_v9  ;;  %v941_v59 = vand.u32 2147483647, %v810_v9  ;;  %v1132_v15 = vld [vmem:[%s5981_s3] sm:$0xff] }
 0x2cd   : > { %v4523_v35 = vpop.eup %3589  ;;  %v791_v27 = vmul.f32 1.442695, %v761_v14  ;;  %1159 = vmatpush.msrb.mxu1 %v1138_v51  ;;  %vm927_vm0 = vcmp.eq.f32.partialorder %v926_v16, 8.507059e+37  ;;  %vm937_vm6 = vweird.f32 %v810_v9 }
 0x2ce   : > { %v920_v4 = vmul.f32 %v3588_v23, %v919_v60  ;;  %1098 = vmatmul.f32.gmra.mxu0 %v916_v61  ;;  %821 = vadd.xlane.f32.xlu2 %v4523_v35 }
 0x2cf   : > { %3593 = vpow2.f32 %v791_v27  ;;  %1160 = vmatpush.msrb.mxu1 %v1137_v28 }
 0x2d0   : > { %v921_v26 = vadd.f32 %v3588_v23, %v920_v4 }
 0x2d1   : > { %v3592_v32 = vpop.eup %3591  ;;  %1161 = vmatpush.msrb.mxu1 %v1136_v6 }
 0x2d2   : > { %v933_v19 = vmul.f32 %v3592_v32, %v810_v9  ;;  %v746_v5 = vpop.xlane.xlu0 %745  ;;  %v925_v55 = vsel %vm924_vm14, %v3588_v23, %v921_v26  ;;  %vm938_vm3 = vweird.f32 %v3592_v32  ;;  %v1135_v23 = vld [vmem:[%s5981_s3 + $0x18] sm:$0xff] }
 0x2d3   : > { %v762_v37 = vsub.f32 %v4454_v34, %v746_v5  ;;  %v930_v36 = vsel %vm927_vm0, %v929_v48, %v925_v55  ;;  %vm939_vm14 = vmor %vm937_vm6, %vm938_vm3  ;;  %v944_v34 = vor.u32 1.1754944e-38, %v943_v63  ;;  %vm942_vm0 = vcmp.eq.f32.partialorder %v941_v59, 8.507059e+37  ;;  %1162 = vmatpush.msrb.mxu1 %v1135_v23 }
 0x2d4   : > { %v934_v56 = vsub.f32 1.0, %v933_v19  ;;  %v931_v38 = vmul.f32 %v4429_v10, %v930_v36 }
 0x2d5   : > { %v4537_v33 = vpop.eup %3593  ;;  %v793_v54 = vmul.f32 1.442695, %v762_v37  ;;  %1163 = vmatpush.msrb.mxu1 %v1134_v30 }
 0x2d6   : > { %v935_v13 = vmul.f32 %v3592_v32, %v934_v56  ;;  %1101 = vmatmul.f32.gmra.mxu0 %v931_v38  ;;  %823 = vadd.xlane.f32.xlu0 %v4537_v33 }
 0x2d7   : > { %3595 = vpow2.f32 %v793_v54 }
 0x2d8   : > { %v936_v43 = vadd.f32 %v3592_v32, %v935_v13 }
 0x2da   : > { %v940_v11 = vsel %vm939_vm14, %v3592_v32, %v936_v43 }
 0x2db   : > { %v945_v22 = vsel %vm942_vm0, %v944_v34, %v940_v11 }
 0x2dc   : > { %v946_v10 = vmul.f32 %v4445_v18, %v945_v22  ;;  %v1133_v18 = vld [vmem:[%s5981_s3 + $0x8] sm:$0xff] }
 0x2dd   : > { %v4541_v1 = vpop.eup %3595  ;;  %1164 = vmatpush.msrb.mxu1 %v1133_v18 }
 0x2de   : > { %1104 = vmatmul.f32.gmra.mxu0 %v946_v10  ;;  %825 = vadd.xlane.f32.xlu1 %v4541_v1 }
 0x2df   : > { %1165 = vmatpush.msrb.mxu1 %v1132_v15 }
 0x319   : > { %v812_v9 = vpop.xlane.xlu2 %811 }
 0x31a   : > { %3597 = vrcp.f32 %v812_v9  ;;  %v958_v60 = vand.u32 2147483648, %v812_v9  ;;  %v956_v45 = vand.u32 2147483647, %v812_v9  ;;  %vm952_vm6 = vweird.f32 %v812_v9 }
 0x31c   : > { %v959_v4 = vor.u32 1.1754944e-38, %v958_v60  ;;  %vm957_vm0 = vcmp.eq.f32.partialorder %v956_v45, 8.507059e+37 }
 0x320   : > { %v3598_v17 = vpop.eup %3597 }
 0x321   : > { %v948_v8 = vmul.f32 %v3598_v17, %v812_v9  ;;  %v814_v20 = vpop.xlane.xlu1 %813  ;;  %vm953_vm3 = vweird.f32 %v3598_v17 }
 0x322   : > { %3599 = vrcp.f32 %v814_v20  ;;  %vm954_vm14 = vmor %vm952_vm6, %vm953_vm3  ;;  %v973_v5 = vand.u32 2147483648, %v814_v20  ;;  %v971_v37 = vand.u32 2147483647, %v814_v20  ;;  %vm967_vm1 = vweird.f32 %v814_v20 }
 0x323   : > { %v949_v14 = vsub.f32 1.0, %v948_v8  ;;  %v1084_v47 = vpop.f32.mrf.mxu0 }
 0x324   : > { %1166 = vmatmul.f32.vlgmr.msrb.gmra.mxu1 %v1084_v47  ;;  %v974_v38 = vor.u32 1.1754944e-38, %v973_v5  ;;  %vm972_vm6 = vcmp.eq.f32.partialorder %v971_v37, 8.507059e+37 }
 0x325   : > { %v950_v61 = vmul.f32 %v3598_v17, %v949_v14 }
 0x327   : > { %v951_v27 = vadd.f32 %v3598_v17, %v950_v61 }
 0x328   : > { %v3600_v50 = vpop.eup %3599 }
 0x329   : > { %v963_v16 = vmul.f32 %v3600_v50, %v814_v20  ;;  %v816_v51 = vpop.xlane.xlu2 %815  ;;  %v955_v26 = vsel %vm954_vm14, %v3598_v17, %v951_v27  ;;  %vm968_vm10 = vweird.f32 %v3600_v50 }
 0x32a   : > { %3601 = vrcp.f32 %v816_v51  ;;  %v960_v28 = vsel %vm957_vm0, %v959_v4, %v955_v26  ;;  %vm969_vm3 = vmor %vm967_vm1, %vm968_vm10  ;;  %v988_v11 = vand.u32 2147483648, %v816_v51  ;;  %v986_v10 = vand.u32 2147483647, %v816_v51 }
 0x32b   : > { %v964_v32 = vsub.f32 1.0, %v963_v16  ;;  %v1087_v48 = vpop.f32.mrf.mxu0  ;;  %v961_v19 = vmul.f32 %v4460_v0, %v960_v28  ;;  %vm982_vm0 = vweird.f32 %v816_v51 }
 0x32c   : > { %1169 = vmatmul.f32.gmra.mxu1 %v1087_v48  ;;  %v989_v30 = vor.u32 1.1754944e-38, %v988_v11  ;;  %vm987_vm10 = vcmp.eq.f32.partialorder %v986_v10, 8.507059e+37 }
 0x32d   : > { %v965_v55 = vmul.f32 %v3600_v50, %v964_v32  ;;  %1107 = vmatmul.f32.gmra.mxu0 %v961_v19 }
 0x32f   : > { %v966_v36 = vadd.f32 %v3600_v50, %v965_v55 }
 0x330   : > { %v3602_v56 = vpop.eup %3601 }
 0x331   : > { %v978_v54 = vmul.f32 %v3602_v56, %v816_v51  ;;  %v818_v63 = vpop.xlane.xlu0 %817  ;;  %v970_v13 = vsel %vm969_vm3, %v3600_v50, %v966_v36  ;;  %vm983_vm14 = vweird.f32 %v3602_v56 }
 0x332   : > { %3603 = vrcp.f32 %v818_v63  ;;  %v975_v59 = vsel %vm972_vm6, %v974_v38, %v970_v13  ;;  %vm984_vm1 = vmor %vm982_vm0, %vm983_vm14  ;;  %v1003_v14 = vand.u32 2147483648, %v818_v63  ;;  %v1001_v60 = vand.u32 2147483647, %v818_v63 }
 0x333   : > { %v979_v43 = vsub.f32 1.0, %v978_v54  ;;  %v1090_v34 = vpop.f32.mrf.mxu0  ;;  %v976_v0 = vmul.f32 %v4465_v29, %v975_v59  ;;  %vm997_vm6 = vweird.f32 %v818_v63 }
 0x334   : > { %1172 = vmatmul.f32.gmra.mxu1 %v1090_v34  ;;  %v1004_v27 = vor.u32 1.1754944e-38, %v1003_v14  ;;  %vm1002_vm0 = vcmp.eq.f32.partialorder %v1001_v60, 8.507059e+37 }
 0x335   : > { %v980_v22 = vmul.f32 %v3602_v56, %v979_v43  ;;  %1110 = vmatmul.f32.gmra.mxu0 %v976_v0 }
 0x337   : > { %v981_v6 = vadd.f32 %v3602_v56, %v980_v22 }
 0x338   : > { %v3604_v23 = vpop.eup %3603 }
 0x339   : > { %v993_v18 = vmul.f32 %v3604_v23, %v818_v63  ;;  %v820_v15 = vpop.xlane.xlu1 %819  ;;  %v985_v9 = vsel %vm984_vm1, %v3602_v56, %v981_v6  ;;  %vm998_vm3 = vweird.f32 %v3604_v23 }
 0x33a   : > { %3605 = vrcp.f32 %v820_v15  ;;  %v990_v17 = vsel %vm987_vm10, %v989_v30, %v985_v9  ;;  %vm999_vm14 = vmor %vm997_vm6, %vm998_vm3  ;;  %v1018_v32 = vand.u32 2147483648, %v820_v15  ;;  %v1016_v19 = vand.u32 2147483647, %v820_v15 }
 0x33b   : > { %v994_v8 = vsub.f32 1.0, %v993_v18  ;;  %v1093_v20 = vpop.f32.mrf.mxu0  ;;  %v991_v29 = vmul.f32 %v4470_v57, %v990_v17  ;;  %vm1012_vm10 = vweird.f32 %v820_v15 }
 0x33c   : > { %1175 = vmatmul.f32.gmra.mxu1 %v1093_v20  ;;  %v1019_v37 = vor.u32 1.1754944e-38, %v1018_v32  ;;  %vm1017_vm6 = vcmp.eq.f32.partialorder %v1016_v19, 8.507059e+37 }
 0x33d   : > { %v995_v47 = vmul.f32 %v3604_v23, %v994_v8  ;;  %1113 = vmatmul.f32.gmra.mxu0 %v991_v29 }
 0x33f   : > { %v996_v61 = vadd.f32 %v3604_v23, %v995_v47 }
 0x340   : > { %v3606_v45 = vpop.eup %3605 }
 0x341   : > { %v1008_v50 = vmul.f32 %v3606_v45, %v820_v15  ;;  %v822_v4 = vpop.xlane.xlu2 %821  ;;  %v1000_v16 = vsel %vm999_vm14, %v3604_v23, %v996_v61  ;;  %vm1013_vm1 = vweird.f32 %v3606_v45 }
 0x342   : > { %3607 = vrcp.f32 %v822_v4  ;;  %v1005_v51 = vsel %vm1002_vm0, %v1004_v27, %v1000_v16  ;;  %vm1014_vm3 = vmor %vm1012_vm10, %vm1013_vm1  ;;  %v1033_v59 = vand.u32 2147483648, %v822_v4  ;;  %v1031_v34 = vand.u32 2147483647, %v822_v4 }
 0x343   : > { %v1009_v26 = vsub.f32 1.0, %v1008_v50  ;;  %v1096_v28 = vpop.f32.mrf.mxu0  ;;  %v1006_v57 = vmul.f32 %v4478_v52, %v1005_v51  ;;  %vm1027_vm0 = vweird.f32 %v822_v4 }
 0x344   : > { %1178 = vmatmul.f32.gmra.mxu1 %v1096_v28  ;;  %v1034_v22 = vor.u32 1.1754944e-38, %v1033_v59  ;;  %vm1032_vm10 = vcmp.eq.f32.partialorder %v1031_v34, 8.507059e+37 }
 0x345   : > { %v1010_v48 = vmul.f32 %v3606_v45, %v1009_v26  ;;  %1116 = vmatmul.f32.gmra.mxu0 %v1006_v57 }
 0x347   : > { %v1011_v5 = vadd.f32 %v3606_v45, %v1010_v48 }
 0x348   : > { %v3608_v55 = vpop.eup %3607 }
 0x349   : > { %v1023_v36 = vmul.f32 %v3608_v55, %v822_v4  ;;  %v824_v56 = vpop.xlane.xlu0 %823  ;;  %v1015_v38 = vsel %vm1014_vm3, %v3606_v45, %v1011_v5  ;;  %vm1028_vm14 = vweird.f32 %v3608_v55  ;;  %v3775_v5 = vld [vmem:[%s3959_s28] sm:$0xff] }
 0x34a   : > { %3609 = vrcp.f32 %v824_v56  ;;  %v1020_v54 = vsel %vm1017_vm6, %v1019_v37, %v1015_v38  ;;  %vm1029_vm1 = vmor %vm1027_vm0, %vm1028_vm14  ;;  %v1048_v9 = vand.u32 2147483648, %v824_v56  ;;  %v1046_v8 = vand.u32 2147483647, %v824_v56  ;;  %v3776_v38 = vld [vmem:[%s3959_s28 + $0x8] sm:$0xff] }
 0x34b   : > { %v1024_v63 = vsub.f32 1.0, %v1023_v36  ;;  %v1099_v13 = vpop.f32.mrf.mxu0  ;;  %v1021_v52 = vmul.f32 %v4502_v46, %v1020_v54  ;;  %vm1042_vm6 = vweird.f32 %v824_v56 }
 0x34c   : > { %1181 = vmatmul.f32.gmra.mxu1 %v1099_v13  ;;  %v1049_v14 = vor.u32 1.1754944e-38, %v1048_v9  ;;  %vm1047_vm0 = vcmp.eq.f32.partialorder %v1046_v8, 8.507059e+37  ;;  %v3779_v9 = vld [vmem:[%s3959_s28 + $0x20] sm:$0xff] }
 0x34d   : > { %v1025_v43 = vmul.f32 %v3608_v55, %v1024_v63  ;;  %1119 = vmatmul.f32.gmra.mxu0 %v1021_v52 }
 0x34f   : > { %v1026_v0 = vadd.f32 %v3608_v55, %v1025_v43  ;;  %v3777_v43 = vld [vmem:[%s3959_s28 + $0x10] sm:$0xff] }
 0x350   : > { %v3610_v11 = vpop.eup %3609 }
 0x351   : > { %v1038_v10 = vmul.f32 %v3610_v11, %v824_v56  ;;  %v826_v6 = vpop.xlane.xlu1 %825  ;;  %v1030_v23 = vsel %vm1029_vm1, %v3608_v55, %v1026_v0  ;;  %vm1043_vm3 = vweird.f32 %v3610_v11 }
 0x352   : > { %3611 = vrcp.f32 %v826_v6  ;;  %v1035_v30 = vsel %vm1032_vm10, %v1034_v22, %v1030_v23  ;;  %vm1044_vm14 = vmor %vm1042_vm6, %vm1043_vm3  ;;  %v1061_v16 = vand.u32 2147483647, %v826_v6  ;;  %vm1057_vm10 = vweird.f32 %v826_v6 }
 0x353   : > { %v1039_v18 = vsub.f32 1.0, %v1038_v10  ;;  %v1102_v15 = vpop.f32.mrf.mxu0  ;;  %v1036_v46 = vmul.f32 %v4523_v35, %v1035_v30  ;;  %v1063_v35 = vand.u32 2147483648, %v826_v6 }
 0x354   : > { %1184 = vmatmul.f32.gmra.mxu1 %v1102_v15  ;;  %vm1062_vm6 = vcmp.eq.f32.partialorder %v1061_v16, 8.507059e+37 }
 0x355   : > { %v1040_v17 = vmul.f32 %v3610_v11, %v1039_v18  ;;  %1122 = vmatmul.f32.gmra.mxu0 %v1036_v46  ;;  %v1064_v26 = vor.u32 1.1754944e-38, %v1063_v35  ;;  %v3781_v35 = vld [vmem:[%s3959_s28 + $0x30] sm:$0xff] }
 0x357   : > { %v1041_v20 = vadd.f32 %v3610_v11, %v1040_v17 }
 0x358   : > { %v3612_v29 = vpop.eup %3611 }
 0x359   : > { %v1053_v47 = vmul.f32 %v3612_v29, %v826_v6  ;;  %v1045_v60 = vsel %vm1044_vm14, %v3610_v11, %v1041_v20  ;;  %vm1058_vm1 = vweird.f32 %v3612_v29  ;;  %vm6028_vm14 = vcmask 261120   ;;  %v3778_v6 = vld [vmem:[%s3959_s28 + $0x18] sm:$0xff] }
 0x35a   : > { %v1050_v61 = vsel %vm1047_vm0, %v1049_v14, %v1045_v60  ;;  %vm1059_vm3 = vmor %vm1057_vm10, %vm1058_vm1 }
 0x35b   : > { %v1054_v45 = vsub.f32 1.0, %v1053_v47  ;;  %v1105_v27 = vpop.f32.mrf.mxu0  ;;  %v1051_v50 = vmul.f32 %v4537_v33, %v1050_v61  ;;  %v4570_v33 = vld [vmem:[%s5981_s3 + $0x100] ss:$0 sm:$0xff]  ;;  %vm6029_vm0 = vmmov %vm6028_vm14  ;;  %v3780_v47 = vld [vmem:[%s3959_s28 + $0x28] sm:$0xff] }
 0x35c   : > { %1187 = vmatmul.f32.gmra.mxu1 %v1105_v27  ;;  %vm6030_vm1 = vmmov %vm6029_vm0 }
 0x35d   : > { %v1055_v4 = vmul.f32 %v3612_v29, %v1054_v45  ;;  %1125 = vmatmul.f32.gmra.mxu0 %v1051_v50  ;;  %vm6031_vm10 = vmmov %vm6029_vm0 }
 0x35f   : > { %v1056_v51 = vadd.f32 %v3612_v29, %v1055_v4 }
 0x361   : > { %v1060_v28 = vsel %vm1059_vm3, %v3612_v29, %v1056_v51  ;;  %vm6032_vm3 = vmmov %vm6029_vm0 }
 0x362   : > { %v1065_v57 = vsel %vm1062_vm6, %v1064_v26, %v1060_v28  ;;  %vm6033_vm6 = vmmov %vm6029_vm0  ;;  %v3857_v28 = vmov 32.0  }
 0x363   : > { %v1066_v32 = vmul.f32 %v4541_v1, %v1065_v57  ;;  %3613 = vrcp.f32 %v3857_v28 }
 0x365   : > { %1128 = vmatmul.f32.gmra.mxu0 %v1066_v32 }
 0x369   : > { %v3614_v57 = vpop.eup %3613 }
 0x36a   : > { %v1284_v32 = vmul.f32 32.0, %v3614_v57 }
 0x3a1   : > { %v1167_v48 = vpop.f32.mrf.mxu1 }
 0x3a2   : > { %v1168_v19 = vadd.f32 %v4570_v33, %v1167_v48  ;;  %v1285_v48 = vsub.f32 1.0, %v1284_v32 }
 0x3a4   : > { %v4574_v55 = vadd.f32 %v3775_v5, %v1168_v19  ;;  %v1286_v19 = vmul.f32 %v3614_v57, %v1285_v48 }
 0x3a6   : > { %v1235_v37 = vsel %vm6028_vm14, %v4574_v55, 0.0  ;;  %vm6034_vm14 = vmmov %vm6029_vm0  ;;  %v1287_v5 = vadd.f32 %v3614_v57, %v1286_v19  ;;  %v3785_v19 = vld [vmem:[%s3959_s28 + $0x50] sm:$0xff] }
 0x3a7   : > { %1236 = vadd.xlane.f32.xlu2 %v1235_v37 }
 0x3a9   : > { %v1170_v36 = vpop.f32.mrf.mxu1 }
 0x3aa   : > { %v1171_v1 = vadd.f32 %v4570_v33, %v1170_v36  ;;  %v1108_v56 = vpop.f32.mrf.mxu0 }
 0x3ab   : > { %1190 = vmatmul.f32.gmra.mxu1 %v1108_v56 }
 0x3ac   : > { %v4580_v54 = vadd.f32 %v3776_v38, %v1171_v1 }
 0x3ae   : > { %v1238_v63 = vsel %vm6029_vm0, %v4580_v54, 0.0  ;;  %vm1288_vm0 = vweird.f32 %v3614_v57 }
 0x3af   : > { %1239 = vadd.xlane.f32.xlu0 %v1238_v63  ;;  %v4614_v37 = vsel %vm1288_vm0, %v3614_v57, %v1287_v5  ;;  %vm6039_vm0 = vmmov %vm6030_vm1 }
 0x3b1   : > { %v1173_v13 = vpop.f32.mrf.mxu1 }
 0x3b2   : > { %v1174_v52 = vadd.f32 %v4570_v33, %v1173_v13  ;;  %v1111_v59 = vpop.f32.mrf.mxu0 }
 0x3b3   : > { %1193 = vmatmul.f32.gmra.mxu1 %v1111_v59 }
 0x3b4   : > { %v4586_v34 = vadd.f32 %v3777_v43, %v1174_v52 }
 0x3b6   : > { %v1241_v0 = vsel %vm6030_vm1, %v4586_v34, 0.0 }
 0x3b7   : > { %1242 = vadd.xlane.f32.xlu1 %v1241_v0 }
 0x3b9   : > { %v1176_v11 = vpop.f32.mrf.mxu1 }
 0x3ba   : > { %v1177_v22 = vadd.f32 %v4570_v33, %v1176_v11  ;;  %v1114_v10 = vpop.f32.mrf.mxu0  ;;  %v3782_v11 = vld [vmem:[%s3959_s28 + $0x38] sm:$0xff] }
 0x3bb   : > { %1196 = vmatmul.f32.gmra.mxu1 %v1114_v10 }
 0x3bc   : > { %v4592_v23 = vadd.f32 %v3778_v6, %v1177_v22 }
 0x3be   : > { %v1244_v30 = vsel %vm6031_vm10, %v4592_v23, 0.0  ;;  %vm6035_vm10 = vmmov %vm6030_vm1 }
 0x3bf   : > { %1245 = vadd.xlane.f32.xlu2 %v1244_v30 }
 0x3c1   : > { %v1179_v18 = vpop.f32.mrf.mxu1 }
 0x3c2   : > { %v1180_v15 = vadd.f32 %v4570_v33, %v1179_v18  ;;  %v1117_v46 = vpop.f32.mrf.mxu0 }
 0x3c3   : > { %1199 = vmatmul.f32.gmra.mxu1 %v1117_v46 }
 0x3c4   : > { %v4598_v17 = vadd.f32 %v3779_v9, %v1180_v15  ;;  %v3783_v9 = vld [vmem:[%s3959_s28 + $0x40] sm:$0xff] }
 0x3c6   : > { %v1247_v8 = vsel %vm6032_vm3, %v4598_v17, 0.0  ;;  %vm6036_vm3 = vmmov %vm6030_vm1 }
 0x3c7   : > { %1248 = vadd.xlane.f32.xlu0 %v1247_v8 }
 0x3c9   : > { %v1182_v20 = vpop.f32.mrf.mxu1 }
 0x3ca   : > { %v1183_v29 = vadd.f32 %v4570_v33, %v1182_v20  ;;  %v1120_v14 = vpop.f32.mrf.mxu0 }
 0x3cb   : > { %1202 = vmatmul.f32.gmra.mxu1 %v1120_v14 }
 0x3cc   : > { %v4604_v60 = vadd.f32 %v3780_v47, %v1183_v29 }
 0x3ce   : > { %v1250_v61 = vsel %vm6033_vm6, %v4604_v60, 0.0  ;;  %vm6037_vm6 = vmmov %vm6030_vm1 }
 0x3cf   : > { %1251 = vadd.xlane.f32.xlu1 %v1250_v61 }
 0x3d1   : > { %v1185_v45 = vpop.f32.mrf.mxu1 }
 0x3d2   : > { %v1186_v27 = vadd.f32 %v4570_v33, %v1185_v45  ;;  %v1123_v50 = vpop.f32.mrf.mxu0 }
 0x3d3   : > { %1205 = vmatmul.f32.gmra.mxu1 %v1123_v50  ;;  %v3784_v50 = vld [vmem:[%s3959_s28 + $0x48] sm:$0xff] }
 0x3d4   : > { %v4610_v4 = vadd.f32 %v3781_v35, %v1186_v27 }
 0x3d6   : > { %v1253_v16 = vsel %vm6034_vm14, %v4610_v4, 0.0  ;;  %vm6038_vm14 = vmmov %vm6030_vm1 }
 0x3d7   : > { %1254 = vadd.xlane.f32.xlu0 %v1253_v16 }
 0x3d9   : > { %v1188_v38 = vpop.f32.mrf.mxu1 }
 0x3da   : > { %v1126_v51 = vpop.f32.mrf.mxu0  ;;  %v1189_v13 = vadd.f32 %v4570_v33, %v1188_v38 }
 0x3db   : > { %1208 = vmatmul.f32.gmra.mxu1 %v1126_v51 }
 0x3dc   : > { %v4629_v22 = vadd.f32 %v3782_v11, %v1189_v13  ;;  %v3786_v11 = vld [vmem:[%s3959_s28 + $0x58] sm:$0xff] }
 0x3de   : > { %v1256_v30 = vsel %vm6035_vm10, %v4629_v22, 0.0  ;;  %vm6041_vm10 = vmmov %vm6039_vm0 }
 0x3e2   : > { %v1129_v26 = vpop.f32.mrf.mxu0 }
 0x3e3   : > { %1211 = vmatmul.f32.gmra.mxu1 %v1129_v26 }
 0x41a   : > { %v1237_v36 = vpop.xlane.xlu2 %1236 }
 0x41b   : > { %v1290_v1 = vmul.f32 %v4614_v37, %v1237_v36 }
 0x41d   : > { %v4618_v56 = vsub.f32 %v4574_v55, %v1290_v1 }
 0x41f   : > { %v1322_v63 = vmul.f32 %v4618_v56, %v4618_v56 }
 0x421   : > { %v1338_v52 = vsel %vm6030_vm1, %v1322_v63, 0.0  ;;  %vm6040_vm1 = vmmov %vm6039_vm0 }
 0x422   : > { %1339 = vadd.xlane.f32.xlu2 %v1338_v52  ;;  %v1240_v59 = vpop.xlane.xlu0 %1239  ;;  %v1631_v52 = vld [vmem:[%s5980_s2 + $0x90] sm:$0xff] }
 0x423   : > { %v1291_v43 = vmul.f32 %v4614_v37, %v1240_v59  ;;  %1693 = vmatpush.msrb.mxu2 %v1631_v52 }
 0x425   : > { %v4626_v0 = vsub.f32 %v4580_v54, %v1291_v43 }
 0x427   : > { %v1323_v55 = vmul.f32 %v4626_v0, %v4626_v0 }
 0x428   : > { %v1191_v10 = vpop.f32.mrf.mxu1 }
 0x429   : > { %v1192_v6 = vadd.f32 %v4570_v33, %v1191_v10  ;;  %v1341_v18 = vsel %vm6036_vm3, %v1323_v55, 0.0  ;;  %vm6042_vm3 = vmmov %vm6039_vm0 }
 0x42a   : > { %1257 = vadd.xlane.f32.xlu2 %v1256_v30  ;;  %v1243_v15 = vpop.xlane.xlu1 %1242  ;;  %1342 = vadd.xlane.f32.xlu1 %v1341_v18 }
 0x42b   : > { %v1292_v54 = vmul.f32 %v4614_v37, %v1243_v15  ;;  %v4642_v8 = vadd.f32 %v3783_v9, %v1192_v6 }
 0x42d   : > { %v4639_v46 = vsub.f32 %v4586_v34, %v1292_v54  ;;  %v1259_v61 = vsel %vm6038_vm14, %v4642_v8, 0.0  ;;  %vm6044_vm14 = vmmov %vm6039_vm0 }
 0x42f   : > { %v1324_v20 = vmul.f32 %v4639_v46, %v4639_v46 }
 0x430   : > { %v1194_v29 = vpop.f32.mrf.mxu1 }
 0x431   : > { %v1195_v14 = vadd.f32 %v4570_v33, %v1194_v29  ;;  %v1344_v47 = vsel %vm6037_vm6, %v1324_v20, 0.0  ;;  %vm6043_vm6 = vmmov %vm6039_vm0  ;;  %v3787_v20 = vld [vmem:[%s3959_s28 + $0x60] sm:$0xff] }
 0x432   : > { %v1246_v45 = vpop.xlane.xlu2 %1245  ;;  %1345 = vadd.xlane.f32.xlu0 %v1344_v47  ;;  %1260 = vadd.xlane.f32.xlu1 %v1259_v61 }
 0x433   : > { %v1293_v34 = vmul.f32 %v4614_v37, %v1246_v45  ;;  %v4655_v35 = vadd.f32 %v3784_v50, %v1195_v14  ;;  %v3788_v50 = vld [vmem:[%s3959_s28 + $0x68] sm:$0xff] }
 0x435   : > { %v4652_v27 = vsub.f32 %v4592_v23, %v1293_v34  ;;  %v1262_v57 = vsel %vm6040_vm1, %v4655_v35, 0.0  ;;  %vm6045_vm1 = vmmov %vm6039_vm0 }
 0x437   : > { %v1325_v16 = vmul.f32 %v4652_v27, %v4652_v27 }
 0x438   : > { %v1197_v51 = vpop.f32.mrf.mxu1 }
 0x439   : > { %v1198_v26 = vadd.f32 %v4570_v33, %v1197_v51  ;;  %v1347_v28 = vsel %vm6039_vm0, %v1325_v16, 0.0  ;;  %v1630_v51 = vld [vmem:[%s5980_s2 + $0x68] sm:$0xff] }
 0x43a   : > { %1348 = vadd.xlane.f32.xlu2 %v1347_v28  ;;  %1263 = vadd.xlane.f32.xlu0 %v1262_v57  ;;  %v1249_v32 = vpop.xlane.xlu0 %1248  ;;  %v1628_v28 = vld [vmem:[%s5980_s2 + $0x18] sm:$0xff] }
 0x43b   : > { %v1294_v23 = vmul.f32 %v4614_v37, %v1249_v32  ;;  %v4668_v5 = vadd.f32 %v3785_v19, %v1198_v26  ;;  %1694 = vmatpush.msrb.mxu2 %v1630_v51  ;;  %v1629_v26 = vld [vmem:[%s5980_s2 + $0x40] sm:$0xff] }
 0x43d   : > { %v4665_v48 = vsub.f32 %v4598_v17, %v1294_v23  ;;  %v1265_v63 = vsel %vm6041_vm10, %v4668_v5, 0.0  ;;  %vm6046_vm10 = vmmov %vm6039_vm0  ;;  %1695 = vmatpush.msrb.mxu2 %v1629_v26  ;;  %v4742_v26 = vld [vmem:[%s5981_s3 + $0x102] ss:$0 sm:$0xff] }
 0x43f   : > { %v1326_v36 = vmul.f32 %v4665_v48, %v4665_v48  ;;  %1696 = vmatpush.msrb.mxu2 %v1628_v28 }
 0x440   : > { %v1200_v1 = vpop.f32.mrf.mxu1 }
 0x441   : > { %v1201_v38 = vadd.f32 %v4570_v33, %v1200_v1  ;;  %v1350_v13 = vsel %vm6042_vm3, %v1326_v36, 0.0  ;;  %vm6047_vm3 = vmmov %vm6039_vm0 }
 0x442   : > { %1266 = vadd.xlane.f32.xlu2 %v1265_v63  ;;  %v1252_v17 = vpop.xlane.xlu1 %1251  ;;  %1351 = vadd.xlane.f32.xlu1 %v1350_v13 }
 0x443   : > { %v1295_v59 = vmul.f32 %v4614_v37, %v1252_v17  ;;  %v4684_v55 = vadd.f32 %v3786_v11, %v1201_v38 }
 0x445   : > { %v4681_v43 = vsub.f32 %v4604_v60, %v1295_v59  ;;  %v1268_v15 = vsel %vm6044_vm14, %v4684_v55, 0.0 }
 0x447   : > { %v1327_v10 = vmul.f32 %v4681_v43, %v4681_v43 }
 0x448   : > { %v1203_v6 = vpop.f32.mrf.mxu1 }
 0x449   : > { %v1204_v30 = vadd.f32 %v4570_v33, %v1203_v6  ;;  %v1353_v18 = vsel %vm6043_vm6, %v1327_v10, 0.0 }
 0x44a   : > { %1354 = vadd.xlane.f32.xlu0 %v1353_v18  ;;  %1269 = vadd.xlane.f32.xlu1 %v1268_v15  ;;  %v1255_v54 = vpop.xlane.xlu0 %1254 }
 0x44b   : > { %v1296_v60 = vmul.f32 %v4614_v37, %v1255_v54  ;;  %v4697_v29 = vadd.f32 %v3787_v20, %v1204_v30 }
 0x44d   : > { %v4694_v9 = vsub.f32 %v4610_v4, %v1296_v60  ;;  %v1271_v45 = vsel %vm6039_vm0, %v4697_v29, 0.0 }
 0x44f   : > { %v1328_v14 = vmul.f32 %v4694_v9, %v4694_v9 }
 0x450   : > { %v1206_v47 = vpop.f32.mrf.mxu1 }
 0x451   : > { %v1207_v61 = vadd.f32 %v4570_v33, %v1206_v47  ;;  %v1356_v34 = vsel %vm6045_vm1, %v1328_v14, 0.0 }
 0x452   : > { %1272 = vadd.xlane.f32.xlu0 %v1271_v45  ;;  %1357 = vadd.xlane.f32.xlu2 %v1356_v34  ;;  %v3789_v45 = vld [vmem:[%s3959_s28 + $0x70] sm:$0xff] }
 0x453   : > { %v4706_v16 = vadd.f32 %v3788_v50, %v1207_v61 }
 0x455   : > { %v1274_v4 = vsel %vm6046_vm10, %v4706_v16, 0.0  ;;  %vm6048_vm10 = vmmov %vm6045_vm1 }
 0x458   : > { %v1209_v63 = vpop.f32.mrf.mxu1 }
 0x459   : > { %v1210_v6 = vadd.f32 %v4570_v33, %v1209_v63 }
 0x45a   : > { %1275 = vadd.xlane.f32.xlu2 %v1274_v4 }
 0x45b   : > { %v4737_v34 = vadd.f32 %v3789_v45, %v1210_v6 }
 0x460   : > { %v1212_v50 = vpop.f32.mrf.mxu1 }
 0x495   : > { %v1340_v57 = vpop.xlane.xlu2 %1339 }
 0x496   : > { %v1386_v32 = vmul.f32 %v1340_v57, %v4614_v37 }
 0x498   : > { %v1402_v23 = vadd.f32 1e-12, %v1386_v32  ;;  %v1213_v32 = vadd.f32 %v4570_v33, %v1212_v50 }
 0x49a   : > { %3615 = vrsqrt.f32 %v1402_v23  ;;  %vm1424_vm14 = vweird.f32 %v1402_v23 }
 0x49d   : > { %v1258_v19 = vpop.xlane.xlu2 %1257  ;;  %v1343_v36 = vpop.xlane.xlu1 %1342 }
 0x49e   : > { %v1297_v1 = vmul.f32 %v4614_v37, %v1258_v19  ;;  %v1387_v38 = vmul.f32 %v1343_v36, %v4614_v37 }
 0x4a0   : > { %v3616_v13 = vpop.eup %3615  ;;  %v4723_v52 = vsub.f32 %v4629_v22, %v1297_v1  ;;  %v1403_v17 = vadd.f32 1e-12, %v1387_v38  ;;  %v1277_v1 = vsel %vm6048_vm10, %v4737_v34, 0.0 }
 0x4a1   : > { %v1419_v59 = vmul.f32 %v3616_v13, %v1402_v23  ;;  %vm1425_vm6 = vweird.f32 %v3616_v13  ;;  %v4751_v23 = vld [vmem:[%s5981_s3 + $0x103] ss:$0 sm:$0xff] }
 0x4a2   : > { %3617 = vrsqrt.f32 %v1403_v17  ;;  %v1329_v11 = vmul.f32 %v4723_v52, %v4723_v52  ;;  %vm1426_vm0 = vmor %vm1424_vm14, %vm1425_vm6  ;;  %vm1434_vm6 = vweird.f32 %v1403_v17 }
 0x4a3   : > { %v1420_v10 = vmul.f32 %v3616_v13, %v1419_v59 }
 0x4a4   : > { %v1359_v30 = vsel %vm6047_vm3, %v1329_v11, 0.0 }
 0x4a5   : > { %v1421_v18 = vmul.f32 0.5, %v1420_v10  ;;  %v1261_v15 = vpop.xlane.xlu1 %1260  ;;  %1360 = vadd.xlane.f32.xlu1 %v1359_v30  ;;  %v1346_v54 = vpop.xlane.xlu0 %1345 }
 0x4a6   : > { %v1298_v60 = vmul.f32 %v4614_v37, %v1261_v15  ;;  %v1388_v22 = vmul.f32 %v1346_v54, %v4614_v37  ;;  %v3790_v15 = vld [vmem:[%s3959_s28 + $0x78] sm:$0xff]  ;;  %s3363_s28 = sshll.u32 %s202_s23, 7 }
 0x4a7   : > { %v1422_v20 = vsub.f32 1.5, %v1421_v18  ;;  %v4767_v54 = vadd.f32 %v3790_v15, %v1213_v32  ;;  %s5865_s27 = scalar_lea.vmem [#allocation2], %s3363_s28 }
 0x4a8   : > { %v3618_v14 = vpop.eup %3617  ;;  %v4732_v47 = vsub.f32 %v4642_v8, %v1298_v60  ;;  %v4734_v61 = vadd.f32 1e-12, %v1388_v22  ;;  %s3282_s7 = sshll.u32 %s5865_s27, 4  ;;  %s3283_s7 = int_to_ptr.vmem [resolvable:$true] %s3282_s7 }
 0x4a9   : > { %v1423_v4 = vmul.f32 %v3616_v13, %v1422_v20  ;;  %v1429_v51 = vmul.f32 %v3618_v14, %v1403_v17  ;;  %vm1435_vm3 = vweird.f32 %v3618_v14 }
 0x4aa   : > { %3619 = vrsqrt.f32 %v4734_v61  ;;  %v1330_v8 = vmul.f32 %v4732_v47, %v4732_v47  ;;  %vm1436_vm14 = vmor %vm1434_vm6, %vm1435_vm3  ;;  %vm1444_vm6 = vweird.f32 %v4734_v61 }
 0x4ab   : > { %v1427_v28 = vsel %vm1426_vm0, %v3616_v13, %v1423_v4  ;;  %v1430_v57 = vmul.f32 %v3618_v14, %v1429_v51  ;;  %vm6049_vm0 = vmmov %vm6045_vm1 }
 0x4ac   : > { %v1578_v19 = vmul.f32 %v1427_v28, %v4618_v56  ;;  %v1362_v36 = vsel %vm6045_vm1, %v1330_v8, 0.0  ;;  %vm6050_vm1 = vmmov %vm6049_vm0 }
 0x4ad   : > { %v1431_v38 = vmul.f32 0.5, %v1430_v57  ;;  %v1349_v63 = vpop.xlane.xlu2 %1348  ;;  %1363 = vadd.xlane.f32.xlu0 %v1362_v36  ;;  %1278 = vadd.xlane.f32.xlu1 %v1277_v1  ;;  %v1264_v13 = vpop.xlane.xlu0 %1263  ;;  %v1280_v4 = vsel %vm6050_vm1, %v4767_v54, 0.0  ;;  %vm6051_vm10 = vmmov %vm6049_vm0 }
 0x4ae   : > { %v1595_v33 = vmul.f32 %v4742_v26, %v1578_v19  ;;  %v1389_v59 = vmul.f32 %v1349_v63, %v4614_v37  ;;  %v1299_v11 = vmul.f32 %v4614_v37, %v1264_v13  ;;  %vm6052_vm1 = vmmov %vm6049_vm0 }
 0x4af   : > { %v1432_v10 = vsub.f32 1.5, %v1431_v38 }
 0x4b0   : > { %v3620_v56 = vpop.eup %3619  ;;  %v4761_v6 = vadd.f32 %v4751_v23, %v1595_v33  ;;  %v1405_v30 = vadd.f32 1e-12, %v1389_v59  ;;  %v4764_v18 = vsub.f32 %v4655_v35, %v1299_v11 }
 0x4b1   : > { %v1433_v60 = vmul.f32 %v3618_v14, %v1432_v10  ;;  %v1439_v22 = vmul.f32 %v3620_v56, %v4734_v61  ;;  %vm1445_vm3 = vweird.f32 %v3620_v56 }
 0x4b2   : > { %3621 = vrsqrt.f32 %v1405_v30  ;;  %3432 = vmatmul.msk.f32.vlgmr.msrb.gmra.mxu2 %vm6049_vm0, %v4761_v6  ;;  %v1331_v20 = vmul.f32 %v4764_v18, %v4764_v18 }
 0x4b3   : > { %v1437_v45 = vsel %vm1436_vm14, %v3618_v14, %v1433_v60  ;;  %v1440_v50 = vmul.f32 %v3620_v56, %v1439_v22  ;;  %vm1446_vm14 = vmor %vm1444_vm6, %vm1445_vm3  ;;  %vm1454_vm3 = vweird.f32 %v1405_v30 }
 0x4b4   : > { %v1579_v35 = vmul.f32 %v1437_v45, %v4626_v0  ;;  %v1365_v51 = vsel %vm6051_vm10, %v1331_v20, 0.0 }
 0x4b5   : > { %v1441_v17 = vmul.f32 0.5, %v1440_v50  ;;  %v1267_v8 = vpop.xlane.xlu2 %1266  ;;  %1281 = vadd.xlane.f32.xlu0 %v1280_v4  ;;  %v1352_v28 = vpop.xlane.xlu1 %1351  ;;  %1366 = vadd.xlane.f32.xlu2 %v1365_v51 }
 0x4b6   : > { %v1300_v57 = vmul.f32 %v4614_v37, %v1267_v8  ;;  %v1390_v32 = vmul.f32 %v1352_v28, %v4614_v37  ;;  %v1596_v19 = vmul.f32 %v4742_v26, %v1579_v35 }
 0x4b7   : > { %v1442_v14 = vsub.f32 1.5, %v1441_v17 }
 0x4b8   : > { %v3622_v36 = vpop.eup %3621  ;;  %v4782_v0 = vsub.f32 %v4668_v5, %v1300_v57  ;;  %v1406_v1 = vadd.f32 1e-12, %v1390_v32  ;;  %v4785_v38 = vadd.f32 %v4751_v23, %v1596_v19 }
 0x4b9   : > { %v1443_v63 = vmul.f32 %v3620_v56, %v1442_v14  ;;  %v1449_v13 = vmul.f32 %v3622_v36, %v1405_v30  ;;  %vm1455_vm10 = vweird.f32 %v3622_v36 }
 0x4ba   : > { %3623 = vrsqrt.f32 %v1406_v1  ;;  %3433 = vmatmul.msk.f32.gmra.mxu2 %vm6049_vm0, %v4785_v38  ;;  %v1332_v33 = vmul.f32 %v4782_v0, %v4782_v0  ;;  %vm1456_vm6 = vmor %vm1454_vm3, %vm1455_vm10  ;;  %vm1464_vm10 = vweird.f32 %v1406_v1 }
 0x4bb   : > { %v1447_v59 = vsel %vm1446_vm14, %v3620_v56, %v1443_v63  ;;  %v1450_v11 = vmul.f32 %v3622_v36, %v1449_v13  ;;  %vm6053_vm14 = vmmov %vm6049_vm0 }
 0x4bc   : > { %v1580_v5 = vmul.f32 %v1447_v59, %v4639_v46  ;;  %v1368_v10 = vsel %vm6052_vm1, %v1332_v33, 0.0 }
 0x4bd   : > { %v1451_v15 = vmul.f32 0.5, %v1450_v11  ;;  %1369 = vadd.xlane.f32.xlu1 %v1368_v10  ;;  %v1270_v60 = vpop.xlane.xlu1 %1269  ;;  %v1355_v22 = vpop.xlane.xlu0 %1354 }
 0x4be   : > { %v1301_v61 = vmul.f32 %v4614_v37, %v1270_v60  ;;  %v1391_v20 = vmul.f32 %v1355_v22, %v4614_v37  ;;  %v1597_v45 = vmul.f32 %v4742_v26, %v1580_v5 }
 0x4bf   : > { %v1452_v50 = vsub.f32 1.5, %v1451_v15 }
 0x4c0   : > { %v3624_v35 = vpop.eup %3623  ;;  %v4798_v56 = vsub.f32 %v4684_v55, %v1301_v61  ;;  %v1407_v4 = vadd.f32 1e-12, %v1391_v20  ;;  %v4801_v46 = vadd.f32 %v4751_v23, %v1597_v45 }
 0x4c1   : > { %v1453_v51 = vmul.f32 %v3622_v36, %v1452_v50  ;;  %v1459_v17 = vmul.f32 %v3624_v35, %v1406_v1  ;;  %vm1465_vm1 = vweird.f32 %v3624_v35 }
 0x4c2   : > { %3625 = vrsqrt.f32 %v1407_v4  ;;  %3434 = vmatmul.msk.f32.gmra.mxu2 %vm6053_vm14, %v4801_v46  ;;  %v1333_v8 = vmul.f32 %v4798_v56, %v4798_v56  ;;  %vm1466_vm3 = vmor %vm1464_vm10, %vm1465_vm1  ;;  %vm1474_vm1 = vweird.f32 %v1407_v4 }
 0x4c3   : > { %v1457_v28 = vsel %vm1456_vm6, %v3622_v36, %v1453_v51  ;;  %v1460_v57 = vmul.f32 %v3624_v35, %v1459_v17  ;;  %vm6054_vm6 = vmmov %vm6049_vm0 }
 0x4c4   : > { %v1581_v55 = vmul.f32 %v1457_v28, %v4652_v27  ;;  %v1371_v32 = vsel %vm6049_vm0, %v1333_v8, 0.0  ;;  %vm6055_vm14 = vmmov %vm6049_vm0 }
 0x4c5   : > { %v1461_v19 = vmul.f32 0.5, %v1460_v57  ;;  %v1358_v14 = vpop.xlane.xlu2 %1357  ;;  %1372 = vadd.xlane.f32.xlu2 %v1371_v32  ;;  %v1273_v63 = vpop.xlane.xlu0 %1272 }
 0x4c6   : > { %v1392_v30 = vmul.f32 %v1358_v14, %v4614_v37  ;;  %v1302_v13 = vmul.f32 %v4614_v37, %v1273_v63  ;;  %v1598_v33 = vmul.f32 %v4742_v26, %v1581_v55 }
 0x4c7   : > { %v1462_v59 = vsub.f32 1.5, %v1461_v19 }
 0x4c8   : > { %v3626_v11 = vpop.eup %3625  ;;  %v1408_v5 = vadd.f32 1e-12, %v1392_v30  ;;  %v4813_v36 = vsub.f32 %v4697_v29, %v1302_v13  ;;  %v4816_v27 = vadd.f32 %v4751_v23, %v1598_v33 }
 0x4c9   : > { %v1463_v10 = vmul.f32 %v3624_v35, %v1462_v59  ;;  %v1469_v15 = vmul.f32 %v3626_v11, %v1407_v4  ;;  %vm1475_vm0 = vweird.f32 %v3626_v11 }
 0x4ca   : > { %3627 = vrsqrt.f32 %v1408_v5  ;;  %3435 = vmatmul.msk.f32.gmra.mxu2 %vm6054_vm6, %v4816_v27  ;;  %v1334_v60 = vmul.f32 %v4813_v36, %v4813_v36  ;;  %vm1476_vm10 = vmor %vm1474_vm1, %vm1475_vm0  ;;  %vm1484_vm0 = vweird.f32 %v1408_v5 }
 0x4cb   : > { %v1467_v22 = vsel %vm1466_vm3, %v3624_v35, %v1463_v10  ;;  %v1470_v61 = vmul.f32 %v3626_v11, %v1469_v15  ;;  %vm6056_vm3 = vmmov %vm6054_vm6  ;;  %v1905_v15 = vld [vmem:[%s5981_s3 + $0xf8] sm:$0xff] }
 0x4cc   : > { %v1582_v20 = vmul.f32 %v1467_v22, %v4665_v48  ;;  %v1374_v29 = vsel %vm6055_vm14, %v1334_v60, 0.0  ;;  %vm6057_vm6 = vmmov %vm6056_vm3  ;;  %1908 = vmatpush.msra.mxu3 %v1905_v15  ;;  %v1902_v60 = vld [vmem:[%s5981_s3 + $0xe0] sm:$0xff]  ;;  %v1901_v22 = vld [vmem:[%s5981_s3 + $0xd8] sm:$0xff] }
 0x4cd   : > { %v1471_v45 = vmul.f32 0.5, %v1470_v61  ;;  %v1276_v50 = vpop.xlane.xlu2 %1275  ;;  %1375 = vadd.xlane.f32.xlu0 %v1374_v29 }
 0x4ce   : > { %v1303_v1 = vmul.f32 %v4614_v37, %v1276_v50  ;;  %v1599_v51 = vmul.f32 %v4742_v26, %v1582_v20  ;;  %v1900_v20 = vld [vmem:[%s5981_s3 + $0xd0] sm:$0xff] }
 0x4cf   : > { %v1472_v17 = vsub.f32 1.5, %v1471_v45  ;;  %v1899_v45 = vld [vmem:[%s5981_s3 + $0xc8] sm:$0xff] }
 0x4d0   : > { %v3628_v8 = vpop.eup %3627  ;;  %v4827_v28 = vsub.f32 %v4706_v16, %v1303_v1  ;;  %v4830_v35 = vadd.f32 %v4751_v23, %v1599_v51  ;;  %v1898_v1 = vld [vmem:[%s5981_s3 + $0xc0] sm:$0xff]  ;;  %v1897_v51 = vld [vmem:[%s5981_s3 + $0xb8] sm:$0xff] }
 0x4d1   : > { %v1473_v57 = vmul.f32 %v3626_v11, %v1472_v17  ;;  %v1479_v48 = vmul.f32 %v3628_v8, %v1408_v5  ;;  %vm1485_vm14 = vweird.f32 %v3628_v8  ;;  %v1904_v5 = vld [vmem:[%s5981_s3 + $0xf0] sm:$0xff] }
 0x4d2   : > { %3436 = vmatmul.msk.f32.gmra.mxu2 %vm6056_vm3, %v4830_v35  ;;  %v1335_v55 = vmul.f32 %v4827_v28, %v4827_v28  ;;  %vm1486_vm1 = vmor %vm1484_vm0, %vm1485_vm14  ;;  %1909 = vmatpush.msra.mxu3 %v1904_v5  ;;  %v1892_v5 = vld [vmem:[%s5981_s3 + $0x90] sm:$0xff] }
 0x4d3   : > { %v1477_v32 = vsel %vm1476_vm10, %v3626_v11, %v1473_v57  ;;  %v1480_v19 = vmul.f32 %v3628_v8, %v1479_v48  ;;  %vm6058_vm10 = vmmov %vm6056_vm3  ;;  %v1896_v57 = vld [vmem:[%s5981_s3 + $0xb0] sm:$0xff] }
 0x4d4   : > { %v1583_v14 = vmul.f32 %v1477_v32, %v4681_v43  ;;  %v1377_v16 = vsel %vm6057_vm6, %v1335_v55, 0.0  ;;  %v1895_v32 = vld [vmem:[%s5981_s3 + $0xa8] sm:$0xff]  ;;  %vm6059_vm6 = vmmov %vm6056_vm3 }
 0x4d5   : > { %v1481_v63 = vmul.f32 0.5, %v1480_v19  ;;  %1378 = vadd.xlane.f32.xlu1 %v1377_v16 }
 0x4d6   : > { %v1600_v30 = vmul.f32 %v4742_v26, %v1583_v14 }
 0x4d7   : > { %v1482_v13 = vsub.f32 1.5, %v1481_v63 }
 0x4d8   : > { %v4840_v4 = vadd.f32 %v4751_v23, %v1600_v30  ;;  %v1894_v30 = vld [vmem:[%s5981_s3 + $0xa0] sm:$0xff] }
 0x4d9   : > { %v1483_v33 = vmul.f32 %v3628_v8, %v1482_v13 }
 0x4da   : > { %3437 = vmatmul.msk.f32.gmra.mxu2 %vm6056_vm3, %v4840_v4 }
 0x4db   : > { %v1487_v59 = vsel %vm1486_vm1, %v3628_v8, %v1483_v33 }
 0x4dc   : > { %v1584_v43 = vmul.f32 %v1487_v59, %v4694_v9  ;;  %v1903_v9 = vld [vmem:[%s5981_s3 + $0xe8] sm:$0xff]  ;;  %v1893_v59 = vld [vmem:[%s5981_s3 + $0x98] sm:$0xff] }
 0x4dd   : > { %1910 = vmatpush.msra.mxu3 %v1903_v9 }
 0x4de   : > { %v1601_v11 = vmul.f32 %v4742_v26, %v1584_v43 }
 0x4df   : > { %1911 = vmatpush.msra.mxu3 %v1902_v60 }
 0x4e0   : > { %v4847_v10 = vadd.f32 %v4751_v23, %v1601_v11 }
 0x4e1   : > { %1912 = vmatpush.msra.mxu3 %v1901_v22 }
 0x4e2   : > { %3438 = vmatmul.msk.f32.gmra.mxu2 %vm6058_vm10, %v4847_v10 }
 0x4e3   : > { %1913 = vmatpush.msra.mxu3 %v1900_v20 }
 0x4e5   : > { %1914 = vmatpush.msra.mxu3 %v1899_v45 }
 0x4e7   : > { %1915 = vmatpush.msra.mxu3 %v1898_v1 }
 0x4e9   : > { %1916 = vmatpush.msra.mxu3 %v1897_v51 }
 0x4eb   : > { %1917 = vmatpush.msra.mxu3 %v1896_v57 }
 0x4ed   : > { %1918 = vmatpush.msra.mxu3 %v1895_v32 }
 0x4ef   : > { %1919 = vmatpush.msra.mxu3 %v1894_v30 }
 0x4f1   : > { %1920 = vmatpush.msra.mxu3 %v1893_v59 }
 0x4f3   : > { %1921 = vmatpush.msra.mxu3 %v1892_v5 }
 0x518   : > { %v1361_v61 = vpop.xlane.xlu1 %1360 }
 0x519   : > { %v1393_v29 = vmul.f32 %v1361_v61, %v4614_v37  ;;  %v1891_v61 = vld [vmem:[%s5981_s3 + $0x88] sm:$0xff] }
 0x51a   : > { %1922 = vmatpush.msra.mxu3 %v1891_v61 }
 0x51b   : > { %v1409_v50 = vadd.f32 1e-12, %v1393_v29 }
 0x51d   : > { %3629 = vrsqrt.f32 %v1409_v50  ;;  %vm1494_vm0 = vweird.f32 %v1409_v50 }
 0x520   : > { %v1279_v17 = vpop.xlane.xlu1 %1278  ;;  %v1364_v8 = vpop.xlane.xlu0 %1363 }
 0x521   : > { %v1304_v48 = vmul.f32 %v4614_v37, %v1279_v17  ;;  %v1394_v55 = vmul.f32 %v1364_v8, %v4614_v37  ;;  %v1890_v17 = vld [vmem:[%s5981_s3 + $0x80] sm:$0xff] }
 0x522   : > { %1923 = vmatpush.msra.mxu3 %v1890_v17 }
 0x523   : > { %v3630_v19 = vpop.eup %3629  ;;  %v4888_v14 = vsub.f32 %v4737_v34, %v1304_v48  ;;  %v1410_v16 = vadd.f32 1e-12, %v1394_v55 }
 0x524   : > { %v1489_v63 = vmul.f32 %v3630_v19, %v1409_v50  ;;  %vm1495_vm14 = vweird.f32 %v3630_v19 }
 0x525   : > { %3631 = vrsqrt.f32 %v1410_v16  ;;  %v1336_v13 = vmul.f32 %v4888_v14, %v4888_v14  ;;  %vm1496_vm1 = vmor %vm1494_vm0, %vm1495_vm14 }
 0x526   : > { %v1490_v33 = vmul.f32 %v3630_v19, %v1489_v63  ;;  %vm6060_vm0 = vmmov %vm6056_vm3 }
 0x527   : > { %v1380_v34 = vsel %vm6059_vm6, %v1336_v13, 0.0  ;;  %vm1504_vm6 = vweird.f32 %v1410_v16 }
 0x528   : > { %v1491_v43 = vmul.f32 0.5, %v1490_v33  ;;  %1381 = vadd.xlane.f32.xlu2 %v1380_v34  ;;  %v1367_v11 = vpop.xlane.xlu2 %1366  ;;  %v1282_v15 = vpop.xlane.xlu0 %1281 }
 0x529   : > { %v1395_v9 = vmul.f32 %v1367_v11, %v4614_v37  ;;  %v1305_v60 = vmul.f32 %v4614_v37, %v1282_v15 }
 0x52a   : > { %v1492_v22 = vsub.f32 1.5, %v1491_v43 }
 0x52b   : > { %v3632_v20 = vpop.eup %3631  ;;  %v1411_v29 = vadd.f32 1e-12, %v1395_v9  ;;  %v4908_v45 = vsub.f32 %v4767_v54, %v1305_v60 }
 0x52c   : > { %v1493_v1 = vmul.f32 %v3630_v19, %v1492_v22  ;;  %v1499_v51 = vmul.f32 %v3632_v20, %v1410_v16  ;;  %vm1505_vm10 = vweird.f32 %v3632_v20 }
 0x52d   : > { %3633 = vrsqrt.f32 %v1411_v29  ;;  %v1337_v8 = vmul.f32 %v4908_v45, %v4908_v45  ;;  %vm1506_vm14 = vmor %vm1504_vm6, %vm1505_vm10 }
 0x52e   : > { %v1497_v57 = vsel %vm1496_vm1, %v3630_v19, %v1493_v1  ;;  %v1500_v48 = vmul.f32 %v3632_v20, %v1499_v51  ;;  %v4922_v19 = vld [vmem:[%s5980_s2 + $0xb8] ss:$0 sm:$0xff]  ;;  %vm6061_vm6 = vmmov %vm6060_vm0 }
 0x52f   : > { %v1585_v55 = vmul.f32 %v1497_v57, %v4723_v52  ;;  %v1383_v54 = vsel %vm6056_vm3, %v1337_v8, 0.0  ;;  %vm1514_vm3 = vweird.f32 %v1411_v29 }
 0x530   : > { %v1501_v32 = vmul.f32 0.5, %v1500_v48  ;;  %v1370_v63 = vpop.xlane.xlu1 %1369  ;;  %1384 = vadd.xlane.f32.xlu0 %v1383_v54 }
 0x531   : > { %v1396_v50 = vmul.f32 %v1370_v63, %v4614_v37  ;;  %v1602_v30 = vmul.f32 %v4742_v26, %v1585_v55 }
 0x532   : > { %v1502_v13 = vsub.f32 1.5, %v1501_v32 }
 0x533   : > { %v3634_v33 = vpop.eup %3633  ;;  %v1412_v59 = vadd.f32 1e-12, %v1396_v50  ;;  %v4925_v52 = vadd.f32 %v4751_v23, %v1602_v30 }
 0x534   : > { %v1503_v34 = vmul.f32 %v3632_v20, %v1502_v13  ;;  %v1509_v43 = vmul.f32 %v3634_v33, %v1411_v29  ;;  %vm1515_vm1 = vweird.f32 %v3634_v33 }
 0x535   : > { %3635 = vrsqrt.f32 %v1412_v59  ;;  %v1698_v11 = vpop.f32.mrf.mxu2  ;;  %3439 = vmatmul.msk.f32.gmra.mxu2 %vm6060_vm0, %v4925_v52  ;;  %vm1516_vm10 = vmor %vm1514_vm3, %vm1515_vm1  ;;  %vm1524_vm0 = vweird.f32 %v1412_v59 }
 0x536   : > { %v1507_v15 = vsel %vm1506_vm14, %v3632_v20, %v1503_v34  ;;  %v1510_v5 = vmul.f32 %v3634_v33, %v1509_v43  ;;  %v1699_v9 = vadd.f32 %v1698_v11, %v4922_v19  ;;  %vm6062_vm3 = vmmov %vm6061_vm6 }
 0x537   : > { %v1586_v60 = vmul.f32 %v1507_v15, %v4732_v47 }
 0x538   : > { %v1511_v22 = vmul.f32 0.5, %v1510_v5  ;;  %v1762_v61 = vmul.f32 0.044715, %v1699_v9  ;;  %v1373_v1 = vpop.xlane.xlu2 %1372 }
 0x539   : > { %v1397_v51 = vmul.f32 %v1373_v1, %v4614_v37  ;;  %v1603_v16 = vmul.f32 %v4742_v26, %v1586_v60 }
 0x53a   : > { %v1512_v17 = vsub.f32 1.5, %v1511_v22  ;;  %v1778_v8 = vmul.f32 %v1762_v61, %v1699_v9 }
 0x53b   : > { %v3636_v57 = vpop.eup %3635  ;;  %v1413_v48 = vadd.f32 1e-12, %v1397_v51  ;;  %v4934_v55 = vadd.f32 %v4751_v23, %v1603_v16 }
 0x53c   : > { %v1513_v20 = vmul.f32 %v3634_v33, %v1512_v17  ;;  %v1519_v54 = vmul.f32 %v3636_v57, %v1412_v59  ;;  %v1794_v32 = vmul.f32 %v1778_v8, %v1699_v9  ;;  %vm1525_vm14 = vweird.f32 %v3636_v57 }
 0x53d   : > { %3637 = vrsqrt.f32 %v1413_v48  ;;  %v1701_v47 = vpop.f32.mrf.mxu2  ;;  %3440 = vmatmul.msk.f32.gmra.mxu2 %vm6061_vm6, %v4934_v55  ;;  %vm1526_vm1 = vmor %vm1524_vm0, %vm1525_vm14  ;;  %vm1534_vm6 = vweird.f32 %v1413_v48 }
 0x53e   : > { %v1517_v63 = vsel %vm1516_vm10, %v3634_v33, %v1513_v20  ;;  %v1520_v50 = vmul.f32 %v3636_v57, %v1519_v54  ;;  %v4939_v30 = vadd.f32 %v1701_v47, %v4922_v19  ;;  %v1810_v13 = vadd.f32 %v1794_v32, %v1699_v9  ;;  %vm6063_vm0 = vmmov %vm6062_vm3 }
 0x53f   : > { %v1587_v34 = vmul.f32 %v1517_v63, %v4764_v18 }
 0x540   : > { %v1521_v43 = vmul.f32 0.5, %v1520_v50  ;;  %v1376_v11 = vpop.xlane.xlu0 %1375  ;;  %v1826_v15 = vmul.f32 0.7978846, %v1810_v13  ;;  %v1763_v29 = vmul.f32 0.044715, %v4939_v30 }
 0x541   : > { %v1398_v5 = vmul.f32 %v1376_v11, %v4614_v37  ;;  %v1604_v60 = vmul.f32 %v4742_v26, %v1587_v34 }
 0x542   : > { %v1522_v22 = vsub.f32 1.5, %v1521_v43  ;;  %3639 = vtanh.f32 %v1826_v15  ;;  %v1779_v33 = vmul.f32 %v1763_v29, %v4939_v30  ;;  %v1746_v29 = vmul.f32 0.5, %v1699_v9 }
 0x543   : > { %v3638_v61 = vpop.eup %3637  ;;  %v4946_v1 = vadd.f32 1e-12, %v1398_v5  ;;  %v4949_v51 = vadd.f32 %v4751_v23, %v1604_v60 }
 0x544   : > { %v1523_v18 = vmul.f32 %v3636_v57, %v1522_v22  ;;  %v1529_v16 = vmul.f32 %v3638_v61, %v1413_v48  ;;  %v1795_v17 = vmul.f32 %v1779_v33, %v4939_v30  ;;  %vm1535_vm10 = vweird.f32 %v3638_v61 }
 0x545   : > { %3641 = vrsqrt.f32 %v4946_v1  ;;  %v1704_v8 = vpop.f32.mrf.mxu2  ;;  %3441 = vmatmul.msk.f32.gmra.mxu2 %vm6062_vm3, %v4949_v51  ;;  %vm1536_vm14 = vmor %vm1534_vm6, %vm1535_vm10  ;;  %vm1544_vm3 = vweird.f32 %v4946_v1 }
 0x546   : > { %v1527_v20 = vsel %vm1526_vm1, %v3636_v57, %v1523_v18  ;;  %v1530_v54 = vmul.f32 %v3638_v61, %v1529_v16  ;;  %v4956_v32 = vadd.f32 %v1704_v8, %v4922_v19  ;;  %v1811_v47 = vadd.f32 %v1795_v17, %v4939_v30  ;;  %vm6064_vm6 = vmmov %vm6063_vm0 }
 0x547   : > { %v1588_v63 = vmul.f32 %v1527_v20, %v4782_v0 }
 0x548   : > { %v3640_v59 = vpop.eup %3639  ;;  %v1531_v50 = vmul.f32 0.5, %v1530_v54  ;;  %v1764_v13 = vmul.f32 0.044715, %v4956_v32  ;;  %v1379_v34 = vpop.xlane.xlu1 %1378  ;;  %v1827_v43 = vmul.f32 0.7978846, %v1811_v47 }
 0x549   : > { %v1399_v11 = vmul.f32 %v1379_v34, %v4614_v37  ;;  %v1605_v15 = vmul.f32 %v4742_v26, %v1588_v63  ;;  %v1858_v57 = vadd.f32 1.0, %v3640_v59 }
 0x54a   : > { %v1532_v5 = vsub.f32 1.5, %v1531_v50  ;;  %3643 = vtanh.f32 %v1827_v43  ;;  %v1780_v60 = vmul.f32 %v1764_v13, %v4956_v32 }
 0x54b   : > { %v3642_v22 = vpop.eup %3641  ;;  %v1415_v33 = vadd.f32 1e-12, %v1399_v11  ;;  %v4965_v0 = vadd.f32 %v4751_v23, %v1605_v15  ;;  %v1874_v18 = vmul.f32 %v1858_v57, %v1746_v29  ;;  %v1747_v11 = vmul.f32 0.5, %v4939_v30 }
 0x54c   : > { %v1533_v16 = vmul.f32 %v3638_v61, %v1532_v5  ;;  %v1539_v17 = vmul.f32 %v3642_v22, %v4946_v1  ;;  %v1796_v8 = vmul.f32 %v1780_v60, %v4956_v32  ;;  %vm1545_vm1 = vweird.f32 %v3642_v22 }
 0x54d   : > { %3645 = vrsqrt.f32 %v1415_v33  ;;  %v1707_v9 = vpop.f32.mrf.mxu2  ;;  %3442 = vmatmul.msk.f32.gmra.mxu2 %vm6063_vm0, %v4965_v0  ;;  %1924 = vmatmul.f32.vlgmr.msra.gmra.mxu3 %v1874_v18  ;;  %vm1546_vm10 = vmor %vm1544_vm3, %vm1545_vm1  ;;  %vm1554_vm0 = vweird.f32 %v1415_v33 }
 0x54e   : > { %v1537_v20 = vsel %vm1536_vm14, %v3638_v61, %v1533_v16  ;;  %v1540_v54 = vmul.f32 %v3642_v22, %v1539_v17  ;;  %v1708_v47 = vadd.f32 %v1707_v9, %v4922_v19  ;;  %v1812_v63 = vadd.f32 %v1796_v8, %v4956_v32  ;;  %vm6065_vm3 = vmmov %vm6064_vm6 }
 0x54f   : > { %v1589_v59 = vmul.f32 %v1537_v20, %v4798_v56 }
 0x550   : > { %v3644_v48 = vpop.eup %3643  ;;  %v1541_v50 = vmul.f32 0.5, %v1540_v54  ;;  %v1765_v13 = vmul.f32 0.044715, %v1708_v47  ;;  %v1828_v34 = vmul.f32 0.7978846, %v1812_v63 }
 0x551   : > { %v1606_v43 = vmul.f32 %v4742_v26, %v1589_v59  ;;  %v1859_v15 = vadd.f32 1.0, %v3644_v48 }
 0x552   : > { %v1542_v29 = vsub.f32 1.5, %v1541_v50  ;;  %3647 = vtanh.f32 %v1828_v34  ;;  %v1781_v61 = vmul.f32 %v1765_v13, %v1708_v47  ;;  %v1748_v13 = vmul.f32 0.5, %v4956_v32 }
 0x553   : > { %v3646_v57 = vpop.eup %3645  ;;  %v4977_v5 = vadd.f32 %v4751_v23, %v1606_v43  ;;  %v1875_v60 = vmul.f32 %v1859_v15, %v1747_v11 }
 0x554   : > { %v1543_v18 = vmul.f32 %v3642_v22, %v1542_v29  ;;  %v1549_v56 = vmul.f32 %v3646_v57, %v1415_v33  ;;  %v1797_v16 = vmul.f32 %v1781_v61, %v1708_v47  ;;  %vm1555_vm14 = vweird.f32 %v3646_v57 }
 0x555   : > { %v1710_v17 = vpop.f32.mrf.mxu2  ;;  %3443 = vmatmul.msk.f32.gmra.mxu2 %vm6064_vm6, %v4977_v5  ;;  %1927 = vmatmul.f32.gmra.mxu3 %v1875_v60  ;;  %vm1556_vm1 = vmor %vm1554_vm0, %vm1555_vm14 }
 0x556   : > { %v1547_v30 = vsel %vm1546_vm10, %v3642_v22, %v1543_v18  ;;  %v1550_v8 = vmul.f32 %v3646_v57, %v1549_v56  ;;  %v1711_v9 = vadd.f32 %v1710_v17, %v4922_v19  ;;  %v1813_v20 = vadd.f32 %v1797_v16, %v1708_v47  ;;  %vm6066_vm10 = vmmov %vm6065_vm3 }
 0x557   : > { %v1590_v54 = vmul.f32 %v1547_v30, %v4813_v36 }
 0x558   : > { %v3648_v63 = vpop.eup %3647  ;;  %v1551_v59 = vmul.f32 0.5, %v1550_v8  ;;  %v1766_v48 = vmul.f32 0.044715, %v1711_v9  ;;  %v1829_v50 = vmul.f32 0.7978846, %v1813_v20  ;;  %v1749_v20 = vmul.f32 0.5, %v1708_v47 }
 0x559   : > { %v1607_v1 = vmul.f32 %v4742_v26, %v1590_v54  ;;  %v1860_v34 = vadd.f32 1.0, %v3648_v63  ;;  %v1750_v47 = vmul.f32 0.5, %v1711_v9 }
 0x55a   : > { %v1552_v43 = vsub.f32 1.5, %v1551_v59  ;;  %3649 = vtanh.f32 %v1829_v50  ;;  %v1782_v11 = vmul.f32 %v1766_v48, %v1711_v9 }
 0x55b   : > { %v4987_v22 = vadd.f32 %v4751_v23, %v1607_v1  ;;  %v1876_v15 = vmul.f32 %v1860_v34, %v1748_v13 }
 0x55c   : > { %v1553_v29 = vmul.f32 %v3646_v57, %v1552_v43  ;;  %v1798_v36 = vmul.f32 %v1782_v11, %v1711_v9 }
 0x55d   : > { %v1713_v61 = vpop.f32.mrf.mxu2  ;;  %3444 = vmatmul.msk.f32.gmra.mxu2 %vm6065_vm3, %v4987_v22  ;;  %1930 = vmatmul.f32.gmra.mxu3 %v1876_v15 }
 0x55e   : > { %v1557_v60 = vsel %vm1556_vm1, %v3646_v57, %v1553_v29  ;;  %v1714_v32 = vadd.f32 %v1713_v61, %v4922_v19  ;;  %v1814_v18 = vadd.f32 %v1798_v36, %v1711_v9 }
 0x55f   : > { %v1591_v56 = vmul.f32 %v1557_v60, %v4827_v28 }
 0x560   : > { %v3650_v16 = vpop.eup %3649  ;;  %v1767_v17 = vmul.f32 0.044715, %v1714_v32  ;;  %v1830_v30 = vmul.f32 0.7978846, %v1814_v18  ;;  %v1751_v18 = vmul.f32 0.5, %v1714_v32 }
 0x561   : > { %v1608_v8 = vmul.f32 %v4742_v26, %v1591_v56  ;;  %v1861_v33 = vadd.f32 1.0, %v3650_v16 }
 0x562   : > { %3651 = vtanh.f32 %v1830_v30  ;;  %v1783_v54 = vmul.f32 %v1767_v17, %v1714_v32 }
 0x563   : > { %v4995_v63 = vadd.f32 %v4751_v23, %v1608_v8  ;;  %v1877_v59 = vmul.f32 %v1861_v33, %v1749_v20 }
 0x564   : > { %v1799_v48 = vmul.f32 %v1783_v54, %v1714_v32 }
 0x565   : > { %v1716_v57 = vpop.f32.mrf.mxu2  ;;  %3445 = vmatmul.msk.f32.gmra.mxu2 %vm6066_vm10, %v4995_v63  ;;  %1933 = vmatmul.f32.gmra.mxu3 %v1877_v59 }
 0x566   : > { %v1717_v28 = vadd.f32 %v1716_v57, %v4922_v19  ;;  %v1815_v50 = vadd.f32 %v1799_v48, %v1714_v32 }
 0x568   : > { %v3652_v1 = vpop.eup %3651  ;;  %v1768_v13 = vmul.f32 0.044715, %v1717_v28  ;;  %v1831_v34 = vmul.f32 0.7978846, %v1815_v50  ;;  %v1752_v30 = vmul.f32 0.5, %v1717_v28 }
 0x569   : > { %v1862_v43 = vadd.f32 1.0, %v3652_v1 }
 0x56a   : > { %3653 = vtanh.f32 %v1831_v34  ;;  %v1784_v11 = vmul.f32 %v1768_v13, %v1717_v28 }
 0x56b   : > { %v1878_v15 = vmul.f32 %v1862_v43, %v1750_v47 }
 0x56c   : > { %v1800_v29 = vmul.f32 %v1784_v11, %v1717_v28 }
 0x56d   : > { %1936 = vmatmul.f32.gmra.mxu3 %v1878_v15 }
 0x56e   : > { %v1816_v36 = vadd.f32 %v1800_v29, %v1717_v28 }
 0x570   : > { %v3654_v61 = vpop.eup %3653  ;;  %v1832_v60 = vmul.f32 0.7978846, %v1816_v36 }
 0x571   : > { %v1863_v56 = vadd.f32 1.0, %v3654_v61 }
 0x572   : > { %3655 = vtanh.f32 %v1832_v60 }
 0x573   : > { %v1879_v16 = vmul.f32 %v1863_v56, %v1751_v18 }
 0x575   : > { %1939 = vmatmul.f32.gmra.mxu3 %v1879_v16 }
 0x578   : > { %v3656_v17 = vpop.eup %3655 }
 0x579   : > { %v1864_v8 = vadd.f32 1.0, %v3656_v17 }
 0x57b   : > { %v1880_v20 = vmul.f32 %v1864_v8, %v1752_v30 }
 0x57d   : > { %1942 = vmatmul.f32.gmra.mxu3 %v1880_v20 }
 0x59b   : > { %v1382_v9 = vpop.xlane.xlu2 %1381 }
 0x59c   : > { %v1400_v33 = vmul.f32 %v1382_v9, %v4614_v37 }
 0x59e   : > { %v1416_v54 = vadd.f32 1e-12, %v1400_v33 }
 0x5a0   : > { %3657 = vrsqrt.f32 %v1416_v54  ;;  %vm1564_vm14 = vweird.f32 %v1416_v54 }
 0x5a3   : > { %v1385_v59 = vpop.xlane.xlu0 %1384 }
 0x5a4   : > { %v1401_v48 = vmul.f32 %v1385_v59, %v4614_v37 }
 0x5a6   : > { %v3658_v57 = vpop.eup %3657  ;;  %v1417_v50 = vadd.f32 1e-12, %v1401_v48 }
 0x5a7   : > { %v1559_v32 = vmul.f32 %v3658_v57, %v1416_v54  ;;  %vm1565_vm6 = vweird.f32 %v3658_v57 }
 0x5a8   : > { %3659 = vrsqrt.f32 %v1417_v50  ;;  %vm1566_vm0 = vmor %vm1564_vm14, %vm1565_vm6  ;;  %vm1574_vm3 = vweird.f32 %v1417_v50 }
 0x5a9   : > { %v1560_v1 = vmul.f32 %v3658_v57, %v1559_v32  ;;  %vm6068_vm6 = vmmov %vm6067_vm12 }
 0x5aa   : > { %vm6070_vm14 = vmmov %vm6068_vm6 }
 0x5ab   : > { %v1561_v13 = vmul.f32 0.5, %v1560_v1 }
 0x5ad   : > { %v1562_v34 = vsub.f32 1.5, %v1561_v13 }
 0x5ae   : > { %v3660_v28 = vpop.eup %3659 }
 0x5af   : > { %v1563_v47 = vmul.f32 %v3658_v57, %v1562_v34  ;;  %v1569_v43 = vmul.f32 %v3660_v28, %v1417_v50  ;;  %vm1575_vm1 = vweird.f32 %v3660_v28 }
 0x5b0   : > { %vm1576_vm10 = vmor %vm1574_vm3, %vm1575_vm1 }
 0x5b1   : > { %v1567_v11 = vsel %vm1566_vm0, %v3658_v57, %v1563_v47  ;;  %v1570_v15 = vmul.f32 %v3660_v28, %v1569_v43  ;;  %vm6071_vm0 = vmmov %vm6068_vm6 }
 0x5b2   : > { %v1592_v29 = vmul.f32 %v1567_v11, %v4888_v14  ;;  %vm6072_vm1 = vmmov %vm6071_vm0 }
 0x5b3   : > { %v1571_v36 = vmul.f32 0.5, %v1570_v15  ;;  %v5022_v15 = vld [vmem:[%s5981_s3 + $0x101] ss:$0 sm:$0xff]  ;;  %vm6073_vm3 = vmmov %vm6071_vm0 }
 0x5b4   : > { %v1609_v61 = vmul.f32 %v4742_v26, %v1592_v29 }
 0x5b5   : > { %v1572_v60 = vsub.f32 1.5, %v1571_v36 }
 0x5b6   : > { %v5005_v18 = vadd.f32 %v4751_v23, %v1609_v61 }
 0x5b7   : > { %v1573_v56 = vmul.f32 %v3660_v28, %v1572_v60 }
 0x5b8   : > { %v1719_v16 = vpop.f32.mrf.mxu2  ;;  %3446 = vmatmul.msk.f32.gmra.mxu2 %vm6067_vm12, %v5005_v18  ;;  %vm6069_vm12 = vmmov %vm6068_vm6 }
 0x5b9   : > { %v1577_v17 = vsel %vm1576_vm10, %v3660_v28, %v1573_v56  ;;  %v1720_v30 = vadd.f32 %v1719_v16, %v4922_v19  ;;  %vm6074_vm10 = vmmov %vm6071_vm0 }
 0x5ba   : > { %v1593_v14 = vmul.f32 %v1577_v17, %v4908_v45 }
 0x5bb   : > { %v1769_v8 = vmul.f32 0.044715, %v1720_v30  ;;  %v1753_v43 = vmul.f32 0.5, %v1720_v30 }
 0x5bc   : > { %v1610_v20 = vmul.f32 %v4742_v26, %v1593_v14 }
 0x5bd   : > { %v1785_v9 = vmul.f32 %v1769_v8, %v1720_v30 }
 0x5be   : > { %v5013_v33 = vadd.f32 %v4751_v23, %v1610_v20 }
 0x5bf   : > { %v1801_v54 = vmul.f32 %v1785_v9, %v1720_v30 }
 0x5c0   : > { %v1722_v59 = vpop.f32.mrf.mxu2  ;;  %3447 = vmatmul.msk.f32.gmra.mxu2 %vm6068_vm6, %v5013_v33  ;;  %vm6075_vm6 = vmmov %vm6071_vm0 }
 0x5c1   : > { %v1723_v48 = vadd.f32 %v1722_v59, %v4922_v19  ;;  %v1817_v57 = vadd.f32 %v1801_v54, %v1720_v30 }
 0x5c3   : > { %v1770_v50 = vmul.f32 0.044715, %v1723_v48  ;;  %v1833_v32 = vmul.f32 0.7978846, %v1817_v57  ;;  %v1754_v54 = vmul.f32 0.5, %v1723_v48 }
 0x5c5   : > { %3661 = vtanh.f32 %v1833_v32  ;;  %v1786_v1 = vmul.f32 %v1770_v50, %v1723_v48 }
 0x5c7   : > { %v1802_v45 = vmul.f32 %v1786_v1, %v1723_v48 }
 0x5c8   : > { %v1725_v13 = vpop.f32.mrf.mxu2 }
 0x5c9   : > { %v1726_v26 = vadd.f32 %v1725_v13, %v4922_v19  ;;  %v1818_v34 = vadd.f32 %v1802_v45, %v1723_v48 }
 0x5cb   : > { %v3662_v28 = vpop.eup %3661  ;;  %v1771_v23 = vmul.f32 0.044715, %v1726_v26  ;;  %v1834_v47 = vmul.f32 0.7978846, %v1818_v34 }
 0x5cc   : > { %v1865_v11 = vadd.f32 1.0, %v3662_v28 }
 0x5cd   : > { %3663 = vtanh.f32 %v1834_v47  ;;  %v1787_v29 = vmul.f32 %v1771_v23, %v1726_v26 }
 0x5ce   : > { %v1881_v36 = vmul.f32 %v1865_v11, %v1753_v43  ;;  %v1755_v11 = vmul.f32 0.5, %v1726_v26 }
 0x5cf   : > { %v1803_v61 = vmul.f32 %v1787_v29, %v1726_v26 }
 0x5d0   : > { %v1728_v60 = vpop.f32.mrf.mxu2  ;;  %v1925_v56 = vpop.f32.mrf.mxu3  ;;  %1945 = vmatmul.f32.gmra.mxu3 %v1881_v36 }
 0x5d1   : > { %v1729_v16 = vadd.f32 %v1728_v60, %v4922_v19  ;;  %v1926_v17 = vadd.f32 %v5022_v15, %v1925_v56  ;;  %v1819_v14 = vadd.f32 %v1803_v61, %v1726_v26 }
 0x5d3   : > { %v3664_v8 = vpop.eup %3663  ;;  %v1772_v30 = vmul.f32 0.044715, %v1729_v16  ;;  %v5027_v20 = vadd.f32 %v1926_v17, %v4761_v6  ;;  %v1835_v9 = vmul.f32 0.7978846, %v1819_v14 }
 0x5d4   : > { %v1866_v59 = vadd.f32 1.0, %v3664_v8 }
 0x5d5   : > { %v1989_v57 = vsel %vm6069_vm12, %v5027_v20, 0.0  ;;  %3665 = vtanh.f32 %v1835_v9  ;;  %v1788_v50 = vmul.f32 %v1772_v30, %v1729_v16  ;;  %vm6076_vm12 = vmmov %vm6071_vm0 }
 0x5d6   : > { %1990 = vadd.xlane.f32.xlu1 %v1989_v57  ;;  %v1882_v32 = vmul.f32 %v1866_v59, %v1754_v54  ;;  %v1756_v57 = vmul.f32 0.5, %v1729_v16 }
 0x5d7   : > { %v1804_v1 = vmul.f32 %v1788_v50, %v1729_v16 }
 0x5d8   : > { %v1731_v45 = vpop.f32.mrf.mxu2  ;;  %v1928_v13 = vpop.f32.mrf.mxu3  ;;  %1948 = vmatmul.f32.gmra.mxu3 %v1882_v32 }
 0x5d9   : > { %v1732_v34 = vadd.f32 %v1731_v45, %v4922_v19  ;;  %v1929_v28 = vadd.f32 %v5022_v15, %v1928_v13  ;;  %v1820_v6 = vadd.f32 %v1804_v1, %v1729_v16 }
 0x5db   : > { %v3666_v23 = vpop.eup %3665  ;;  %v1773_v47 = vmul.f32 0.044715, %v1732_v34  ;;  %v5034_v48 = vadd.f32 %v1929_v28, %v4785_v38  ;;  %v1836_v43 = vmul.f32 0.7978846, %v1820_v6 }
 0x5dc   : > { %v1867_v29 = vadd.f32 1.0, %v3666_v23 }
 0x5dd   : > { %v1992_v36 = vsel %vm6070_vm14, %v5034_v48, 0.0  ;;  %3667 = vtanh.f32 %v1836_v43  ;;  %v1789_v61 = vmul.f32 %v1773_v47, %v1732_v34  ;;  %vm6077_vm14 = vmmov %vm6071_vm0 }
 0x5de   : > { %1993 = vadd.xlane.f32.xlu2 %v1992_v36  ;;  %v1883_v60 = vmul.f32 %v1867_v29, %v1755_v11  ;;  %v1757_v36 = vmul.f32 0.5, %v1732_v34 }
 0x5df   : > { %v1805_v56 = vmul.f32 %v1789_v61, %v1732_v34 }
 0x5e0   : > { %v1734_v17 = vpop.f32.mrf.mxu2  ;;  %v1931_v14 = vpop.f32.mrf.mxu3  ;;  %1951 = vmatmul.f32.gmra.mxu3 %v1883_v60 }
 0x5e1   : > { %v1735_v8 = vadd.f32 %v1734_v17, %v4922_v19  ;;  %v1932_v30 = vadd.f32 %v5022_v15, %v1931_v14  ;;  %v1821_v38 = vadd.f32 %v1805_v56, %v1732_v34 }
 0x5e3   : > { %v3668_v9 = vpop.eup %3667  ;;  %v1774_v54 = vmul.f32 0.044715, %v1735_v8  ;;  %v5041_v26 = vadd.f32 %v1932_v30, %v4801_v46  ;;  %v1837_v59 = vmul.f32 0.7978846, %v1821_v38  ;;  %v1758_v34 = vmul.f32 0.5, %v1735_v8 }
 0x5e4   : > { %v1868_v50 = vadd.f32 1.0, %v3668_v9 }
 0x5e5   : > { %v1995_v32 = vsel %vm6071_vm0, %v5041_v26, 0.0  ;;  %3669 = vtanh.f32 %v1837_v59  ;;  %v1790_v1 = vmul.f32 %v1774_v54, %v1735_v8 }
 0x5e6   : > { %1996 = vadd.xlane.f32.xlu0 %v1995_v32  ;;  %v1884_v45 = vmul.f32 %v1868_v50, %v1756_v57 }
 0x5e7   : > { %v1806_v13 = vmul.f32 %v1790_v1, %v1735_v8 }
 0x5e8   : > { %v1737_v28 = vpop.f32.mrf.mxu2  ;;  %v1934_v6 = vpop.f32.mrf.mxu3  ;;  %1954 = vmatmul.f32.gmra.mxu3 %v1884_v45 }
 0x5e9   : > { %v1738_v23 = vadd.f32 %v1737_v28, %v4922_v19  ;;  %v1935_v47 = vadd.f32 %v5022_v15, %v1934_v6  ;;  %v1822_v46 = vadd.f32 %v1806_v13, %v1735_v8 }
 0x5eb   : > { %v3670_v43 = vpop.eup %3669  ;;  %v1775_v11 = vmul.f32 0.044715, %v1738_v23  ;;  %v5048_v16 = vadd.f32 %v1935_v47, %v4816_v27  ;;  %v1838_v29 = vmul.f32 0.7978846, %v1822_v46  ;;  %v1759_v6 = vmul.f32 0.5, %v1738_v23 }
 0x5ec   : > { %v1869_v61 = vadd.f32 1.0, %v3670_v43 }
 0x5ed   : > { %v1998_v60 = vsel %vm6072_vm1, %v5048_v16, 0.0  ;;  %3671 = vtanh.f32 %v1838_v29  ;;  %v1791_v56 = vmul.f32 %v1775_v11, %v1738_v23  ;;  %vm6078_vm1 = vmmov %vm6071_vm0 }
 0x5ee   : > { %1999 = vadd.xlane.f32.xlu1 %v1998_v60  ;;  %v1885_v17 = vmul.f32 %v1869_v61, %v1757_v36 }
 0x5ef   : > { %v1807_v14 = vmul.f32 %v1791_v56, %v1738_v23 }
 0x5f0   : > { %v1937_v30 = vpop.f32.mrf.mxu3  ;;  %1957 = vmatmul.f32.gmra.mxu3 %v1885_v17 }
 0x5f1   : > { %v1938_v38 = vadd.f32 %v5022_v15, %v1937_v30  ;;  %v1823_v9 = vadd.f32 %v1807_v14, %v1738_v23 }
 0x5f3   : > { %v3672_v54 = vpop.eup %3671  ;;  %v5054_v27 = vadd.f32 %v1938_v38, %v4830_v35  ;;  %v1839_v59 = vmul.f32 0.7978846, %v1823_v9 }
 0x5f4   : > { %v1870_v57 = vadd.f32 1.0, %v3672_v54 }
 0x5f5   : > { %v2001_v50 = vsel %vm6073_vm3, %v5054_v27, 0.0  ;;  %3673 = vtanh.f32 %v1839_v59  ;;  %vm6079_vm3 = vmmov %vm6071_vm0 }
 0x5f6   : > { %2002 = vadd.xlane.f32.xlu2 %v2001_v50  ;;  %v1886_v32 = vmul.f32 %v1870_v57, %v1758_v34 }
 0x5f8   : > { %v1940_v1 = vpop.f32.mrf.mxu3  ;;  %1960 = vmatmul.f32.gmra.mxu3 %v1886_v32 }
 0x5f9   : > { %v1941_v45 = vadd.f32 %v5022_v15, %v1940_v1 }
 0x5fb   : > { %v3674_v13 = vpop.eup %3673  ;;  %v5060_v28 = vadd.f32 %v1941_v45, %v4840_v4 }
 0x5fc   : > { %v1871_v35 = vadd.f32 1.0, %v3674_v13 }
 0x5fd   : > { %v2004_v8 = vsel %vm6074_vm10, %v5060_v28, 0.0  ;;  %vm6080_vm10 = vmmov %vm6071_vm0 }
 0x5fe   : > { %2005 = vadd.xlane.f32.xlu0 %v2004_v8  ;;  %v1887_v47 = vmul.f32 %v1871_v35, %v1759_v6 }
 0x600   : > { %v1943_v46 = vpop.f32.mrf.mxu3  ;;  %1963 = vmatmul.f32.gmra.mxu3 %v1887_v47 }
 0x601   : > { %v1944_v43 = vadd.f32 %v5022_v15, %v1943_v46 }
 0x603   : > { %v5066_v11 = vadd.f32 %v1944_v43, %v4847_v10 }
 0x605   : > { %v2007_v29 = vsel %vm6075_vm6, %v5066_v11, 0.0  ;;  %vm6081_vm6 = vmmov %vm6071_vm0 }
 0x606   : > { %2008 = vadd.xlane.f32.xlu2 %v2007_v29 }
 0x63b   : > { %v1740_v4 = vpop.f32.mrf.mxu2 }
 0x63c   : > { %v1741_v23 = vadd.f32 %v1740_v4, %v4922_v19 }
 0x63e   : > { %v1776_v36 = vmul.f32 0.044715, %v1741_v23  ;;  %v1760_v45 = vmul.f32 0.5, %v1741_v23 }
 0x640   : > { %v1792_v61 = vmul.f32 %v1776_v36, %v1741_v23 }
 0x642   : > { %v1808_v60 = vmul.f32 %v1792_v61, %v1741_v23 }
 0x643   : > { %v1743_v56 = vpop.f32.mrf.mxu2 }
 0x644   : > { %v1744_v17 = vadd.f32 %v1743_v56, %v4922_v19  ;;  %v1824_v14 = vadd.f32 %v1808_v60, %v1741_v23 }
 0x646   : > { %v1777_v30 = vmul.f32 0.044715, %v1744_v17  ;;  %v1840_v38 = vmul.f32 0.7978846, %v1824_v14  ;;  %v1761_v23 = vmul.f32 0.5, %v1744_v17 }
 0x648   : > { %3675 = vtanh.f32 %v1840_v38  ;;  %v1793_v9 = vmul.f32 %v1777_v30, %v1744_v17 }
 0x649   : > { %v1991_v10 = vpop.xlane.xlu1 %1990 }
 0x64a   : > { %v2037_v54 = vmul.f32 %v1991_v10, %v4614_v37  ;;  %v1809_v59 = vmul.f32 %v1793_v9, %v1744_v17 }
 0x64c   : > { %v5074_v34 = vsub.f32 %v5027_v20, %v2037_v54  ;;  %v1825_v57 = vadd.f32 %v1809_v59, %v1744_v17 }
 0x64e   : > { %v3676_v50 = vpop.eup %3675  ;;  %v2069_v32 = vmul.f32 %v5074_v34, %v5074_v34  ;;  %v1841_v1 = vmul.f32 0.7978846, %v1825_v57 }
 0x64f   : > { %v1872_v19 = vadd.f32 1.0, %v3676_v50 }
 0x650   : > { %v2085_v13 = vsel %vm6076_vm12, %v2069_v32, 0.0  ;;  %3677 = vtanh.f32 %v1841_v1  ;;  %vm6082_vm12 = vmmov %vm6071_vm0 }
 0x651   : > { %2086 = vadd.xlane.f32.xlu1 %v2085_v13  ;;  %v1994_v6 = vpop.xlane.xlu2 %1993  ;;  %v1888_v35 = vmul.f32 %v1872_v19, %v1760_v45 }
 0x652   : > { %v2038_v8 = vmul.f32 %v1994_v6, %v4614_v37 }
 0x653   : > { %v1946_v47 = vpop.f32.mrf.mxu3  ;;  %1966 = vmatmul.f32.gmra.mxu3 %v1888_v35 }
 0x654   : > { %v5081_v20 = vsub.f32 %v5034_v48, %v2038_v8  ;;  %v1947_v46 = vadd.f32 %v5022_v15, %v1946_v47 }
 0x656   : > { %v3678_v43 = vpop.eup %3677  ;;  %v5085_v29 = vadd.f32 %v1947_v46, %v4925_v52  ;;  %v2070_v4 = vmul.f32 %v5081_v20, %v5081_v20 }
 0x657   : > { %v1873_v36 = vadd.f32 1.0, %v3678_v43 }
 0x658   : > { %v2010_v61 = vsel %vm6077_vm14, %v5085_v29, 0.0  ;;  %v2088_v60 = vsel %vm6071_vm0, %v2070_v4, 0.0  ;;  %vm6083_vm14 = vmmov %vm6071_vm0 }
 0x659   : > { %2011 = vadd.xlane.f32.xlu1 %v2010_v61  ;;  %2089 = vadd.xlane.f32.xlu0 %v2088_v60  ;;  %v1997_v48 = vpop.xlane.xlu0 %1996  ;;  %v1889_v56 = vmul.f32 %v1873_v36, %v1761_v23 }
 0x65a   : > { %v2039_v14 = vmul.f32 %v1997_v48, %v4614_v37 }
 0x65b   : > { %v1949_v30 = vpop.f32.mrf.mxu3  ;;  %1969 = vmatmul.f32.gmra.mxu3 %v1889_v56 }
 0x65c   : > { %v5094_v52 = vsub.f32 %v5041_v26, %v2039_v14  ;;  %v1950_v38 = vadd.f32 %v5022_v15, %v1949_v30 }
 0x65e   : > { %v5098_v17 = vadd.f32 %v1950_v38, %v4934_v55  ;;  %v2071_v9 = vmul.f32 %v5094_v52, %v5094_v52 }
 0x660   : > { %v2013_v10 = vsel %vm6078_vm1, %v5098_v17, 0.0  ;;  %v2091_v54 = vsel %vm6079_vm3, %v2071_v9, 0.0  ;;  %vm6084_vm1 = vmmov %vm6071_vm0 }
 0x661   : > { %v2000_v59 = vpop.xlane.xlu1 %1999  ;;  %2014 = vadd.xlane.f32.xlu0 %v2013_v10  ;;  %2092 = vadd.xlane.f32.xlu2 %v2091_v54  ;;  %vm6085_vm3 = vmmov %vm6071_vm0 }
 0x662   : > { %v2040_v57 = vmul.f32 %v2000_v59, %v4614_v37 }
 0x663   : > { %v1952_v26 = vpop.f32.mrf.mxu3 }
 0x664   : > { %v5107_v50 = vsub.f32 %v5048_v16, %v2040_v57  ;;  %v1953_v55 = vadd.f32 %v5022_v15, %v1952_v26 }
 0x666   : > { %v2072_v32 = vmul.f32 %v5107_v50, %v5107_v50  ;;  %v5113_v1 = vadd.f32 %v1953_v55, %v4949_v51 }
 0x668   : > { %v2094_v45 = vsel %vm6080_vm10, %v2072_v32, 0.0  ;;  %v2016_v19 = vsel %vm6081_vm6, %v5113_v1, 0.0  ;;  %vm6086_vm10 = vmmov %vm6071_vm0  ;;  %v2377_v32 = vld [vmem:[%s5980_s2 + $0x70] sm:$0xff] }
 0x669   : > { %v2003_v13 = vpop.xlane.xlu2 %2002  ;;  %2095 = vadd.xlane.f32.xlu1 %v2094_v45  ;;  %2017 = vadd.xlane.f32.xlu2 %v2016_v19  ;;  %vm6087_vm6 = vmmov %vm6071_vm0  ;;  %v2376_v45 = vld [vmem:[%s5980_s2 + $0x48] sm:$0xff] }
 0x66a   : > { %v2041_v6 = vmul.f32 %v2003_v13, %v4614_v37 }
 0x66b   : > { %v1955_v16 = vpop.f32.mrf.mxu3 }
 0x66c   : > { %v5120_v35 = vsub.f32 %v5054_v27, %v2041_v6  ;;  %v1956_v8 = vadd.f32 %v5022_v15, %v1955_v16 }
 0x66e   : > { %v5124_v47 = vadd.f32 %v1956_v8, %v4965_v0  ;;  %v2073_v51 = vmul.f32 %v5120_v35, %v5120_v35 }
 0x670   : > { %v2019_v46 = vsel %vm6082_vm12, %v5124_v47, 0.0  ;;  %v2097_v43 = vsel %vm6083_vm14, %v2073_v51, 0.0  ;;  %vm6088_vm12 = vmmov %vm6071_vm0 }
 0x671   : > { %2020 = vadd.xlane.f32.xlu1 %v2019_v46  ;;  %2098 = vadd.xlane.f32.xlu0 %v2097_v43  ;;  %v2006_v4 = vpop.xlane.xlu0 %2005 }
 0x672   : > { %v2042_v23 = vmul.f32 %v2006_v4, %v4614_v37 }
 0x673   : > { %v1958_v27 = vpop.f32.mrf.mxu3 }
 0x674   : > { %v5133_v36 = vsub.f32 %v5060_v28, %v2042_v23  ;;  %v1959_v0 = vadd.f32 %v5022_v15, %v1958_v27 }
 0x676   : > { %v5137_v61 = vadd.f32 %v1959_v0, %v4977_v5  ;;  %v2074_v60 = vmul.f32 %v5133_v36, %v5133_v36 }
 0x678   : > { %v2022_v48 = vsel %vm6071_vm0, %v5137_v61, 0.0  ;;  %v2100_v56 = vsel %vm6084_vm1, %v2074_v60, 0.0 }
 0x679   : > { %v2009_v14 = vpop.xlane.xlu2 %2008  ;;  %2023 = vadd.xlane.f32.xlu0 %v2022_v48  ;;  %2101 = vadd.xlane.f32.xlu2 %v2100_v56 }
 0x67a   : > { %v2043_v30 = vmul.f32 %v2009_v14, %v4614_v37 }
 0x67b   : > { %v1961_v28 = vpop.f32.mrf.mxu3 }
 0x67c   : > { %v5146_v38 = vsub.f32 %v5066_v11, %v2043_v30  ;;  %v1962_v5 = vadd.f32 %v5022_v15, %v1961_v28 }
 0x67e   : > { %v2075_v9 = vmul.f32 %v5146_v38, %v5146_v38  ;;  %v5152_v10 = vadd.f32 %v1962_v5, %v4987_v22  ;;  %v2378_v22 = vld [vmem:[%s5980_s2 + $0x98] sm:$0xff] }
 0x67f   : > { %2440 = vmatpush.msra.mxu0 %v2378_v22 }
 0x680   : > { %v2103_v54 = vsel %vm6085_vm3, %v2075_v9, 0.0  ;;  %v2025_v59 = vsel %vm6086_vm10, %v5152_v10, 0.0  ;;  %vm6089_vm10 = vmmov %vm6085_vm3 }
 0x681   : > { %2104 = vadd.xlane.f32.xlu1 %v2103_v54  ;;  %2026 = vadd.xlane.f32.xlu2 %v2025_v59 }
 0x682   : > { %2441 = vmatpush.msra.mxu0 %v2377_v32  ;;  %v5195_v32 = vld [vmem:[%s5981_s3 + $0x104] ss:$0 sm:$0xff] }
 0x683   : > { %v1964_v57 = vpop.f32.mrf.mxu3 }
 0x684   : > { %v1965_v26 = vadd.f32 %v5022_v15, %v1964_v57  ;;  %2442 = vmatpush.msra.mxu0 %v2376_v45 }
 0x686   : > { %v5159_v11 = vadd.f32 %v1965_v26, %v4995_v63  ;;  %v2375_v63 = vld [vmem:[%s5980_s2 + $0x20] sm:$0xff] }
 0x687   : > { %2443 = vmatpush.msra.mxu0 %v2375_v63 }
 0x688   : > { %v2028_v55 = vsel %vm6087_vm6, %v5159_v11, 0.0 }
 0x689   : > { %2029 = vadd.xlane.f32.xlu1 %v2028_v55 }
 0x6c4   : > { %v2087_v19 = vpop.xlane.xlu1 %2086 }
 0x6c5   : > { %v2133_v13 = vmul.f32 %v2087_v19, %v4614_v37 }
 0x6c7   : > { %v2149_v6 = vadd.f32 1e-12, %v2133_v13  ;;  %v5206_v13 = vld [vmem:[%s5981_s3 + $0x105] ss:$0 sm:$0xff] }
 0x6c9   : > { %3679 = vrsqrt.f32 %v2149_v6  ;;  %vm2171_vm0 = vweird.f32 %v2149_v6 }
 0x6cc   : > { %v2012_v16 = vpop.xlane.xlu1 %2011  ;;  %v2090_v8 = vpop.xlane.xlu0 %2089 }
 0x6cd   : > { %v2044_v51 = vmul.f32 %v2012_v16, %v4614_v37  ;;  %v2134_v46 = vmul.f32 %v2090_v8, %v4614_v37 }
 0x6cf   : > { %v3680_v43 = vpop.eup %3679  ;;  %v5179_v4 = vsub.f32 %v5085_v29, %v2044_v51  ;;  %v2150_v23 = vadd.f32 1e-12, %v2134_v46 }
 0x6d0   : > { %v2166_v27 = vmul.f32 %v3680_v43, %v2149_v6  ;;  %vm2172_vm14 = vweird.f32 %v3680_v43 }
 0x6d1   : > { %3681 = vrsqrt.f32 %v2150_v23  ;;  %v2076_v0 = vmul.f32 %v5179_v4, %v5179_v4  ;;  %vm2173_vm1 = vmor %vm2171_vm0, %vm2172_vm14 }
 0x6d2   : > { %v2167_v60 = vmul.f32 %v3680_v43, %v2166_v27  ;;  %vm6090_vm0 = vmmov %vm6085_vm3 }
 0x6d3   : > { %v2106_v48 = vsel %vm6088_vm12, %v2076_v0, 0.0  ;;  %vm2181_vm12 = vweird.f32 %v2150_v23 }
 0x6d4   : > { %v2168_v56 = vmul.f32 0.5, %v2167_v60  ;;  %2107 = vadd.xlane.f32.xlu0 %v2106_v48  ;;  %v2093_v14 = vpop.xlane.xlu2 %2092  ;;  %v2015_v30 = vpop.xlane.xlu0 %2014 }
 0x6d5   : > { %v2135_v28 = vmul.f32 %v2093_v14, %v4614_v37  ;;  %v2045_v5 = vmul.f32 %v2015_v30, %v4614_v37 }
 0x6d6   : > { %v2169_v9 = vsub.f32 1.5, %v2168_v56  ;;  %v1967_v29 = vpop.f32.mrf.mxu3 }
 0x6d7   : > { %v3682_v54 = vpop.eup %3681  ;;  %v5186_v59 = vadd.f32 1e-12, %v2135_v28  ;;  %v5189_v57 = vsub.f32 %v5098_v17, %v2045_v5  ;;  %v1968_v26 = vadd.f32 %v5022_v15, %v1967_v29 }
 0x6d8   : > { %v2170_v55 = vmul.f32 %v3680_v43, %v2169_v9  ;;  %v2176_v22 = vmul.f32 %v3682_v54, %v2150_v23  ;;  %vm2182_vm6 = vweird.f32 %v3682_v54 }
 0x6d9   : > { %3683 = vrsqrt.f32 %v5186_v59  ;;  %v5199_v45 = vadd.f32 %v1968_v26, %v5005_v18  ;;  %v2077_v17 = vmul.f32 %v5189_v57, %v5189_v57  ;;  %vm2183_vm14 = vmor %vm2181_vm12, %vm2182_vm6  ;;  %vm2191_vm6 = vweird.f32 %v5186_v59 }
 0x6da   : > { %v2174_v63 = vsel %vm2173_vm1, %v3680_v43, %v2170_v55  ;;  %v2177_v19 = vmul.f32 %v3682_v54, %v2176_v22  ;;  %vm6091_vm1 = vmmov %vm6090_vm0 }
 0x6db   : > { %v2325_v6 = vmul.f32 %v2174_v63, %v5074_v34  ;;  %v2031_v16 = vsel %vm6085_vm3, %v5199_v45, 0.0  ;;  %v2109_v8 = vsel %vm6089_vm10, %v2077_v17, 0.0  ;;  %vm6092_vm3 = vmmov %vm6090_vm0 }
 0x6dc   : > { %v2178_v51 = vmul.f32 0.5, %v2177_v19  ;;  %v2096_v18 = vpop.xlane.xlu1 %2095  ;;  %2032 = vadd.xlane.f32.xlu0 %v2031_v16  ;;  %v2018_v46 = vpop.xlane.xlu2 %2017  ;;  %2110 = vadd.xlane.f32.xlu2 %v2109_v8 }
 0x6dd   : > { %v2342_v43 = vmul.f32 %v5195_v32, %v2325_v6  ;;  %v2136_v27 = vmul.f32 %v2096_v18, %v4614_v37  ;;  %v2046_v0 = vmul.f32 %v2018_v46, %v4614_v37 }
 0x6de   : > { %v2179_v60 = vsub.f32 1.5, %v2178_v51  ;;  %v1970_v48 = vpop.f32.mrf.mxu3 }
 0x6df   : > { %v3684_v34 = vpop.eup %3683  ;;  %v2359_v56 = vadd.f32 %v5206_v13, %v2342_v43  ;;  %v2152_v14 = vadd.f32 1e-12, %v2136_v27  ;;  %v5217_v30 = vsub.f32 %v5113_v1, %v2046_v0  ;;  %v1971_v28 = vadd.f32 %v5022_v15, %v1970_v48 }
 0x6e0   : > { %v2180_v5 = vmul.f32 %v3682_v54, %v2179_v60  ;;  %v2186_v9 = vmul.f32 %v3684_v34, %v5186_v59  ;;  %vm2192_vm10 = vweird.f32 %v3684_v34 }
 0x6e1   : > { %3685 = vrsqrt.f32 %v2152_v14  ;;  %3448 = vmatmul.msk.f32.vlgmr.msra.gmra.mxu0 %vm6090_vm0, %v2359_v56  ;;  %v2078_v29 = vmul.f32 %v5217_v30, %v5217_v30  ;;  %v5225_v26 = vadd.f32 %v1971_v28, %v5013_v33  ;;  %vm2193_vm12 = vmor %vm2191_vm6, %vm2192_vm10 }
 0x6e2   : > { %v2184_v55 = vsel %vm2183_vm14, %v3682_v54, %v2180_v5  ;;  %v2187_v22 = vmul.f32 %v3684_v34, %v2186_v9  ;;  %vm6093_vm14 = vmmov %vm6090_vm0 }
 0x6e3   : > { %v2326_v1 = vmul.f32 %v2184_v55, %v5081_v20  ;;  %v2112_v15 = vsel %vm6091_vm1, %v2078_v29, 0.0  ;;  %v2034_v23 = vsel %vm6092_vm3, %v5225_v26, 0.0  ;;  %vm2201_vm3 = vweird.f32 %v2152_v14  ;;  %vm6094_vm6 = vmmov %vm6090_vm0 }
 0x6e4   : > { %v2188_v17 = vmul.f32 0.5, %v2187_v22  ;;  %v2021_v63 = vpop.xlane.xlu1 %2020  ;;  %2113 = vadd.xlane.f32.xlu1 %v2112_v15  ;;  %2035 = vadd.xlane.f32.xlu2 %v2034_v23  ;;  %v2099_v19 = vpop.xlane.xlu0 %2098 }
 0x6e5   : > { %v2047_v6 = vmul.f32 %v2021_v63, %v4614_v37  ;;  %v2137_v16 = vmul.f32 %v2099_v19, %v4614_v37  ;;  %v2343_v33 = vmul.f32 %v5195_v32, %v2326_v1 }
 0x6e6   : > { %v2189_v54 = vsub.f32 1.5, %v2188_v17 }
 0x6e7   : > { %v3686_v8 = vpop.eup %3685  ;;  %v5235_v20 = vsub.f32 %v5124_v47, %v2047_v6  ;;  %v2153_v51 = vadd.f32 1e-12, %v2137_v16  ;;  %v2360_v18 = vadd.f32 %v5206_v13, %v2343_v33 }
 0x6e8   : > { %v2190_v46 = vmul.f32 %v3684_v34, %v2189_v54  ;;  %v2196_v43 = vmul.f32 %v3686_v8, %v2152_v14  ;;  %vm2202_vm1 = vweird.f32 %v3686_v8 }
 0x6e9   : > { %3687 = vrsqrt.f32 %v2153_v51  ;;  %3449 = vmatmul.msk.f32.gmra.mxu0 %vm6093_vm14, %v2360_v18  ;;  %v2079_v27 = vmul.f32 %v5235_v20, %v5235_v20  ;;  %vm2203_vm10 = vmor %vm2201_vm3, %vm2202_vm1 }
 0x6ea   : > { %v2194_v0 = vsel %vm2193_vm12, %v3684_v34, %v2190_v46  ;;  %v2197_v60 = vmul.f32 %v3686_v8, %v2196_v43  ;;  %vm6095_vm12 = vmmov %vm6090_vm0 }
 0x6eb   : > { %v2327_v48 = vmul.f32 %v2194_v0, %v5094_v52  ;;  %v2115_v47 = vsel %vm6090_vm0, %v2079_v27, 0.0  ;;  %vm2211_vm0 = vweird.f32 %v2153_v51  ;;  %vm6096_vm3 = vmmov %vm6094_vm6 }
 0x6ec   : > { %v2198_v56 = vmul.f32 0.5, %v2197_v60  ;;  %2116 = vadd.xlane.f32.xlu0 %v2115_v47  ;;  %v2102_v28 = vpop.xlane.xlu2 %2101  ;;  %v2024_v5 = vpop.xlane.xlu0 %2023 }
 0x6ed   : > { %v2138_v59 = vmul.f32 %v2102_v28, %v4614_v37  ;;  %v2048_v9 = vmul.f32 %v2024_v5, %v4614_v37  ;;  %v2344_v29 = vmul.f32 %v5195_v32, %v2327_v48 }
 0x6ee   : > { %v2199_v55 = vsub.f32 1.5, %v2198_v56 }
 0x6ef   : > { %v3688_v22 = vpop.eup %3687  ;;  %v2154_v1 = vadd.f32 1e-12, %v2138_v59  ;;  %v5248_v34 = vsub.f32 %v5137_v61, %v2048_v9  ;;  %v2361_v52 = vadd.f32 %v5206_v13, %v2344_v29 }
 0x6f0   : > { %v2200_v15 = vmul.f32 %v3686_v8, %v2199_v55  ;;  %v2206_v23 = vmul.f32 %v3688_v22, %v2153_v51  ;;  %vm2212_vm14 = vweird.f32 %v3688_v22 }
 0x6f1   : > { %3689 = vrsqrt.f32 %v2154_v1  ;;  %3450 = vmatmul.msk.f32.gmra.mxu0 %vm6094_vm6, %v2361_v52  ;;  %v2080_v17 = vmul.f32 %v5248_v34, %v5248_v34  ;;  %vm2213_vm1 = vmor %vm2211_vm0, %vm2212_vm14 }
 0x6f2   : > { %v2204_v63 = vsel %vm2203_vm10, %v3686_v8, %v2200_v15  ;;  %v2207_v19 = vmul.f32 %v3688_v22, %v2206_v23  ;;  %vm6097_vm10 = vmmov %vm6096_vm3 }
 0x6f3   : > { %v2328_v6 = vmul.f32 %v2204_v63, %v5107_v50  ;;  %v2118_v16 = vsel %vm6095_vm12, %v2080_v17, 0.0  ;;  %vm2221_vm12 = vweird.f32 %v2154_v1  ;;  %vm6098_vm0 = vmmov %vm6096_vm3 }
 0x6f4   : > { %v2208_v61 = vmul.f32 0.5, %v2207_v19  ;;  %v2105_v33 = vpop.xlane.xlu1 %2104  ;;  %v2027_v54 = vpop.xlane.xlu2 %2026  ;;  %2119 = vadd.xlane.f32.xlu1 %v2118_v16 }
 0x6f5   : > { %v2139_v14 = vmul.f32 %v2105_v33, %v4614_v37  ;;  %v2049_v18 = vmul.f32 %v2027_v54, %v4614_v37  ;;  %v2345_v46 = vmul.f32 %v5195_v32, %v2328_v6 }
 0x6f6   : > { %v2209_v43 = vsub.f32 1.5, %v2208_v61 }
 0x6f7   : > { %v3690_v27 = vpop.eup %3689  ;;  %v2155_v0 = vadd.f32 1e-12, %v2139_v14  ;;  %v5260_v8 = vsub.f32 %v5152_v10, %v2049_v18  ;;  %v2362_v50 = vadd.f32 %v5206_v13, %v2345_v46 }
 0x6f8   : > { %v2210_v60 = vmul.f32 %v3688_v22, %v2209_v43  ;;  %v2216_v48 = vmul.f32 %v3690_v27, %v2154_v1  ;;  %vm2222_vm6 = vweird.f32 %v3690_v27 }
 0x6f9   : > { %3691 = vrsqrt.f32 %v2155_v0  ;;  %3451 = vmatmul.msk.f32.gmra.mxu0 %vm6096_vm3, %v2362_v50  ;;  %v2081_v47 = vmul.f32 %v5260_v8, %v5260_v8  ;;  %vm2223_vm14 = vmor %vm2221_vm12, %vm2222_vm6 }
 0x6fa   : > { %v2214_v56 = vsel %vm2213_vm1, %v3688_v22, %v2210_v60  ;;  %v2217_v28 = vmul.f32 %v3690_v27, %v2216_v48  ;;  %vm6099_vm1 = vmmov %vm6098_vm0 }
 0x6fb   : > { %v2329_v5 = vmul.f32 %v2214_v56, %v5120_v35  ;;  %v2121_v59 = vsel %vm6097_vm10, %v2081_v47, 0.0  ;;  %vm2231_vm10 = vweird.f32 %v2155_v0  ;;  %vm6100_vm12 = vmmov %vm6098_vm0 }
 0x6fc   : > { %v2218_v10 = vmul.f32 0.5, %v2217_v28  ;;  %v2030_v9 = vpop.xlane.xlu1 %2029  ;;  %2122 = vadd.xlane.f32.xlu2 %v2121_v59 }
 0x6fd   : > { %v2050_v29 = vmul.f32 %v2030_v9, %v4614_v37  ;;  %v2346_v51 = vmul.f32 %v5195_v32, %v2329_v5 }
 0x6fe   : > { %v2219_v55 = vsub.f32 1.5, %v2218_v10 }
 0x6ff   : > { %v3692_v52 = vpop.eup %3691  ;;  %v5271_v15 = vsub.f32 %v5159_v11, %v2050_v29  ;;  %v2363_v22 = vadd.f32 %v5206_v13, %v2346_v51 }
 0x700   : > { %v2220_v23 = vmul.f32 %v3690_v27, %v2219_v55  ;;  %v2226_v35 = vmul.f32 %v3692_v52, %v2155_v0  ;;  %vm2232_vm3 = vweird.f32 %v3692_v52 }
 0x701   : > { %3452 = vmatmul.msk.f32.gmra.mxu0 %vm6098_vm0, %v2363_v22  ;;  %v2082_v17 = vmul.f32 %v5271_v15, %v5271_v15  ;;  %vm2233_vm6 = vmor %vm2231_vm10, %vm2232_vm3 }
 0x702   : > { %v2224_v63 = vsel %vm2223_vm14, %v3690_v27, %v2220_v23  ;;  %v2227_v19 = vmul.f32 %v3692_v52, %v2226_v35  ;;  %vm6101_vm14 = vmmov %vm6098_vm0 }
 0x703   : > { %v2330_v6 = vmul.f32 %v2224_v63, %v5133_v36  ;;  %v2124_v16 = vsel %vm6099_vm1, %v2082_v17, 0.0 }
 0x704   : > { %v2228_v61 = vmul.f32 0.5, %v2227_v19  ;;  %2125 = vadd.xlane.f32.xlu0 %v2124_v16 }
 0x705   : > { %v2347_v11 = vmul.f32 %v5195_v32, %v2330_v6 }
 0x706   : > { %v2229_v33 = vsub.f32 1.5, %v2228_v61 }
 0x707   : > { %v2364_v1 = vadd.f32 %v5206_v13, %v2347_v11 }
 0x708   : > { %v2230_v54 = vmul.f32 %v3692_v52, %v2229_v33 }
 0x709   : > { %3453 = vmatmul.msk.f32.gmra.mxu0 %vm6100_vm12, %v2364_v1 }
 0x70a   : > { %v2234_v14 = vsel %vm2233_vm6, %v3692_v52, %v2230_v54  ;;  %vm6102_vm6 = vmmov %vm6098_vm0 }
 0x70b   : > { %v2331_v18 = vmul.f32 %v2234_v14, %v5146_v38 }
 0x70d   : > { %v2348_v36 = vmul.f32 %v5195_v32, %v2331_v18 }
 0x70f   : > { %v2365_v46 = vadd.f32 %v5206_v13, %v2348_v36 }
 0x711   : > { %3454 = vmatmul.msk.f32.gmra.mxu0 %vm6101_vm14, %v2365_v46 }
 0x747   : > { %v2108_v43 = vpop.xlane.xlu0 %2107 }
 0x748   : > { %v2140_v27 = vmul.f32 %v2108_v43, %v4614_v37 }
 0x74a   : > { %v2156_v50 = vadd.f32 1e-12, %v2140_v27 }
 0x74c   : > { %3693 = vrsqrt.f32 %v2156_v50  ;;  %vm2241_vm3 = vweird.f32 %v2156_v50 }
 0x74f   : > { %v2111_v60 = vpop.xlane.xlu2 %2110  ;;  %v2033_v48 = vpop.xlane.xlu0 %2032 }
 0x750   : > { %v2141_v0 = vmul.f32 %v2111_v60, %v4614_v37  ;;  %v2051_v47 = vmul.f32 %v2033_v48, %v4614_v37 }
 0x752   : > { %v3694_v56 = vpop.eup %3693  ;;  %v2157_v28 = vadd.f32 1e-12, %v2141_v0  ;;  %v5290_v38 = vsub.f32 %v5199_v45, %v2051_v47 }
 0x753   : > { %v2236_v5 = vmul.f32 %v3694_v56, %v2156_v50  ;;  %vm2242_vm1 = vweird.f32 %v3694_v56 }
 0x754   : > { %3695 = vrsqrt.f32 %v2157_v28  ;;  %v2083_v59 = vmul.f32 %v5290_v38, %v5290_v38  ;;  %vm2243_vm10 = vmor %vm2241_vm3, %vm2242_vm1  ;;  %vm2251_vm14 = vweird.f32 %v2157_v28 }
 0x755   : > { %v2237_v10 = vmul.f32 %v3694_v56, %v2236_v5  ;;  %vm6103_vm1 = vmmov %vm6102_vm6 }
 0x756   : > { %v2127_v9 = vsel %vm6098_vm0, %v2083_v59, 0.0 }
 0x757   : > { %v2238_v29 = vmul.f32 0.5, %v2237_v10  ;;  %v2114_v51 = vpop.xlane.xlu1 %2113  ;;  %v2036_v55 = vpop.xlane.xlu2 %2035  ;;  %2128 = vadd.xlane.f32.xlu1 %v2127_v9 }
 0x758   : > { %v2142_v52 = vmul.f32 %v2114_v51, %v4614_v37  ;;  %v2052_v22 = vmul.f32 %v2036_v55, %v4614_v37 }
 0x759   : > { %v2239_v23 = vsub.f32 1.5, %v2238_v29 }
 0x75a   : > { %v3696_v45 = vpop.eup %3695  ;;  %v2158_v35 = vadd.f32 1e-12, %v2142_v52  ;;  %v5298_v17 = vsub.f32 %v5225_v26, %v2052_v22 }
 0x75b   : > { %v2240_v63 = vmul.f32 %v3694_v56, %v2239_v23  ;;  %v2246_v19 = vmul.f32 %v3696_v45, %v2157_v28  ;;  %vm2252_vm12 = vweird.f32 %v3696_v45 }
 0x75c   : > { %3697 = vrsqrt.f32 %v2158_v35  ;;  %v2084_v6 = vmul.f32 %v5298_v17, %v5298_v17  ;;  %vm2253_vm0 = vmor %vm2251_vm14, %vm2252_vm12 }
 0x75d   : > { %v2244_v16 = vsel %vm2243_vm10, %v3694_v56, %v2240_v63  ;;  %v2247_v61 = vmul.f32 %v3696_v45, %v2246_v19  ;;  %vm2261_vm10 = vweird.f32 %v2158_v35  ;;  %vm6104_vm12 = vmmov %vm6103_vm1 }
 0x75e   : > { %v2332_v11 = vmul.f32 %v2244_v16, %v5179_v4  ;;  %v5303_v33 = vpop.f32.mrf.mxu0  ;;  %v2130_v1 = vsel %vm6102_vm6, %v2084_v6, 0.0 }
 0x75f   : > { %v2248_v54 = vmul.f32 0.5, %v2247_v61  ;;  %2131 = vadd.xlane.f32.xlu2 %v2130_v1  ;;  %v2117_v26 = vpop.xlane.xlu0 %2116 }
 0x760   : > { %v2143_v14 = vmul.f32 %v2117_v26, %v4614_v37  ;;  %v2349_v18 = vmul.f32 %v5195_v32, %v2332_v11 }
 0x761   : > { %v2249_v36 = vsub.f32 1.5, %v2248_v54 }
 0x762   : > { %v3698_v46 = vpop.eup %3697  ;;  %v2159_v43 = vadd.f32 1e-12, %v2143_v14  ;;  %v2366_v27 = vadd.f32 %v5206_v13, %v2349_v18 }
 0x763   : > { %v2250_v50 = vmul.f32 %v3696_v45, %v2249_v36  ;;  %v2256_v4 = vmul.f32 %v3698_v46, %v2158_v35  ;;  %vm2262_vm3 = vweird.f32 %v3698_v46 }
 0x764   : > { %3699 = vrsqrt.f32 %v2159_v43  ;;  %3455 = vmatmul.msk.f32.gmra.mxu0 %vm6103_vm1, %v2366_v27  ;;  %vm2263_vm6 = vmor %vm2261_vm10, %vm2262_vm3 }
 0x765   : > { %v2254_v60 = vsel %vm2253_vm0, %v3696_v45, %v2250_v50  ;;  %v2257_v48 = vmul.f32 %v3698_v46, %v2256_v4  ;;  %vm2271_vm0 = vweird.f32 %v2159_v43  ;;  %vm6105_vm3 = vmmov %vm6104_vm12 }
 0x766   : > { %v2333_v0 = vmul.f32 %v2254_v60, %v5189_v57  ;;  %v5311_v47 = vpop.f32.mrf.mxu0 }
 0x767   : > { %v2258_v56 = vmul.f32 0.5, %v2257_v48  ;;  %v2120_v5 = vpop.xlane.xlu1 %2119  ;;  %v5332_v48 = vld [vmem:[%s5980_s2 + $0xc0] ss:$0 sm:$0xff] }
 0x768   : > { %v2144_v59 = vmul.f32 %v2120_v5, %v4614_v37  ;;  %v2350_v10 = vmul.f32 %v5195_v32, %v2333_v0 }
 0x769   : > { %v2259_v9 = vsub.f32 1.5, %v2258_v56 }
 0x76a   : > { %v3700_v28 = vpop.eup %3699  ;;  %v2160_v29 = vadd.f32 1e-12, %v2144_v59  ;;  %v2367_v51 = vadd.f32 %v5206_v13, %v2350_v10  ;;  %v5338_v59 = vadd.f32 %v5303_v33, %v5332_v48 }
 0x76b   : > { %v2260_v55 = vmul.f32 %v3698_v46, %v2259_v9  ;;  %v2266_v52 = vmul.f32 %v3700_v28, %v2159_v43  ;;  %vm2272_vm14 = vweird.f32 %v3700_v28 }
 0x76c   : > { %3701 = vrsqrt.f32 %v2160_v29  ;;  %3456 = vmatmul.msk.f32.gmra.mxu0 %vm6104_vm12, %v2367_v51  ;;  %vm2273_vm1 = vmor %vm2271_vm0, %vm2272_vm14  ;;  %vm5991_vm0 = vcmask 31744  }
 0x76d   : > { %v2264_v57 = vsel %vm2263_vm6, %v3698_v46, %v2260_v55  ;;  %v2267_v22 = vmul.f32 %v3700_v28, %v2266_v52  ;;  %vm2281_vm6 = vweird.f32 %v2160_v29  ;;  %vm6106_vm14 = vmmov %vm6105_vm3 }
 0x76e   : > { %v2334_v23 = vmul.f32 %v2264_v57, %v5217_v30  ;;  %v5318_v45 = vpop.f32.mrf.mxu0  ;;  %v5347_v57 = vsel %vm5991_vm0, %v5338_v59, -inf }
 0x76f   : > { %v2268_v63 = vmul.f32 0.5, %v2267_v22  ;;  %v2123_v19 = vpop.xlane.xlu2 %2122 }
 0x770   : > { %v2145_v6 = vmul.f32 %v2123_v19, %v4614_v37  ;;  %v2351_v16 = vmul.f32 %v5195_v32, %v2334_v23 }
 0x771   : > { %v2269_v61 = vsub.f32 1.5, %v2268_v63 }
 0x772   : > { %v3702_v35 = vpop.eup %3701  ;;  %v2161_v11 = vadd.f32 1e-12, %v2145_v6  ;;  %v2368_v1 = vadd.f32 %v5206_v13, %v2351_v16  ;;  %v5359_v16 = vadd.f32 %v5311_v47, %v5332_v48 }
 0x773   : > { %v2270_v54 = vmul.f32 %v3700_v28, %v2269_v61  ;;  %v2276_v26 = vmul.f32 %v3702_v35, %v2160_v29  ;;  %vm2282_vm10 = vweird.f32 %v3702_v35 }
 0x774   : > { %3703 = vrsqrt.f32 %v2161_v11  ;;  %3457 = vmatmul.msk.f32.gmra.mxu0 %vm6105_vm3, %v2368_v1  ;;  %vm2283_vm12 = vmor %vm2281_vm6, %vm2282_vm10  ;;  %vm2291_vm3 = vweird.f32 %v2161_v11 }
 0x775   : > { %v2274_v30 = vsel %vm2273_vm1, %v3700_v28, %v2270_v54  ;;  %v2277_v14 = vmul.f32 %v3702_v35, %v2276_v26  ;;  %vm6107_vm6 = vmmov %vm6106_vm14 }
 0x776   : > { %v2335_v18 = vmul.f32 %v2274_v30, %v5235_v20  ;;  %v5325_v36 = vpop.f32.mrf.mxu0 }
 0x777   : > { %v2278_v46 = vmul.f32 0.5, %v2277_v14  ;;  %v2126_v27 = vpop.xlane.xlu0 %2125 }
 0x778   : > { %v2146_v50 = vmul.f32 %v2126_v27, %v4614_v37  ;;  %v2352_v4 = vmul.f32 %v5195_v32, %v2335_v18 }
 0x779   : > { %v2279_v60 = vsub.f32 1.5, %v2278_v46 }
 0x77a   : > { %v3704_v43 = vpop.eup %3703  ;;  %v2162_v0 = vadd.f32 1e-12, %v2146_v50  ;;  %v2369_v56 = vadd.f32 %v5206_v13, %v2352_v4  ;;  %v5380_v50 = vadd.f32 %v5318_v45, %v5332_v48 }
 0x77b   : > { %v2280_v20 = vmul.f32 %v3702_v35, %v2279_v60  ;;  %v2286_v5 = vmul.f32 %v3704_v43, %v2161_v11  ;;  %vm2292_vm1 = vweird.f32 %v3704_v43  ;;  %v5368_v11 = vsel %vm5991_vm0, %v5359_v16, -inf }
 0x77c   : > { %3705 = vrsqrt.f32 %v2162_v0  ;;  %3458 = vmatmul.msk.f32.gmra.mxu0 %vm6106_vm14, %v2369_v56  ;;  %vm2293_vm10 = vmor %vm2291_vm3, %vm2292_vm1  ;;  %vm2301_vm14 = vweird.f32 %v2162_v0 }
 0x77d   : > { %v2284_v10 = vsel %vm2283_vm12, %v3702_v35, %v2280_v20  ;;  %v2287_v9 = vmul.f32 %v3704_v43, %v2286_v5  ;;  %vm6108_vm3 = vmmov %vm6107_vm6  ;;  %v5389_v5 = vsel %vm5991_vm0, %v5380_v50, -inf }
 0x77e   : > { %v2336_v28 = vmul.f32 %v2284_v10, %v5248_v34  ;;  %v2457_v51 = vpop.f32.mrf.mxu0 }
 0x77f   : > { %v2288_v55 = vmul.f32 0.5, %v2287_v9  ;;  %v5342_v52 = vadd.f32 %v2457_v51, %v5332_v48 }
 0x780   : > { %v2353_v29 = vmul.f32 %v5195_v32, %v2336_v28 }
 0x781   : > { %v2289_v22 = vsub.f32 1.5, %v2288_v55  ;;  %v5351_v33 = vsel %vm5991_vm0, %v5342_v52, -inf }
 0x782   : > { %v3706_v23 = vpop.eup %3705  ;;  %v2499_v34 = vmax.f32 %v5347_v57, %v5351_v33  ;;  %v2370_v63 = vadd.f32 %v5206_v13, %v2353_v29 }
 0x783   : > { %v2290_v19 = vmul.f32 %v3704_v43, %v2289_v22  ;;  %v2296_v6 = vmul.f32 %v3706_v23, %v2162_v0  ;;  %vm2302_vm12 = vweird.f32 %v3706_v23 }
 0x784   : > { %3459 = vmatmul.msk.f32.gmra.mxu0 %vm6107_vm6, %v2370_v63  ;;  %vm2303_vm1 = vmor %vm2301_vm14, %vm2302_vm12 }
 0x785   : > { %v2294_v61 = vsel %vm2293_vm10, %v3704_v43, %v2290_v19  ;;  %v2297_v35 = vmul.f32 %v3706_v23, %v2296_v6  ;;  %vm6109_vm10 = vmmov %vm6108_vm3 }
 0x786   : > { %v2337_v1 = vmul.f32 %v2294_v61, %v5260_v8  ;;  %v2460_v54 = vpop.f32.mrf.mxu0 }
 0x787   : > { %v2298_v26 = vmul.f32 0.5, %v2297_v35  ;;  %v5363_v30 = vadd.f32 %v2460_v54, %v5332_v48 }
 0x788   : > { %v2354_v14 = vmul.f32 %v5195_v32, %v2337_v1 }
 0x789   : > { %v2299_v18 = vsub.f32 1.5, %v2298_v26  ;;  %v5372_v47 = vsel %vm5991_vm0, %v5363_v30, -inf }
 0x78a   : > { %v2501_v8 = vmax.f32 %v5368_v11, %v5372_v47  ;;  %v2371_v46 = vadd.f32 %v5206_v13, %v2354_v14 }
 0x78b   : > { %v2300_v27 = vmul.f32 %v3706_v23, %v2299_v18 }
 0x78c   : > { %3460 = vmatmul.msk.f32.gmra.mxu0 %vm6108_vm3, %v2371_v46 }
 0x78d   : > { %v2304_v4 = vsel %vm2303_vm1, %v3706_v23, %v2300_v27 }
 0x78e   : > { %v2338_v60 = vmul.f32 %v2304_v4, %v5271_v15  ;;  %v2463_v43 = vpop.f32.mrf.mxu0 }
 0x78f   : > { %v5384_v56 = vadd.f32 %v2463_v43, %v5332_v48 }
 0x790   : > { %v2355_v20 = vmul.f32 %v5195_v32, %v2338_v60 }
 0x791   : > { %v5393_v0 = vsel %vm5991_vm0, %v5384_v56, -inf  ;;  %vm6110_vm0 = vcmask 261120  }
 0x792   : > { %v2503_v45 = vmax.f32 %v5389_v5, %v5393_v0  ;;  %v2372_v10 = vadd.f32 %v5206_v13, %v2355_v20 }
 0x794   : > { %3461 = vmatmul.msk.f32.gmra.mxu0 %vm6109_vm10, %v2372_v10 }
 0x7ca   : > { %v2129_v15 = vpop.xlane.xlu1 %2128 }
 0x7cb   : > { %v2147_v9 = vmul.f32 %v2129_v15, %v4614_v37 }
 0x7cd   : > { %v2163_v28 = vadd.f32 1e-12, %v2147_v9 }
 0x7cf   : > { %3707 = vrsqrt.f32 %v2163_v28  ;;  %vm2311_vm12 = vweird.f32 %v2163_v28 }
 0x7d2   : > { %v2132_v51 = vpop.xlane.xlu2 %2131 }
 0x7d3   : > { %v2148_v55 = vmul.f32 %v2132_v51, %v4614_v37 }
 0x7d5   : > { %v3708_v29 = vpop.eup %3707  ;;  %v2164_v22 = vadd.f32 1e-12, %v2148_v55 }
 0x7d6   : > { %v2306_v23 = vmul.f32 %v3708_v29, %v2163_v28  ;;  %vm2312_vm6 = vweird.f32 %v3708_v29 }
 0x7d7   : > { %3709 = vrsqrt.f32 %v2164_v22  ;;  %vm2313_vm14 = vmor %vm2311_vm12, %vm2312_vm6  ;;  %vm2321_vm3 = vweird.f32 %v2164_v22 }
 0x7d8   : > { %v2307_v63 = vmul.f32 %v3708_v29, %v2306_v23  ;;  %vm6111_vm6 = vmmov %vm6110_vm0 }
 0x7da   : > { %v2308_v19 = vmul.f32 0.5, %v2307_v63 }
 0x7dc   : > { %v2309_v6 = vsub.f32 1.5, %v2308_v19 }
 0x7dd   : > { %v3710_v61 = vpop.eup %3709 }
 0x7de   : > { %v2310_v35 = vmul.f32 %v3708_v29, %v2309_v6  ;;  %v2316_v1 = vmul.f32 %v3710_v61, %v2164_v22  ;;  %vm2322_vm1 = vweird.f32 %v3710_v61 }
 0x7df   : > { %vm2323_vm10 = vmor %vm2321_vm3, %vm2322_vm1 }
 0x7e0   : > { %v2314_v54 = vsel %vm2313_vm14, %v3708_v29, %v2310_v35  ;;  %v2317_v26 = vmul.f32 %v3710_v61, %v2316_v1 }
 0x7e1   : > { %v2339_v14 = vmul.f32 %v2314_v54, %v5290_v38  ;;  %v2466_v18 = vpop.f32.mrf.mxu0 }
 0x7e2   : > { %v2318_v46 = vmul.f32 0.5, %v2317_v26 }
 0x7e3   : > { %v2356_v37 = vmul.f32 %v5195_v32, %v2339_v14 }
 0x7e4   : > { %v2319_v27 = vsub.f32 1.5, %v2318_v46  ;;  %v5430_v46 = vadd.f32 %v2466_v18, %v5332_v48 }
 0x7e5   : > { %v2373_v4 = vadd.f32 %v5206_v13, %v2356_v37  ;;  %v5434_v37 = vadd.f32 %v5325_v36, %v5332_v48 }
 0x7e6   : > { %v2320_v60 = vmul.f32 %v3710_v61, %v2319_v27 }
 0x7e7   : > { %3462 = vmatmul.msk.f32.gmra.mxu0 %vm6110_vm0, %v2373_v4  ;;  %vm6112_vm0 = vcmask 31744  }
 0x7e8   : > { %v2324_v43 = vsel %vm2323_vm10, %v3710_v61, %v2320_v60  ;;  %vm6113_vm12 = vmmov %vm6112_vm0 }
 0x7e9   : > { %v2340_v20 = vmul.f32 %v2324_v43, %v5298_v17  ;;  %v2469_v10 = vpop.f32.mrf.mxu0  ;;  %vm6114_vm14 = vmmov %vm6112_vm0 }
 0x7ea   : > { %v5410_v29 = vadd.f32 %v2469_v10, %v5332_v48  ;;  %vm6115_vm1 = vmmov %vm6112_vm0 }
 0x7eb   : > { %v2357_v15 = vmul.f32 %v5195_v32, %v2340_v20  ;;  %vm6116_vm3 = vmmov %vm6112_vm0 }
 0x7ec   : > { %v2506_v17 = vsel %vm6112_vm0, %v5410_v29, -inf  ;;  %vm6117_vm10 = vmmov %vm6112_vm0 }
 0x7ed   : > { %v2374_v38 = vadd.f32 %v5206_v13, %v2357_v15  ;;  %v2507_v6 = vmax.f32 %v2499_v34, %v2506_v17  ;;  %v2504_v34 = vsel %vm6116_vm3, %v5430_v46, -inf  ;;  %v2497_v47 = vsel %vm6117_vm10, %v5434_v37, -inf }
 0x7ee   : > { %v2505_v27 = vmax.f32 %v2497_v47, %v2504_v34 }
 0x7ef   : > { %3463 = vmatmul.msk.f32.gmra.mxu0 %vm6111_vm6, %v2374_v38  ;;  %vm6118_vm6 = vmmov %vm6112_vm0 }
 0x7f1   : > { %v2472_v9 = vpop.f32.mrf.mxu0 }
 0x7f2   : > { %v5413_v22 = vadd.f32 %v2472_v9, %v5332_v48 }
 0x7f4   : > { %v2508_v32 = vsel %vm6113_vm12, %v5413_v22, -inf  ;;  %vm6119_vm12 = vmmov %vm6112_vm0 }
 0x7f5   : > { %v2509_v61 = vmax.f32 %v2501_v8, %v2508_v32 }
 0x7f9   : > { %v2475_v28 = vpop.f32.mrf.mxu0 }
 0x7fa   : > { %v2476_v57 = vadd.f32 %v2475_v28, %v5332_v48 }
 0x7fc   : > { %v2510_v8 = vsel %vm6118_vm6, %v2476_v57, -inf }
 0x7fd   : > { %v2511_v43 = vmax.f32 %v2503_v45, %v2510_v8 }
 0x801   : > { %v2478_v51 = vpop.f32.mrf.mxu0 }
 0x802   : > { %v2479_v33 = vadd.f32 %v2478_v51, %v5332_v48 }
 0x804   : > { %v2512_v18 = vsel %vm6112_vm0, %v2479_v33, -inf }
 0x805   : > { %v2513_v20 = vmax.f32 %v2505_v27, %v2512_v18 }
 0x809   : > { %v2481_v55 = vpop.f32.mrf.mxu0 }
 0x80a   : > { %v2482_v23 = vadd.f32 %v2481_v55, %v5332_v48 }
 0x80c   : > { %v2514_v63 = vsel %vm6114_vm14, %v2482_v23, -inf  ;;  %vm6120_vm14 = vmmov %vm6112_vm0 }
 0x80d   : > { %v2515_v1 = vmax.f32 %v2507_v6, %v2514_v63 }
 0x811   : > { %v2484_v13 = vpop.f32.mrf.mxu0 }
 0x812   : > { %v2485_v19 = vadd.f32 %v2484_v13, %v5332_v48 }
 0x814   : > { %v2516_v35 = vsel %vm6115_vm1, %v2485_v19, -inf }
 0x815   : > { %v2517_v54 = vmax.f32 %v2509_v61, %v2516_v35 }
 0x817   : > { %v2522_v26 = vmax.f32 %v2515_v1, %v2517_v54 }
 0x864   : > { %v2487_v14 = vpop.f32.mrf.mxu0 }
 0x865   : > { %v2488_v11 = vadd.f32 %v2487_v14, %v5332_v48 }
 0x867   : > { %v2518_v36 = vsel %vm6119_vm12, %v2488_v11, -inf }
 0x868   : > { %v2519_v15 = vmax.f32 %v2511_v43, %v2518_v36 }
 0x86c   : > { %v2490_v4 = vpop.f32.mrf.mxu0 }
 0x86d   : > { %v2491_v60 = vadd.f32 %v2490_v4, %v5332_v48 }
 0x86f   : > { %v2520_v10 = vsel %vm6120_vm14, %v2491_v60, -inf }
 0x870   : > { %v2521_v38 = vmax.f32 %v2513_v20, %v2520_v10 }
 0x872   : > { %v2523_v9 = vmax.f32 %v2519_v15, %v2521_v38 }
 0x874   : > { %v2524_v28 = vmax.f32 %v2522_v26, %v2523_v9 }
 0x876   : > { %v2525_v51 = vrot.slane %v2524_v28, 4 }
 0x878   : > { %v2526_v55 = vmax.f32 %v2524_v28, %v2525_v51 }
 0x87a   : > { %v2527_v17 = vrot.slane %v2526_v55, 2 }
 0x87c   : > { %v2528_v32 = vmax.f32 %v2526_v55, %v2527_v17 }
 0x87e   : > { %v2529_v13 = vrot.slane %v2528_v32, 1 }
 0x880   : > { %v5451_v63 = vmax.f32 %v2528_v32, %v2529_v13 }
 0x882   : > { %v2546_v48 = vsub.f32 %v2491_v60, %v5451_v63  ;;  %v2545_v6 = vsub.f32 %v2488_v11, %v5451_v63  ;;  %v2544_v5 = vsub.f32 %v2485_v19, %v5451_v63  ;;  %v2543_v0 = vsub.f32 %v2482_v23, %v5451_v63 }
 0x883   : > { %v2537_v35 = vsub.f32 %v5384_v56, %v5451_v63  ;;  %v2542_v54 = vsub.f32 %v2479_v33, %v5451_v63  ;;  %v2541_v14 = vsub.f32 %v2476_v57, %v5451_v63  ;;  %v2536_v34 = vsub.f32 %v5363_v30, %v5451_v63 }
 0x884   : > { %v2577_v45 = vmul.f32 1.442695, %v2546_v48  ;;  %v2575_v61 = vmul.f32 1.442695, %v2545_v6  ;;  %v2573_v1 = vmul.f32 1.442695, %v2544_v5  ;;  %v2535_v19 = vsub.f32 %v5342_v52, %v5451_v63 }
 0x885   : > { %v2571_v26 = vmul.f32 1.442695, %v2543_v0  ;;  %v2534_v23 = vsub.f32 %v5434_v37, %v5451_v63  ;;  %v2533_v56 = vsub.f32 %v5380_v50, %v5451_v63  ;;  %v2532_v11 = vsub.f32 %v5359_v16, %v5451_v63 }
 0x886   : > { %3711 = vpow2.f32 %v2577_v45  ;;  %v2531_v33 = vsub.f32 %v5338_v59, %v5451_v63  ;;  %v2569_v57 = vmul.f32 1.442695, %v2542_v54  ;;  %v2540_v30 = vsub.f32 %v5413_v22, %v5451_v63 }
 0x887   : > { %3713 = vpow2.f32 %v2575_v61  ;;  %v2567_v52 = vmul.f32 1.442695, %v2541_v14  ;;  %v2539_v37 = vsub.f32 %v5410_v29, %v5451_v63  ;;  %v2538_v59 = vsub.f32 %v5430_v46, %v5451_v63 }
 0x888   : > { %3715 = vpow2.f32 %v2573_v1  ;;  %v2565_v16 = vmul.f32 1.442695, %v2540_v30  ;;  %v2559_v4 = vmul.f32 1.442695, %v2537_v35  ;;  %v2557_v36 = vmul.f32 1.442695, %v2536_v34 }
 0x889   : > { %3717 = vpow2.f32 %v2571_v26  ;;  %v2563_v22 = vmul.f32 1.442695, %v2539_v37  ;;  %v2561_v29 = vmul.f32 1.442695, %v2538_v59  ;;  %v2555_v43 = vmul.f32 1.442695, %v2535_v19 }
 0x88a   : > { %3719 = vpow2.f32 %v2569_v57  ;;  %v2553_v10 = vmul.f32 1.442695, %v2534_v23  ;;  %v2551_v38 = vmul.f32 1.442695, %v2533_v56  ;;  %v2549_v28 = vmul.f32 1.442695, %v2532_v11 }
 0x88b   : > { %3721 = vpow2.f32 %v2567_v52  ;;  %v2547_v55 = vmul.f32 1.442695, %v2531_v33  ;;  %v3858_v6 = vmov 1.0  }
 0x88c   : > { %v5475_v47 = vpop.eup %3711  ;;  %3723 = vpow2.f32 %v2565_v16 }
 0x88d   : > { %2579 = vmatpush.msra.mxu1 %v5475_v47  ;;  %v5480_v50 = vpop.eup %3713  ;;  %3725 = vpow2.f32 %v2563_v22 }
 0x88e   : > { %v5485_v8 = vpop.eup %3715  ;;  %3727 = vpow2.f32 %v2561_v29 }
 0x88f   : > { %2580 = vmatpush.msra.mxu1 %v5480_v50  ;;  %v5488_v18 = vpop.eup %3717  ;;  %3729 = vpow2.f32 %v2559_v4 }
 0x890   : > { %v5491_v27 = vpop.eup %3719  ;;  %3731 = vpow2.f32 %v2557_v36 }
 0x891   : > { %2581 = vmatpush.msra.mxu1 %v5485_v8  ;;  %v5494_v46 = vpop.eup %3721  ;;  %3733 = vpow2.f32 %v2555_v43 }
 0x892   : > { %v5497_v60 = vpop.eup %3723  ;;  %3735 = vpow2.f32 %v2553_v10 }
 0x893   : > { %2582 = vmatpush.msra.mxu1 %v5488_v18  ;;  %v5500_v20 = vpop.eup %3725  ;;  %3737 = vpow2.f32 %v2551_v38 }
 0x894   : > { %v5503_v15 = vpop.eup %3727  ;;  %3739 = vpow2.f32 %v2549_v28 }
 0x895   : > { %2583 = vmatpush.msra.mxu1 %v5491_v27  ;;  %v5506_v9 = vpop.eup %3729  ;;  %3741 = vpow2.f32 %v2547_v55 }
 0x896   : > { %v5509_v51 = vpop.eup %3731 }
 0x897   : > { %2584 = vmatpush.msra.mxu1 %v5494_v46  ;;  %v5512_v17 = vpop.eup %3733 }
 0x898   : > { %v5515_v32 = vpop.eup %3735 }
 0x899   : > { %2585 = vmatpush.msra.mxu1 %v5497_v60  ;;  %v5518_v13 = vpop.eup %3737 }
 0x89a   : > { %v5521_v63 = vpop.eup %3739 }
 0x89b   : > { %2586 = vmatpush.msra.mxu1 %v5500_v20  ;;  %v3742_v48 = vpop.eup %3741 }
 0x89d   : > { %2587 = vmatpush.msra.mxu1 %v5503_v15 }
 0x89f   : > { %2588 = vmatpush.msra.mxu1 %v5506_v9 }
 0x8a1   : > { %2589 = vmatpush.msra.mxu1 %v5509_v51 }
 0x8a3   : > { %2590 = vmatpush.msra.mxu1 %v5512_v17 }
 0x8a5   : > { %2591 = vmatpush.msra.mxu1 %v5515_v32 }
 0x8a7   : > { %2592 = vmatpush.msra.mxu1 %v5518_v13 }
 0x8a9   : > { %2593 = vmatpush.msra.mxu1 %v5521_v63 }
 0x8ab   : > { %2594 = vmatpush.msra.mxu1 %v3742_v48 }
 0x8ac   : > { %3464 = vmatmul.msk.f32.vlgmr.msra.gmra.mxu1 %vm4181_vm2, %v3858_v6  ;;  %vm6121_vm2 = vnez %v6015_v53 }
 0x8b4   : > { %3465 = vmatmul.msk.f32.gmra.mxu1 %vm4198_vm5, %v3858_v6  ;;  %vm6122_vm5 = vnez %v6017_v41 }
 0x8bc   : > { %3466 = vmatmul.msk.f32.gmra.mxu1 %vm4214_vm7, %v3858_v6  ;;  %vm6123_vm7 = vnez %v6019_v12 }
 0x8c4   : > { %3467 = vmatmul.msk.f32.gmra.mxu1 %vm4230_vm9, %v3858_v6  ;;  %vm6124_vm9 = vnez %v6021_v24 }
 0x8cc   : > { %3468 = vmatmul.msk.f32.gmra.mxu1 %vm4244_vm11, %v3858_v6  ;;  %vm6125_vm11 = vnez %v6023_v39 }
 0x8d4   : > { %3469 = vmatmul.msk.f32.gmra.mxu1 %vm4258_vm13, %v3858_v6  ;;  %vm6126_vm13 = vnez %v6025_v3 }
 0x8dc   : > { %3470 = vmatmul.msk.f32.gmra.mxu1 %vm4272_vm15, %v3858_v6  ;;  %vm6127_vm15 = vnez %v6027_v40 }
 0x8e4   : > { %3471 = vmatmul.msk.f32.gmra.mxu1 %vm4287_vm4, %v3858_v6 }
 0x8ec   : > { %3472 = vmatmul.msk.f32.gmra.mxu1 %vm4316_vm8, %v3858_v6 }
 0x8f4   : > { %3473 = vmatmul.msk.f32.gmra.mxu1 %vm6121_vm2, %v3858_v6 }
 0x8fc   : > { %3474 = vmatmul.msk.f32.gmra.mxu1 %vm6122_vm5, %v3858_v6 }
 0x904   : > { %3475 = vmatmul.msk.f32.gmra.mxu1 %vm6123_vm7, %v3858_v6  ;;  %vm6128_vm7 = vmmov %vm6112_vm0 }
 0x90c   : > { %3476 = vmatmul.msk.f32.gmra.mxu1 %vm6124_vm9, %v3858_v6 }
 0x914   : > { %3477 = vmatmul.msk.f32.gmra.mxu1 %vm6125_vm11, %v3858_v6 }
 0x91c   : > { %3478 = vmatmul.msk.f32.gmra.mxu1 %vm6126_vm13, %v3858_v6 }
 0x924   : > { %3479 = vmatmul.msk.f32.gmra.mxu1 %vm6127_vm15, %v3858_v6 }
 0x929   : > { %v2596_v49 = vpop.f32.mrf.mxu1 }
 0x92a   : > { %3743 = vrcp.f32 %v2596_v49  ;;  %v2655_v44 = vand.u32 2147483648, %v2596_v49  ;;  %v2653_v62 = vand.u32 2147483647, %v2596_v49  ;;  %vm2649_vm8 = vweird.f32 %v2596_v49 }
 0x92c   : > { %v2656_v41 = vor.u32 1.1754944e-38, %v2655_v44  ;;  %vm2654_vm3 = vcmp.eq.f32.partialorder %v2653_v62, 8.507059e+37 }
 0x930   : > { %v3744_v58 = vpop.eup %3743 }
 0x931   : > { %v2645_v2 = vmul.f32 %v3744_v58, %v2596_v49  ;;  %v2599_v7 = vpop.f32.mrf.mxu1  ;;  %vm2650_vm4 = vweird.f32 %v3744_v58 }
 0x932   : > { %3745 = vrcp.f32 %v2599_v7  ;;  %vm2651_vm1 = vmor %vm2649_vm8, %vm2650_vm4  ;;  %vm2664_vm10 = vweird.f32 %v2599_v7  ;;  %v2670_v45 = vand.u32 2147483648, %v2599_v7  ;;  %v2668_v61 = vand.u32 2147483647, %v2599_v7 }
 0x933   : > { %v2646_v21 = vsub.f32 1.0, %v2645_v2  ;;  %vm6129_vm4 = vmmov %vm6112_vm0 }
 0x934   : > { %v2671_v26 = vor.u32 1.1754944e-38, %v2670_v45  ;;  %vm2669_vm14 = vcmp.eq.f32.partialorder %v2668_v61, 8.507059e+37 }
 0x935   : > { %v2647_v31 = vmul.f32 %v3744_v58, %v2646_v21 }
 0x937   : > { %v2648_v25 = vadd.f32 %v3744_v58, %v2647_v31 }
 0x938   : > { %v3746_v53 = vpop.eup %3745 }
 0x939   : > { %v2660_v12 = vmul.f32 %v3746_v53, %v2599_v7  ;;  %v2602_v24 = vpop.f32.mrf.mxu1  ;;  %v2652_v39 = vsel %vm2651_vm1, %v3744_v58, %v2648_v25  ;;  %vm2665_vm6 = vweird.f32 %v3746_v53 }
 0x93a   : > { %3747 = vrcp.f32 %v2602_v24  ;;  %v2657_v40 = vsel %vm2654_vm3, %v2656_v41, %v2652_v39  ;;  %vm2666_vm12 = vmor %vm2664_vm10, %vm2665_vm6  ;;  %vm2679_vm2 = vweird.f32 %v2602_v24  ;;  %v2685_v57 = vand.u32 2147483648, %v2602_v24 }
 0x93b   : > { %v2661_v3 = vsub.f32 1.0, %v2660_v12  ;;  %v5556_v5 = vmul.f32 %v3742_v48, %v2657_v40  ;;  %v2683_v30 = vand.u32 2147483647, %v2602_v24  ;;  %vm6130_vm6 = vmmov %vm6112_vm0 }
 0x93c   : > { %v2686_v59 = vor.u32 1.1754944e-38, %v2685_v57 }
 0x93d   : > { %v2662_v0 = vmul.f32 %v3746_v53, %v2661_v3  ;;  %v2884_v35 = vsel %vm6112_vm0, %v5556_v5, -inf  ;;  %vm2684_vm11 = vcmp.eq.f32.partialorder %v2683_v30, 8.507059e+37 }
 0x93e   : > { %2885 = vmax.xlane.f32.xlu0 %v2884_v35 }
 0x93f   : > { %v2663_v1 = vadd.f32 %v3746_v53, %v2662_v0 }
 0x940   : > { %v3748_v54 = vpop.eup %3747 }
 0x941   : > { %v2675_v14 = vmul.f32 %v3748_v54, %v2602_v24  ;;  %v2605_v34 = vpop.f32.mrf.mxu1  ;;  %v2667_v19 = vsel %vm2666_vm12, %v3746_v53, %v2663_v1  ;;  %vm2680_vm5 = vweird.f32 %v3748_v54 }
 0x942   : > { %3749 = vrcp.f32 %v2605_v34  ;;  %v2672_v56 = vsel %vm2669_vm14, %v2671_v26, %v2667_v19  ;;  %vm2681_vm9 = vmor %vm2679_vm2, %vm2680_vm5  ;;  %vm2694_vm13 = vweird.f32 %v2605_v34  ;;  %v2700_v28 = vand.u32 2147483648, %v2605_v34 }
 0x943   : > { %v2676_v23 = vsub.f32 1.0, %v2675_v14  ;;  %v5561_v11 = vmul.f32 %v5521_v63, %v2672_v56  ;;  %v2698_v55 = vand.u32 2147483647, %v2605_v34  ;;  %vm6131_vm5 = vmmov %vm6129_vm4 }
 0x944   : > { %v2701_v49 = vor.u32 1.1754944e-38, %v2700_v28 }
 0x945   : > { %v2677_v33 = vmul.f32 %v3748_v54, %v2676_v23  ;;  %v2887_v52 = vsel %vm6128_vm7, %v5561_v11, -inf  ;;  %vm2699_vm1 = vcmp.eq.f32.partialorder %v2698_v55, 8.507059e+37 }
 0x946   : > { %2888 = vmax.xlane.f32.xlu1 %v2887_v52 }
 0x947   : > { %v2678_v37 = vadd.f32 %v3748_v54, %v2677_v33 }
 0x948   : > { %v3750_v16 = vpop.eup %3749 }
 0x949   : > { %v2690_v22 = vmul.f32 %v3750_v16, %v2605_v34  ;;  %v2608_v29 = vpop.f32.mrf.mxu1  ;;  %v2682_v4 = vsel %vm2681_vm9, %v3748_v54, %v2678_v37  ;;  %vm2695_vm15 = vweird.f32 %v3750_v16 }
 0x94a   : > { %3751 = vrcp.f32 %v2608_v29  ;;  %v2687_v43 = vsel %vm2684_vm11, %v2686_v59, %v2682_v4  ;;  %vm2696_vm8 = vmor %vm2694_vm13, %vm2695_vm15  ;;  %vm2709_vm3 = vweird.f32 %v2608_v29  ;;  %v2715_v62 = vand.u32 2147483648, %v2608_v29 }
 0x94b   : > { %v2691_v36 = vsub.f32 1.0, %v2690_v22  ;;  %v5566_v10 = vmul.f32 %v5518_v13, %v2687_v43  ;;  %v2713_v25 = vand.u32 2147483647, %v2608_v29  ;;  %vm6132_vm15 = vmmov %vm6129_vm4 }
 0x94c   : > { %v2716_v24 = vor.u32 1.1754944e-38, %v2715_v62 }
 0x94d   : > { %v2692_v38 = vmul.f32 %v3750_v16, %v2691_v36  ;;  %v2890_v63 = vsel %vm6129_vm4, %v5566_v10, -inf  ;;  %vm2714_vm12 = vcmp.eq.f32.partialorder %v2713_v25, 8.507059e+37 }
 0x94e   : > { %2891 = vmax.xlane.f32.xlu2 %v2890_v63 }
 0x94f   : > { %v2693_v48 = vadd.f32 %v3750_v16, %v2692_v38 }
 0x950   : > { %v3752_v6 = vpop.eup %3751 }
 0x951   : > { %v2705_v58 = vmul.f32 %v3752_v6, %v2608_v29  ;;  %v2611_v2 = vpop.f32.mrf.mxu1  ;;  %v2697_v7 = vsel %vm2696_vm8, %v3750_v16, %v2693_v48  ;;  %vm2710_vm10 = vweird.f32 %v3752_v6 }
 0x952   : > { %3753 = vrcp.f32 %v2611_v2  ;;  %v2702_v21 = vsel %vm2699_vm1, %v2701_v49, %v2697_v7  ;;  %vm2711_vm0 = vmor %vm2709_vm3, %vm2710_vm10  ;;  %vm2724_vm14 = vweird.f32 %v2611_v2  ;;  %v2730_v35 = vand.u32 2147483648, %v2611_v2 }
 0x953   : > { %v2706_v13 = vsub.f32 1.0, %v2705_v58  ;;  %v5571_v31 = vmul.f32 %v5515_v32, %v2702_v21  ;;  %v2728_v1 = vand.u32 2147483647, %v2611_v2  ;;  %vm6133_vm10 = vmmov %vm6131_vm5 }
 0x954   : > { %v2731_v34 = vor.u32 1.1754944e-38, %v2730_v35 }
 0x955   : > { %v2707_v44 = vmul.f32 %v3752_v6, %v2706_v13  ;;  %v2893_v53 = vsel %vm6130_vm6, %v5571_v31, -inf  ;;  %vm2729_vm9 = vcmp.eq.f32.partialorder %v2728_v1, 8.507059e+37 }
 0x956   : > { %2894 = vmax.xlane.f32.xlu0 %v2893_v53 }
 0x957   : > { %v2708_v41 = vadd.f32 %v3752_v6, %v2707_v44 }
 0x958   : > { %v3754_v12 = vpop.eup %3753 }
 0x959   : > { %v2720_v39 = vmul.f32 %v3754_v12, %v2611_v2  ;;  %v2614_v3 = vpop.f32.mrf.mxu1  ;;  %v2712_v40 = vsel %vm2711_vm0, %v3752_v6, %v2708_v41  ;;  %vm2725_vm2 = vweird.f32 %v3754_v12 }
 0x95a   : > { %3755 = vrcp.f32 %v2614_v3  ;;  %v2717_v0 = vsel %vm2714_vm12, %v2716_v24, %v2712_v40  ;;  %vm2726_vm7 = vmor %vm2724_vm14, %vm2725_vm2  ;;  %vm2739_vm11 = vweird.f32 %v2614_v3  ;;  %v2745_v52 = vand.u32 2147483648, %v2614_v3 }
 0x95b   : > { %v2721_v32 = vsub.f32 1.0, %v2720_v39  ;;  %v5576_v45 = vmul.f32 %v5512_v17, %v2717_v0  ;;  %v2743_v37 = vand.u32 2147483647, %v2614_v3  ;;  %vm6134_vm2 = vmmov %vm6131_vm5 }
 0x95c   : > { %v2746_v29 = vor.u32 1.1754944e-38, %v2745_v52 }
 0x95d   : > { %v2722_v61 = vmul.f32 %v3754_v12, %v2721_v32  ;;  %v2896_v54 = vsel %vm6131_vm5, %v5576_v45, -inf  ;;  %vm2744_vm8 = vcmp.eq.f32.partialorder %v2743_v37, 8.507059e+37 }
 0x95e   : > { %2897 = vmax.xlane.f32.xlu1 %v2896_v54 }
 0x95f   : > { %v2723_v26 = vadd.f32 %v3754_v12, %v2722_v61 }
 0x960   : > { %v3756_v14 = vpop.eup %3755 }
 0x961   : > { %v2735_v19 = vmul.f32 %v3756_v14, %v2614_v3  ;;  %v2617_v23 = vpop.f32.mrf.mxu1  ;;  %v2727_v56 = vsel %vm2726_vm7, %v3754_v12, %v2723_v26  ;;  %vm2740_vm13 = vweird.f32 %v3756_v14 }
 0x962   : > { %3757 = vrcp.f32 %v2617_v23  ;;  %v2732_v33 = vsel %vm2729_vm9, %v2731_v34, %v2727_v56  ;;  %vm2741_vm4 = vmor %vm2739_vm11, %vm2740_vm13  ;;  %vm2754_vm1 = vweird.f32 %v2617_v23  ;;  %v2760_v63 = vand.u32 2147483648, %v2617_v23 }
 0x963   : > { %v2736_v17 = vsub.f32 1.0, %v2735_v19  ;;  %v5581_v57 = vmul.f32 %v5509_v51, %v2732_v33  ;;  %v2758_v48 = vand.u32 2147483647, %v2617_v23  ;;  %vm6135_vm13 = vmmov %vm6134_vm2 }
 0x964   : > { %v2761_v2 = vor.u32 1.1754944e-38, %v2760_v63 }
 0x965   : > { %v2737_v30 = vmul.f32 %v3756_v14, %v2736_v17  ;;  %v2899_v16 = vsel %vm6132_vm15, %v5581_v57, -inf  ;;  %vm2759_vm0 = vcmp.eq.f32.partialorder %v2758_v48, 8.507059e+37 }
 0x966   : > { %2900 = vmax.xlane.f32.xlu2 %v2899_v16 }
 0x967   : > { %v2738_v59 = vadd.f32 %v3756_v14, %v2737_v30 }
 0x968   : > { %v3758_v22 = vpop.eup %3757 }
 0x969   : > { %v2750_v4 = vmul.f32 %v3758_v22, %v2617_v23  ;;  %v2620_v36 = vpop.f32.mrf.mxu1  ;;  %v2742_v43 = vsel %vm2741_vm4, %v3756_v14, %v2738_v59  ;;  %vm2755_vm3 = vweird.f32 %v3758_v22 }
 0x96a   : > { %3759 = vrcp.f32 %v2620_v36  ;;  %v2747_v38 = vsel %vm2744_vm8, %v2746_v29, %v2742_v43  ;;  %vm2756_vm6 = vmor %vm2754_vm1, %vm2755_vm3  ;;  %vm2769_vm12 = vweird.f32 %v2620_v36  ;;  %v2775_v53 = vand.u32 2147483648, %v2620_v36 }
 0x96b   : > { %v2751_v51 = vsub.f32 1.0, %v2750_v4  ;;  %v5586_v28 = vmul.f32 %v5506_v9, %v2747_v38  ;;  %v2773_v41 = vand.u32 2147483647, %v2620_v36  ;;  %vm6136_vm3 = vmmov %vm6134_vm2 }
 0x96c   : > { %v2776_v3 = vor.u32 1.1754944e-38, %v2775_v53 }
 0x96d   : > { %v2752_v55 = vmul.f32 %v3758_v22, %v2751_v51  ;;  %v2902_v6 = vsel %vm6133_vm10, %v5586_v28, -inf  ;;  %vm2774_vm7 = vcmp.eq.f32.partialorder %v2773_v41, 8.507059e+37 }
 0x96e   : > { %2903 = vmax.xlane.f32.xlu0 %v2902_v6 }
 0x96f   : > { %v2753_v49 = vadd.f32 %v3758_v22, %v2752_v55 }
 0x970   : > { %v3760_v58 = vpop.eup %3759 }
 0x971   : > { %v2765_v7 = vmul.f32 %v3760_v58, %v2620_v36  ;;  %v2623_v13 = vpop.f32.mrf.mxu1  ;;  %v2757_v21 = vsel %vm2756_vm6, %v3758_v22, %v2753_v49  ;;  %vm2770_vm14 = vweird.f32 %v3760_v58 }
 0x972   : > { %3761 = vrcp.f32 %v2623_v13  ;;  %v2762_v44 = vsel %vm2759_vm0, %v2761_v2, %v2757_v21  ;;  %vm2771_vm5 = vmor %vm2769_vm12, %vm2770_vm14  ;;  %vm2784_vm9 = vweird.f32 %v2623_v13  ;;  %v2790_v54 = vand.u32 2147483648, %v2623_v13 }
 0x973   : > { %v2766_v9 = vsub.f32 1.0, %v2765_v7  ;;  %v5591_v62 = vmul.f32 %v5503_v15, %v2762_v44  ;;  %v2788_v26 = vand.u32 2147483647, %v2623_v13  ;;  %vm6137_vm14 = vmmov %vm6134_vm2 }
 0x974   : > { %v2791_v23 = vor.u32 1.1754944e-38, %v2790_v54 }
 0x975   : > { %v2767_v25 = vmul.f32 %v3760_v58, %v2766_v9  ;;  %v2905_v12 = vsel %vm6134_vm2, %v5591_v62, -inf  ;;  %vm2789_vm4 = vcmp.eq.f32.partialorder %v2788_v26, 8.507059e+37 }
 0x976   : > { %2906 = vmax.xlane.f32.xlu1 %v2905_v12 }
 0x977   : > { %v2768_v24 = vadd.f32 %v3760_v58, %v2767_v25 }
 0x978   : > { %v3762_v39 = vpop.eup %3761 }
 0x979   : > { %v2780_v40 = vmul.f32 %v3762_v39, %v2623_v13  ;;  %v2626_v32 = vpop.f32.mrf.mxu1  ;;  %v2772_v0 = vsel %vm2771_vm5, %v3760_v58, %v2768_v24  ;;  %vm2785_vm11 = vweird.f32 %v3762_v39 }
 0x97a   : > { %3763 = vrcp.f32 %v2626_v32  ;;  %v2777_v61 = vsel %vm2774_vm7, %v2776_v3, %v2772_v0  ;;  %vm2786_vm15 = vmor %vm2784_vm9, %vm2785_vm11  ;;  %vm2799_vm8 = vweird.f32 %v2626_v32  ;;  %v2805_v16 = vand.u32 2147483648, %v2626_v32 }
 0x97b   : > { %v2781_v15 = vsub.f32 1.0, %v2780_v40  ;;  %v5596_v35 = vmul.f32 %v5500_v20, %v2777_v61  ;;  %v2803_v59 = vand.u32 2147483647, %v2626_v32  ;;  %vm6138_vm11 = vmmov %vm6136_vm3 }
 0x97c   : > { %v2806_v36 = vor.u32 1.1754944e-38, %v2805_v16 }
 0x97d   : > { %v2782_v1 = vmul.f32 %v3762_v39, %v2781_v15  ;;  %v2908_v14 = vsel %vm6135_vm13, %v5596_v35, -inf  ;;  %vm2804_vm6 = vcmp.eq.f32.partialorder %v2803_v59, 8.507059e+37 }
 0x97e   : > { %2909 = vmax.xlane.f32.xlu2 %v2908_v14 }
 0x97f   : > { %v2783_v34 = vadd.f32 %v3762_v39, %v2782_v1 }
 0x980   : > { %v3764_v19 = vpop.eup %3763 }
 0x981   : > { %v2795_v56 = vmul.f32 %v3764_v19, %v2626_v32  ;;  %v2629_v17 = vpop.f32.mrf.mxu1  ;;  %v2787_v33 = vsel %vm2786_vm15, %v3762_v39, %v2783_v34  ;;  %vm2800_vm1 = vweird.f32 %v3764_v19 }
 0x982   : > { %3765 = vrcp.f32 %v2629_v17  ;;  %v2792_v30 = vsel %vm2789_vm4, %v2791_v23, %v2787_v33  ;;  %vm2801_vm10 = vmor %vm2799_vm8, %vm2800_vm1  ;;  %vm2814_vm0 = vweird.f32 %v2629_v17  ;;  %v2820_v6 = vand.u32 2147483648, %v2629_v17 }
 0x983   : > { %v2796_v20 = vsub.f32 1.0, %v2795_v56  ;;  %v5601_v52 = vmul.f32 %v5497_v60, %v2792_v30  ;;  %v2818_v49 = vand.u32 2147483647, %v2629_v17  ;;  %vm6139_vm1 = vmmov %vm6136_vm3 }
 0x984   : > { %v2821_v13 = vor.u32 1.1754944e-38, %v2820_v6 }
 0x985   : > { %v2797_v37 = vmul.f32 %v3764_v19, %v2796_v20  ;;  %v2911_v22 = vsel %vm6136_vm3, %v5601_v52, -inf  ;;  %vm2819_vm5 = vcmp.eq.f32.partialorder %v2818_v49, 8.507059e+37 }
 0x986   : > { %2912 = vmax.xlane.f32.xlu0 %v2911_v22 }
 0x987   : > { %v2798_v29 = vadd.f32 %v3764_v19, %v2797_v37 }
 0x988   : > { %v3766_v4 = vpop.eup %3765 }
 0x989   : > { %v2810_v43 = vmul.f32 %v3766_v4, %v2629_v17  ;;  %v2632_v51 = vpop.f32.mrf.mxu1  ;;  %v2802_v38 = vsel %vm2801_vm10, %v3764_v19, %v2798_v29  ;;  %vm2815_vm12 = vweird.f32 %v3766_v4 }
 0x98a   : > { %3767 = vrcp.f32 %v2632_v51  ;;  %v2807_v55 = vsel %vm2804_vm6, %v2806_v36, %v2802_v38  ;;  %vm2816_vm2 = vmor %vm2814_vm0, %vm2815_vm12  ;;  %vm2829_vm7 = vweird.f32 %v2632_v51  ;;  %v2835_v12 = vand.u32 2147483648, %v2632_v51 }
 0x98b   : > { %v2811_v60 = vsub.f32 1.0, %v2810_v43  ;;  %v5606_v63 = vmul.f32 %v5494_v46, %v2807_v55  ;;  %v2833_v24 = vand.u32 2147483647, %v2632_v51  ;;  %vm6140_vm12 = vmmov %vm6139_vm1 }
 0x98c   : > { %v2836_v32 = vor.u32 1.1754944e-38, %v2835_v12 }
 0x98d   : > { %v2812_v48 = vmul.f32 %v3766_v4, %v2811_v60  ;;  %v2914_v58 = vsel %vm6137_vm14, %v5606_v63, -inf  ;;  %vm2834_vm15 = vcmp.eq.f32.partialorder %v2833_v24, 8.507059e+37 }
 0x98e   : > { %2915 = vmax.xlane.f32.xlu1 %v2914_v58 }
 0x98f   : > { %v2813_v2 = vadd.f32 %v3766_v4, %v2812_v48 }
 0x990   : > { %v3768_v7 = vpop.eup %3767 }
 0x991   : > { %v2825_v21 = vmul.f32 %v3768_v7, %v2632_v51  ;;  %v2635_v9 = vpop.f32.mrf.mxu1  ;;  %v2817_v44 = vsel %vm2816_vm2, %v3766_v4, %v2813_v2  ;;  %vm2830_vm9 = vweird.f32 %v3768_v7 }
 0x992   : > { %3769 = vrcp.f32 %v2635_v9  ;;  %v2822_v25 = vsel %vm2819_vm5, %v2821_v13, %v2817_v44  ;;  %vm2831_vm13 = vmor %vm2829_vm7, %vm2830_vm9  ;;  %vm2844_vm4 = vweird.f32 %v2635_v9  ;;  %v2850_v14 = vand.u32 2147483648, %v2635_v9 }
 0x993   : > { %v2826_v46 = vsub.f32 1.0, %v2825_v21  ;;  %v5611_v53 = vmul.f32 %v5491_v27, %v2822_v25  ;;  %v2848_v34 = vand.u32 2147483647, %v2635_v9  ;;  %vm6141_vm9 = vmmov %vm6139_vm1 }
 0x994   : > { %v2851_v17 = vor.u32 1.1754944e-38, %v2850_v14 }
 0x995   : > { %v2827_v41 = vmul.f32 %v3768_v7, %v2826_v46  ;;  %v2917_v39 = vsel %vm6138_vm11, %v5611_v53, -inf  ;;  %vm2849_vm10 = vcmp.eq.f32.partialorder %v2848_v34, 8.507059e+37 }
 0x996   : > { %2918 = vmax.xlane.f32.xlu2 %v2917_v39 }
 0x997   : > { %v2828_v3 = vadd.f32 %v3768_v7, %v2827_v41 }
 0x998   : > { %v3770_v40 = vpop.eup %3769 }
 0x999   : > { %v2840_v0 = vmul.f32 %v3770_v40, %v2635_v9  ;;  %v2638_v15 = vpop.f32.mrf.mxu1  ;;  %v2832_v61 = vsel %vm2831_vm13, %v3768_v7, %v2828_v3  ;;  %vm2845_vm8 = vweird.f32 %v3770_v40 }
 0x99a   : > { %3771 = vrcp.f32 %v2638_v15  ;;  %v2837_v1 = vsel %vm2834_vm15, %v2836_v32, %v2832_v61  ;;  %vm2846_vm3 = vmor %vm2844_vm4, %vm2845_vm8  ;;  %v2865_v16 = vand.u32 2147483648, %v2638_v15  ;;  %vm2859_vm6 = vweird.f32 %v2638_v15 }
 0x99b   : > { %v2841_v27 = vsub.f32 1.0, %v2840_v0  ;;  %v5616_v54 = vmul.f32 %v5488_v18, %v2837_v1  ;;  %v2863_v29 = vand.u32 2147483647, %v2638_v15  ;;  %vm6142_vm4 = vmmov %vm6139_vm1 }
 0x99c   : > { %v2866_v51 = vor.u32 1.1754944e-38, %v2865_v16  ;;  %vm6143_vm8 = vmmov %vm6139_vm1 }
 0x99d   : > { %v2842_v26 = vmul.f32 %v3770_v40, %v2841_v27  ;;  %v2920_v19 = vsel %vm6139_vm1, %v5616_v54, -inf  ;;  %vm2864_vm2 = vcmp.eq.f32.partialorder %v2863_v29, 8.507059e+37 }
 0x99e   : > { %2921 = vmax.xlane.f32.xlu0 %v2920_v19 }
 0x99f   : > { %v2843_v23 = vadd.f32 %v3770_v40, %v2842_v26 }
 0x9a0   : > { %v3772_v56 = vpop.eup %3771 }
 0x9a1   : > { %v2855_v33 = vmul.f32 %v3772_v56, %v2638_v15  ;;  %v2641_v20 = vpop.f32.mrf.mxu1  ;;  %v2847_v30 = vsel %vm2846_vm3, %v3770_v40, %v2843_v23  ;;  %vm2860_vm0 = vweird.f32 %v3772_v56  ;;  %vm6144_vm3 = vmmov %vm6142_vm4 }
 0x9a2   : > { %3773 = vrcp.f32 %v2641_v20  ;;  %v2852_v37 = vsel %vm2849_vm10, %v2851_v17, %v2847_v30  ;;  %vm2861_vm14 = vmor %vm2859_vm6, %vm2860_vm0  ;;  %vm2874_vm5 = vweird.f32 %v2641_v20  ;;  %v2880_v6 = vand.u32 2147483648, %v2641_v20 }
 0x9a3   : > { %v2856_v18 = vsub.f32 1.0, %v2855_v33  ;;  %v5621_v59 = vmul.f32 %v5485_v8, %v2852_v37  ;;  %v2878_v58 = vand.u32 2147483647, %v2641_v20  ;;  %vm6145_vm6 = vmmov %vm6144_vm3 }
 0x9a4   : > { %v2881_v13 = vor.u32 1.1754944e-38, %v2880_v6 }
 0x9a5   : > { %v2857_v22 = vmul.f32 %v3772_v56, %v2856_v18  ;;  %v2923_v4 = vsel %vm6140_vm12, %v5621_v59, -inf  ;;  %vm2879_vm13 = vcmp.eq.f32.partialorder %v2878_v58, 8.507059e+37  ;;  %vm6146_vm12 = vmmov %vm6144_vm3 }
 0x9a6   : > { %2924 = vmax.xlane.f32.xlu1 %v2923_v4 }
 0x9a7   : > { %v2858_v36 = vadd.f32 %v3772_v56, %v2857_v22 }
 0x9a8   : > { %v3774_v43 = vpop.eup %3773 }
 0x9a9   : > { %v2870_v38 = vmul.f32 %v3774_v43, %v2641_v20  ;;  %v2862_v60 = vsel %vm2861_vm14, %v3772_v56, %v2858_v36  ;;  %vm2875_vm7 = vweird.f32 %v3774_v43 }
 0x9aa   : > { %v2867_v55 = vsel %vm2864_vm2, %v2866_v51, %v2862_v60  ;;  %vm2876_vm11 = vmor %vm2874_vm5, %vm2875_vm7 }
 0x9ab   : > { %v2871_v48 = vsub.f32 1.0, %v2870_v38  ;;  %v5626_v8 = vmul.f32 %v5480_v50, %v2867_v55  ;;  %vm6147_vm2 = vmmov %vm6144_vm3 }
 0x9ac   : > { %vm6148_vm7 = vmmov %vm6147_vm2 }
 0x9ad   : > { %v2872_v49 = vmul.f32 %v3774_v43, %v2871_v48  ;;  %v2926_v2 = vsel %vm6141_vm9, %v5626_v8, -inf }
 0x9ae   : > { %2927 = vmax.xlane.f32.xlu2 %v2926_v2 }
 0x9af   : > { %v2873_v7 = vadd.f32 %v3774_v43, %v2872_v49 }
 0x9b1   : > { %v2877_v21 = vsel %vm2876_vm11, %v3774_v43, %v2873_v7  ;;  %v2886_v9 = vpop.xlane.xlu0 %2885  ;;  %vm6149_vm11 = vmmov %vm6147_vm2 }
 0x9b2   : > { %v2882_v44 = vsel %vm2879_vm13, %v2881_v13, %v2877_v21  ;;  %vm2932_vm15 = vcmp.ge.f32.partialorder %v5556_v5, %v2886_v9 }
 0x9b3   : > { %v5632_v50 = vmul.f32 %v5475_v47, %v2882_v44  ;;  %v2948_v46 = vsel %vm2932_vm15, %v4172_v42, 4  ;;  %vm6150_vm15 = vmmov %vm6147_vm2 }
 0x9b4   : > { %v5636_v25 = vsel %vm6142_vm4, %v2948_v46, 2147483647 }
 0x9b5   : > { %v2929_v41 = vsel %vm6143_vm8, %v5632_v50, -inf  ;;  %v2966_v12 = vshra.s32 %v5636_v25, 16  ;;  %vm6151_vm8 = vmmov %vm6147_vm2 }
 0x9b6   : > { %2930 = vmax.xlane.f32.xlu0 %v2929_v41 }
 0x9b7   : > { %v5641_v24 = vcvt.s32.f32 %v2966_v12 }
 0x9b9   : > { %v2889_v39 = vpop.xlane.xlu1 %2888  ;;  %2969 = vmin.xlane.f32.xlu1 %v5641_v24 }
 0x9ba   : > { %vm2933_vm1 = vcmp.ge.f32.partialorder %v5561_v11, %v2889_v39 }
 0x9bb   : > { %v2949_v47 = vsel %vm2933_vm1, %v4172_v42, 4 }
 0x9bc   : > { %v5647_v3 = vsel %vm6144_vm3, %v2949_v47, 2147483647  ;;  %vm6152_vm3 = vmmov %vm6147_vm2 }
 0x9bd   : > { %v2981_v40 = vshra.s32 %v5647_v3, 16 }
 0x9bf   : > { %v5650_v32 = vcvt.s32.f32 %v2981_v40 }
 0x9c1   : > { %v2892_v0 = vpop.xlane.xlu2 %2891  ;;  %2984 = vmin.xlane.f32.xlu0 %v5650_v32 }
 0x9c2   : > { %vm2934_vm10 = vcmp.ge.f32.partialorder %v5566_v10, %v2892_v0 }
 0x9c3   : > { %v2950_v15 = vsel %vm2934_vm10, %v4172_v42, 4 }
 0x9c4   : > { %v5656_v61 = vsel %vm6145_vm6, %v2950_v15, 2147483647  ;;  %vm6153_vm6 = vmmov %vm6147_vm2 }
 0x9c5   : > { %v2996_v27 = vshra.s32 %v5656_v61, 16 }
 0x9c7   : > { %v5659_v1 = vcvt.s32.f32 %v2996_v27 }
 0x9c9   : > { %v2895_v26 = vpop.xlane.xlu0 %2894  ;;  %2999 = vmin.xlane.f32.xlu1 %v5659_v1 }
 0x9ca   : > { %vm2935_vm0 = vcmp.ge.f32.partialorder %v5571_v31, %v2895_v26 }
 0x9cb   : > { %v2951_v14 = vsel %vm2935_vm0, %v4172_v42, 4 }
 0x9cc   : > { %v5665_v34 = vsel %vm6146_vm12, %v2951_v14, 2147483647  ;;  %vm6154_vm12 = vmmov %vm6147_vm2 }
 0x9cd   : > { %v3011_v19 = vshra.s32 %v5665_v34, 16 }
 0x9cf   : > { %v5668_v23 = vcvt.s32.f32 %v3011_v19 }
 0x9d1   : > { %v2898_v56 = vpop.xlane.xlu1 %2897  ;;  %3014 = vmin.xlane.f32.xlu2 %v5668_v23 }
 0x9d2   : > { %vm2936_vm14 = vcmp.ge.f32.partialorder %v5576_v45, %v2898_v56 }
 0x9d3   : > { %v2952_v17 = vsel %vm2936_vm14, %v4172_v42, 4 }
 0x9d4   : > { %v5674_v33 = vsel %vm6147_vm2, %v2952_v17, 2147483647 }
 0x9d5   : > { %v3026_v20 = vshra.s32 %v5674_v33, 16 }
 0x9d7   : > { %v5677_v30 = vcvt.s32.f32 %v3026_v20 }
 0x9d9   : > { %v2901_v18 = vpop.xlane.xlu2 %2900  ;;  %3029 = vmin.xlane.f32.xlu0 %v5677_v30 }
 0x9da   : > { %vm2937_vm5 = vcmp.ge.f32.partialorder %v5581_v57, %v2901_v18 }
 0x9db   : > { %v2953_v37 = vsel %vm2937_vm5, %v4172_v42, 4 }
 0x9dc   : > { %v5683_v16 = vsel %vm6148_vm7, %v2953_v37, 2147483647  ;;  %vm6155_vm7 = vmmov %vm6147_vm2 }
 0x9dd   : > { %v3041_v22 = vshra.s32 %v5683_v16, 16 }
 0x9df   : > { %v5686_v29 = vcvt.s32.f32 %v3041_v22 }
 0x9e1   : > { %v2904_v4 = vpop.xlane.xlu0 %2903  ;;  %3044 = vmin.xlane.f32.xlu1 %v5686_v29 }
 0x9e2   : > { %vm2938_vm9 = vcmp.ge.f32.partialorder %v5586_v28, %v2904_v4 }
 0x9e3   : > { %v2954_v36 = vsel %vm2938_vm9, %v4172_v42, 4 }
 0x9e4   : > { %v5692_v43 = vsel %vm6149_vm11, %v2954_v36, 2147483647  ;;  %vm6156_vm11 = vmmov %vm6147_vm2 }
 0x9e5   : > { %v3056_v51 = vshra.s32 %v5692_v43, 16 }
 0x9e7   : > { %v5695_v38 = vcvt.s32.f32 %v3056_v51 }
 0x9e9   : > { %v2907_v60 = vpop.xlane.xlu1 %2906  ;;  %3059 = vmin.xlane.f32.xlu2 %v5695_v38 }
 0x9ea   : > { %vm2939_vm13 = vcmp.ge.f32.partialorder %v5591_v62, %v2907_v60 }
 0x9eb   : > { %v2955_v55 = vsel %vm2939_vm13, %v4172_v42, 4 }
 0x9ec   : > { %v5701_v48 = vsel %vm6150_vm15, %v2955_v55, 2147483647 }
 0x9ed   : > { %v3071_v6 = vshra.s32 %v5701_v48, 16 }
 0x9ef   : > { %v5704_v49 = vcvt.s32.f32 %v3071_v6 }
 0x9f1   : > { %v2910_v58 = vpop.xlane.xlu2 %2909  ;;  %3074 = vmin.xlane.f32.xlu0 %v5704_v49 }
 0x9f2   : > { %vm2940_vm4 = vcmp.ge.f32.partialorder %v5596_v35, %v2910_v58 }
 0x9f3   : > { %v2956_v2 = vsel %vm2940_vm4, %v4172_v42, 4  ;;  %vm6157_vm4 = vmmov %vm6147_vm2 }
 0x9f4   : > { %v5710_v7 = vsel %vm6151_vm8, %v2956_v2, 2147483647 }
 0x9f5   : > { %v3086_v13 = vshra.s32 %v5710_v7, 16 }
 0x9f7   : > { %v5713_v21 = vcvt.s32.f32 %v3086_v13 }
 0x9f9   : > { %v2913_v9 = vpop.xlane.xlu0 %2912  ;;  %3089 = vmin.xlane.f32.xlu1 %v5713_v21 }
 0x9fa   : > { %vm2941_vm1 = vcmp.ge.f32.partialorder %v5601_v52, %v2913_v9 }
 0x9fb   : > { %v2957_v44 = vsel %vm2941_vm1, %v4172_v42, 4 }
 0x9fc   : > { %v5719_v46 = vsel %vm6152_vm3, %v2957_v44, 2147483647 }
 0x9fd   : > { %v3101_v41 = vshra.s32 %v5719_v46, 16 }
 0x9ff   : > { %v5722_v12 = vcvt.s32.f32 %v3101_v41  ;;  %v2965_v41 = vand.u32 65535, %v5636_v25 }
 0xa01   : > { %v2916_v39 = vpop.xlane.xlu1 %2915  ;;  %3104 = vmin.xlane.f32.xlu2 %v5722_v12 }
 0xa02   : > { %vm2942_vm10 = vcmp.ge.f32.partialorder %v5606_v63, %v2916_v39 }
 0xa03   : > { %v2958_v47 = vsel %vm2942_vm10, %v4172_v42, 4 }
 0xa04   : > { %v5728_v40 = vsel %vm6153_vm6, %v2958_v47, 2147483647 }
 0xa05   : > { %v3116_v0 = vshra.s32 %v5728_v40, 16 }
 0xa07   : > { %v5731_v15 = vcvt.s32.f32 %v3116_v0  ;;  %v2967_v0 = vcvt.s32.f32 %v2965_v41 }
 0xa09   : > { %v2919_v27 = vpop.xlane.xlu2 %2918  ;;  %3119 = vmin.xlane.f32.xlu0 %v5731_v15 }
 0xa0a   : > { %vm2943_vm0 = vcmp.ge.f32.partialorder %v5611_v53, %v2919_v27 }
 0xa0b   : > { %v2959_v26 = vsel %vm2943_vm0, %v4172_v42, 4 }
 0xa0c   : > { %v5737_v14 = vsel %vm6154_vm12, %v2959_v26, 2147483647 }
 0xa0d   : > { %v3131_v19 = vshra.s32 %v5737_v14, 16 }
 0xa0f   : > { %v5740_v56 = vcvt.s32.f32 %v3131_v19  ;;  %v2980_v19 = vand.u32 65535, %v5647_v3 }
 0xa11   : > { %v2922_v17 = vpop.xlane.xlu0 %2921  ;;  %3134 = vmin.xlane.f32.xlu1 %v5740_v56 }
 0xa12   : > { %vm2944_vm14 = vcmp.ge.f32.partialorder %v5616_v54, %v2922_v17 }
 0xa13   : > { %v2960_v20 = vsel %vm2944_vm14, %v4172_v42, 4 }
 0xa14   : > { %v5746_v18 = vsel %vm6147_vm2, %v2960_v20, 2147483647  ;;  %v2982_v20 = vcvt.s32.f32 %v2980_v19 }
 0xa15   : > { %v3146_v37 = vshra.s32 %v5746_v18, 16 }
 0xa17   : > { %v5749_v22 = vcvt.s32.f32 %v3146_v37 }
 0xa19   : > { %v2925_v4 = vpop.xlane.xlu1 %2924  ;;  %3149 = vmin.xlane.f32.xlu2 %v5749_v22 }
 0xa1a   : > { %vm2945_vm5 = vcmp.ge.f32.partialorder %v5621_v59, %v2925_v4 }
 0xa1b   : > { %v2961_v36 = vsel %vm2945_vm5, %v4172_v42, 4 }
 0xa1c   : > { %v5755_v51 = vsel %vm6155_vm7, %v2961_v36, 2147483647 }
 0xa1d   : > { %v3161_v60 = vshra.s32 %v5755_v51, 16 }
 0xa1f   : > { %v5758_v55 = vcvt.s32.f32 %v3161_v60  ;;  %v3010_v60 = vand.u32 65535, %v5665_v34  ;;  %v3040_v34 = vand.u32 65535, %v5683_v16  ;;  %v3070_v16 = vand.u32 65535, %v5701_v48 }
 0xa20   : > { %v3100_v48 = vand.u32 65535, %v5719_v46  ;;  %v3130_v46 = vand.u32 65535, %v5737_v14  ;;  %v3160_v14 = vand.u32 65535, %v5755_v51 }
 0xa21   : > { %v2928_v6 = vpop.xlane.xlu2 %2927  ;;  %3164 = vmin.xlane.f32.xlu0 %v5758_v55 }
 0xa22   : > { %vm2946_vm9 = vcmp.ge.f32.partialorder %v5626_v8, %v2928_v6 }
 0xa23   : > { %v2962_v58 = vsel %vm2946_vm9, %v4172_v42, 4 }
 0xa24   : > { %v5764_v2 = vsel %vm6156_vm11, %v2962_v58, 2147483647  ;;  %v3012_v58 = vcvt.s32.f32 %v3010_v60 }
 0xa25   : > { %v3176_v13 = vshra.s32 %v5764_v2, 16 }
 0xa27   : > { %v5767_v9 = vcvt.s32.f32 %v3176_v13 }
 0xa29   : > { %3179 = vmin.xlane.f32.xlu1 %v5767_v9  ;;  %v2931_v44 = vpop.xlane.xlu0 %2930 }
 0xa2a   : > { %vm2947_vm13 = vcmp.ge.f32.partialorder %v5632_v50, %v2931_v44 }
 0xa2b   : > { %v2963_v39 = vsel %vm2947_vm13, %v4172_v42, 4 }
 0xa2c   : > { %v5773_v47 = vpop.xlane.xlu1 %2969  ;;  %v5778_v27 = vsel %vm6157_vm4, %v2963_v39, 2147483647  ;;  %v3042_v39 = vcvt.s32.f32 %v3040_v34  ;;  %v3162_v34 = vcvt.s32.f32 %v3160_v14 }
 0xa2d   : > { %vm2971_vm15 = vcmp.eq.f32.partialorder %v5641_v24, %v5773_v47  ;;  %v3191_v17 = vshra.s32 %v5778_v27, 16  ;;  %v2995_v24 = vand.u32 65535, %v5656_v61  ;;  %v3025_v61 = vand.u32 65535, %v5674_v33 }
 0xa2e   : > { %v2972_v26 = vsel %vm2971_vm15, %v2967_v0, inf  ;;  %v3055_v33 = vand.u32 65535, %v5692_v43  ;;  %v3085_v43 = vand.u32 65535, %v5710_v7  ;;  %v3115_v7 = vand.u32 65535, %v5728_v40 }
 0xa2f   : > { %2973 = vmin.xlane.f32.xlu2 %v2972_v26  ;;  %v5784_v37 = vcvt.s32.f32 %v3191_v17  ;;  %v2997_v36 = vcvt.s32.f32 %v2995_v24  ;;  %v3027_v44 = vcvt.s32.f32 %v3025_v61  ;;  %v3072_v17 = vcvt.s32.f32 %v3070_v16 }
 0xa30   : > { %v3057_v26 = vcvt.s32.f32 %v3055_v33  ;;  %v3117_v60 = vcvt.s32.f32 %v3115_v7  ;;  %v3145_v40 = vand.u32 65535, %v5746_v18  ;;  %v3175_v18 = vand.u32 65535, %v5764_v2 }
 0xa31   : > { %v2976_v51 = vcvt.f32.s32 %v5773_v47  ;;  %v3190_v16 = vand.u32 65535, %v5778_v27  ;;  %vm3236_vm15 = vcmask 39936  }
 0xa34   : > { %v5782_v25 = vpop.xlane.xlu0 %2984 }
 0xa35   : > { %vm2986_vm8 = vcmp.eq.f32.partialorder %v5650_v32, %v5782_v25  ;;  %v2991_v2 = vcvt.f32.s32 %v5782_v25 }
 0xa36   : > { %v2987_v42 = vsel %vm2986_vm8, %v2982_v20, inf }
 0xa37   : > { %3194 = vmin.xlane.f32.xlu2 %v5784_v37  ;;  %2988 = vmin.xlane.f32.xlu0 %v2987_v42  ;;  %v3087_v42 = vcvt.s32.f32 %v3085_v43 }
 0xa3c   : > { %v5790_v4 = vpop.xlane.xlu1 %2999 }
 0xa3d   : > { %vm3001_vm1 = vcmp.eq.f32.partialorder %v5659_v1, %v5790_v4 }
 0xa3e   : > { %v3002_v3 = vsel %vm3001_vm1, %v2997_v36, inf  ;;  %v3102_v36 = vcvt.s32.f32 %v3100_v48  ;;  %vm6158_vm1 = vmmov %vm6157_vm4 }
 0xa3f   : > { %3003 = vmin.xlane.f32.xlu1 %v3002_v3 }
 0xa44   : > { %v5795_v6 = vpop.xlane.xlu2 %3014 }
 0xa45   : > { %vm3016_vm3 = vcmp.eq.f32.partialorder %v5668_v23, %v5795_v6 }
 0xa46   : > { %v3017_v32 = vsel %vm3016_vm3, %v3012_v58, inf  ;;  %vm6159_vm3 = vmmov %vm6158_vm1 }
 0xa47   : > { %3018 = vmin.xlane.f32.xlu2 %v3017_v32  ;;  %v3132_v32 = vcvt.s32.f32 %v3130_v46 }
 0xa4c   : > { %v5800_v13 = vpop.xlane.xlu0 %3029 }
 0xa4d   : > { %vm3031_vm10 = vcmp.eq.f32.partialorder %v5677_v30, %v5800_v13 }
 0xa4e   : > { %v3032_v1 = vsel %vm3031_vm10, %v3027_v44, inf  ;;  %v3147_v44 = vcvt.s32.f32 %v3145_v40  ;;  %vm6160_vm10 = vmmov %vm6158_vm1 }
 0xa4f   : > { %3033 = vmin.xlane.f32.xlu0 %v3032_v1 }
 0xa54   : > { %v5805_v41 = vpop.xlane.xlu1 %3044 }
 0xa55   : > { %vm3046_vm6 = vcmp.eq.f32.partialorder %v5686_v29, %v5805_v41 }
 0xa56   : > { %v3047_v23 = vsel %vm3046_vm6, %v3042_v39, inf  ;;  %vm6161_vm6 = vmmov %vm6158_vm1 }
 0xa57   : > { %3048 = vmin.xlane.f32.xlu1 %v3047_v23  ;;  %v3177_v23 = vcvt.s32.f32 %v3175_v18 }
 0xa5c   : > { %v5810_v0 = vpop.xlane.xlu2 %3059 }
 0xa5d   : > { %vm3061_vm0 = vcmp.eq.f32.partialorder %v5695_v38, %v5810_v0 }
 0xa5e   : > { %v3062_v30 = vsel %vm3061_vm0, %v3057_v26, inf  ;;  %v2977_v26 = vshll.u32 %v2976_v51, 16  ;;  %vm6162_vm0 = vmmov %vm6158_vm1 }
 0xa5f   : > { %3063 = vmin.xlane.f32.xlu2 %v3062_v30 }
 0xa64   : > { %v5815_v19 = vpop.xlane.xlu0 %3074 }
 0xa65   : > { %vm3076_vm12 = vcmp.eq.f32.partialorder %v5704_v49, %v5815_v19 }
 0xa66   : > { %v3077_v29 = vsel %vm3076_vm12, %v3072_v17, inf  ;;  %vm6163_vm12 = vmmov %vm6162_vm0 }
 0xa67   : > { %3078 = vmin.xlane.f32.xlu0 %v3077_v29 }
 0xa6c   : > { %v5820_v20 = vpop.xlane.xlu1 %3089 }
 0xa6d   : > { %vm3091_vm14 = vcmp.eq.f32.partialorder %v5713_v21, %v5820_v20 }
 0xa6e   : > { %v3092_v38 = vsel %vm3091_vm14, %v3087_v42, inf  ;;  %v3192_v42 = vcvt.s32.f32 %v3190_v16  ;;  %vm6164_vm14 = vmmov %vm6162_vm0 }
 0xa6f   : > { %3093 = vmin.xlane.f32.xlu1 %v3092_v38  ;;  %v2992_v38 = vshll.u32 %v2991_v2, 16 }
 0xa74   : > { %v5825_v24 = vpop.xlane.xlu2 %3104 }
 0xa75   : > { %vm3106_vm2 = vcmp.eq.f32.partialorder %v5722_v12, %v5825_v24 }
 0xa76   : > { %v3107_v49 = vsel %vm3106_vm2, %v3102_v36, inf  ;;  %vm6165_vm2 = vmmov %vm6162_vm0 }
 0xa77   : > { %3108 = vmin.xlane.f32.xlu2 %v3107_v49 }
 0xa7c   : > { %v5830_v3 = vpop.xlane.xlu0 %3119 }
 0xa7d   : > { %vm3121_vm5 = vcmp.eq.f32.partialorder %v5731_v15, %v5830_v3 }
 0xa7e   : > { %v3122_v21 = vsel %vm3121_vm5, %v3117_v60, inf  ;;  %vm6166_vm5 = vmmov %vm6162_vm0 }
 0xa7f   : > { %3123 = vmin.xlane.f32.xlu0 %v3122_v21 }
 0xa84   : > { %v5835_v58 = vpop.xlane.xlu1 %3134 }
 0xa85   : > { %vm3136_vm7 = vcmp.eq.f32.partialorder %v5740_v56, %v5835_v58 }
 0xa86   : > { %v3137_v12 = vsel %vm3136_vm7, %v3132_v32, inf  ;;  %vm6167_vm7 = vmmov %vm6162_vm0 }
 0xa87   : > { %3138 = vmin.xlane.f32.xlu1 %v3137_v12 }
 0xa8c   : > { %v5840_v61 = vpop.xlane.xlu2 %3149 }
 0xa8d   : > { %vm3151_vm9 = vcmp.eq.f32.partialorder %v5749_v22, %v5840_v61 }
 0xa8e   : > { %v3152_v15 = vsel %vm3151_vm9, %v3147_v44, inf  ;;  %vm6168_vm9 = vmmov %vm6162_vm0 }
 0xa8f   : > { %3153 = vmin.xlane.f32.xlu2 %v3152_v15 }
 0xa94   : > { %v5845_v1 = vpop.xlane.xlu0 %3164 }
 0xa95   : > { %vm3166_vm11 = vcmp.eq.f32.partialorder %v5758_v55, %v5845_v1 }
 0xa96   : > { %v3167_v56 = vsel %vm3166_vm11, %v3162_v34, inf  ;;  %v3036_v34 = vcvt.f32.s32 %v5800_v13  ;;  %vm6169_vm11 = vmmov %vm6162_vm0 }
 0xa97   : > { %3168 = vmin.xlane.f32.xlu0 %v3167_v56 }
 0xa9c   : > { %v5850_v39 = vpop.xlane.xlu1 %3179 }
 0xa9d   : > { %vm3181_vm13 = vcmp.eq.f32.partialorder %v5767_v9, %v5850_v39 }
 0xa9e   : > { %v3182_v22 = vsel %vm3181_vm13, %v3177_v23, inf  ;;  %vm6170_vm13 = vmmov %vm6162_vm0 }
 0xa9f   : > { %3183 = vmin.xlane.f32.xlu1 %v3182_v22  ;;  %v3037_v22 = vshll.u32 %v3036_v34, 16 }
 0xaa2   : > { %v2974_v33 = vpop.xlane.xlu2 %2973 }
 0xaa3   : > { %v2975_v30 = vcvt.f32.s32 %v2974_v33  ;;  %v3051_v33 = vcvt.f32.s32 %v5805_v41 }
 0xaa5   : > { %v2978_v55 = vadd.s32 %v2977_v26, %v2975_v30  ;;  %v3052_v16 = vshll.u32 %v3051_v33, 16 }
 0xaa7   : > { %v3204_v17 = vcvt.s32.f32 %v2978_v55 }
 0xaa9   : > { %v3220_v9 = vsel %vm6157_vm4, %v5556_v5, %v3204_v17  ;;  %v3006_v5 = vcvt.f32.s32 %v5790_v4  ;;  %v3066_v17 = vcvt.f32.s32 %v5810_v0  ;;  %vm6171_vm4 = vmmov %vm6162_vm0 }
 0xaaa   : > { %v3237_v29 = vsel %vm3236_vm15, %v3220_v9, 0.0  ;;  %v5863_v43 = vpop.xlane.xlu2 %3194  ;;  %v2989_v47 = vpop.xlane.xlu0 %2988 }
 0xaab   : > { %3253 = vst [vmem:[%s5865_s27] sm:$0xff] %v3237_v29  ;;  %v2990_v27 = vcvt.f32.s32 %v2989_v47  ;;  %vm3196_vm8 = vcmp.eq.f32.partialorder %v5784_v37, %v5863_v43  ;;  %v3007_v21 = vshll.u32 %v3006_v5, 16  ;;  %v3021_v37 = vcvt.f32.s32 %v5795_v6 }
 0xaac   : > { %v3197_v25 = vsel %vm3196_vm8, %v3192_v42, inf  ;;  %v3067_v42 = vshll.u32 %v3066_v17, 16  ;;  %vm6172_vm8 = vmmov %vm6162_vm0 }
 0xaad   : > { %v2993_v48 = vadd.s32 %v2992_v38, %v2990_v27  ;;  %3198 = vmin.xlane.f32.xlu2 %v3197_v25  ;;  %v3022_v15 = vshll.u32 %v3021_v37, 16  ;;  %v3081_v27 = vcvt.f32.s32 %v5815_v19 }
 0xaaf   : > { %v3205_v36 = vcvt.s32.f32 %v2993_v48 }
 0xab1   : > { %v3221_v49 = vsel %vm6158_vm1, %v5561_v11, %v3205_v36  ;;  %v3082_v36 = vshll.u32 %v3081_v27, 16 }
 0xab2   : > { %v3238_v7 = vsel %vm3236_vm15, %v3221_v49, 0.0  ;;  %v3004_v60 = vpop.xlane.xlu1 %3003 }
 0xab3   : > { %3254 = vst [vmem:[%s5865_s27 + $0x8] sm:$0xff] %v3238_v7  ;;  %v3005_v46 = vcvt.f32.s32 %v3004_v60  ;;  %v3096_v7 = vcvt.f32.s32 %v5820_v20 }
 0xab5   : > { %v3008_v32 = vadd.s32 %v3007_v21, %v3005_v46 }
 0xab7   : > { %v3206_v12 = vcvt.s32.f32 %v3008_v32  ;;  %v3097_v32 = vshll.u32 %v3096_v7, 16 }
 0xab9   : > { %v3222_v40 = vsel %vm6159_vm3, %v5566_v10, %v3206_v12  ;;  %v3111_v12 = vcvt.f32.s32 %v5825_v24 }
 0xaba   : > { %v3239_v4 = vsel %vm3236_vm15, %v3222_v40, 0.0  ;;  %v3019_v44 = vpop.xlane.xlu2 %3018 }
 0xabb   : > { %3255 = vst [vmem:[%s5865_s27 + $0x10] sm:$0xff] %v3239_v4  ;;  %v3020_v11 = vcvt.f32.s32 %v3019_v44 }
 0xabd   : > { %v3023_v14 = vadd.s32 %v3022_v15, %v3020_v11  ;;  %v3112_v15 = vshll.u32 %v3111_v12, 16 }
 0xabf   : > { %v3207_v56 = vcvt.s32.f32 %v3023_v14  ;;  %v3126_v14 = vcvt.f32.s32 %v5830_v3 }
 0xac1   : > { %v3223_v18 = vsel %vm6160_vm10, %v5571_v31, %v3207_v56 }
 0xac2   : > { %v3240_v6 = vsel %vm3236_vm15, %v3223_v18, 0.0  ;;  %v3034_v23 = vpop.xlane.xlu0 %3033 }
 0xac3   : > { %3256 = vst [vmem:[%s5865_s27 + $0x18] sm:$0xff] %v3240_v6  ;;  %v3035_v10 = vcvt.f32.s32 %v3034_v23  ;;  %v3127_v6 = vshll.u32 %v3126_v14, 16 }
 0xac5   : > { %v3038_v51 = vadd.s32 %v3037_v22, %v3035_v10  ;;  %v3141_v22 = vcvt.f32.s32 %v5835_v58 }
 0xac7   : > { %v3208_v26 = vcvt.s32.f32 %v3038_v51 }
 0xac9   : > { %v3224_v30 = vsel %vm6161_vm6, %v5576_v45, %v3208_v26  ;;  %v3142_v26 = vshll.u32 %v3141_v22, 16 }
 0xaca   : > { %v3241_v13 = vsel %vm3236_vm15, %v3224_v30, 0.0  ;;  %v3049_v55 = vpop.xlane.xlu1 %3048 }
 0xacb   : > { %3257 = vst [vmem:[%s5865_s27 + $0x20] sm:$0xff] %v3241_v13  ;;  %v3050_v31 = vcvt.f32.s32 %v3049_v55  ;;  %v3156_v13 = vcvt.f32.s32 %v5840_v61 }
 0xacd   : > { %v3053_v2 = vadd.s32 %v3052_v16, %v3050_v31 }
 0xacf   : > { %v3209_v9 = vcvt.s32.f32 %v3053_v2  ;;  %v3157_v2 = vshll.u32 %v3156_v13, 16 }
 0xad1   : > { %v3225_v29 = vsel %vm6162_vm0, %v5581_v57, %v3209_v9  ;;  %v3171_v9 = vcvt.f32.s32 %v5845_v1 }
 0xad2   : > { %v3242_v41 = vsel %vm3236_vm15, %v3225_v29, 0.0  ;;  %v3064_v47 = vpop.xlane.xlu2 %3063 }
 0xad3   : > { %3258 = vst [vmem:[%s5865_s27 + $0x28] sm:$0xff] %v3242_v41  ;;  %v3065_v45 = vcvt.f32.s32 %v3064_v47 }
 0xad5   : > { %v3068_v38 = vadd.s32 %v3067_v42, %v3065_v45  ;;  %v3172_v42 = vshll.u32 %v3171_v9, 16 }
 0xad7   : > { %v3210_v25 = vcvt.s32.f32 %v3068_v38  ;;  %v3186_v38 = vcvt.f32.s32 %v5850_v39  ;;  %v3201_v39 = vcvt.f32.s32 %v5863_v43 }
 0xad9   : > { %v3226_v48 = vsel %vm6163_vm12, %v5586_v28, %v3210_v25  ;;  %v3202_v7 = vshll.u32 %v3201_v39, 16 }
 0xada   : > { %v3243_v0 = vsel %vm3236_vm15, %v3226_v48, 0.0  ;;  %v3079_v5 = vpop.xlane.xlu0 %3078  ;;  %v3187_v48 = vshll.u32 %v3186_v38, 16 }
 0xadb   : > { %3259 = vst [vmem:[%s5865_s27 + $0x30] sm:$0xff] %v3243_v0  ;;  %v3080_v57 = vcvt.f32.s32 %v3079_v5 }
 0xadd   : > { %v3083_v49 = vadd.s32 %v3082_v36, %v3080_v57 }
 0xadf   : > { %v3211_v60 = vcvt.s32.f32 %v3083_v49 }
 0xae1   : > { %v3227_v21 = vsel %vm6164_vm14, %v5591_v62, %v3211_v60 }
 0xae2   : > { %v3244_v19 = vsel %vm3236_vm15, %v3227_v21, 0.0  ;;  %v3094_v46 = vpop.xlane.xlu1 %3093 }
 0xae3   : > { %3260 = vst [vmem:[%s5865_s27 + $0x38] sm:$0xff] %v3244_v19  ;;  %v3095_v28 = vcvt.f32.s32 %v3094_v46 }
 0xae5   : > { %v3098_v37 = vadd.s32 %v3097_v32, %v3095_v28 }
 0xae7   : > { %v3212_v40 = vcvt.s32.f32 %v3098_v37 }
 0xae9   : > { %v3228_v4 = vsel %vm6165_vm2, %v5596_v35, %v3212_v40 }
 0xaea   : > { %v3245_v20 = vsel %vm3236_vm15, %v3228_v4, 0.0  ;;  %v3109_v44 = vpop.xlane.xlu2 %3108 }
 0xaeb   : > { %3261 = vst [vmem:[%s5865_s27 + $0x40] sm:$0xff] %v3245_v20  ;;  %v3110_v62 = vcvt.f32.s32 %v3109_v44 }
 0xaed   : > { %v3113_v11 = vadd.s32 %v3112_v15, %v3110_v62 }
 0xaef   : > { %v3213_v34 = vcvt.s32.f32 %v3113_v11 }
 0xaf1   : > { %v3229_v56 = vsel %vm6166_vm5, %v5601_v52, %v3213_v34 }
 0xaf2   : > { %v3246_v24 = vsel %vm3236_vm15, %v3229_v56, 0.0  ;;  %v3124_v18 = vpop.xlane.xlu0 %3123 }
 0xaf3   : > { %3262 = vst [vmem:[%s5865_s27 + $0x48] sm:$0xff] %v3246_v24  ;;  %v3125_v35 = vcvt.f32.s32 %v3124_v18 }
 0xaf5   : > { %v3128_v23 = vadd.s32 %v3127_v6, %v3125_v35 }
 0xaf7   : > { %v3214_v10 = vcvt.s32.f32 %v3128_v23 }
 0xaf9   : > { %v3230_v51 = vsel %vm6167_vm7, %v5606_v63, %v3214_v10 }
 0xafa   : > { %v3247_v3 = vsel %vm3236_vm15, %v3230_v51, 0.0  ;;  %v3139_v33 = vpop.xlane.xlu1 %3138 }
 0xafb   : > { %3263 = vst [vmem:[%s5865_s27 + $0x50] sm:$0xff] %v3247_v3  ;;  %v3140_v52 = vcvt.f32.s32 %v3139_v33 }
 0xafd   : > { %v3143_v30 = vadd.s32 %v3142_v26, %v3140_v52 }
 0xaff   : > { %v3215_v55 = vcvt.s32.f32 %v3143_v30 }
 0xb01   : > { %v3231_v16 = vsel %vm6168_vm9, %v5611_v53, %v3215_v55 }
 0xb02   : > { %v3248_v58 = vsel %vm3236_vm15, %v3231_v16, 0.0  ;;  %v3154_v31 = vpop.xlane.xlu2 %3153 }
 0xb03   : > { %3264 = vst [vmem:[%s5865_s27 + $0x58] sm:$0xff] %v3248_v58  ;;  %v3155_v63 = vcvt.f32.s32 %v3154_v31 }
 0xb05   : > { %v3158_v17 = vadd.s32 %v3157_v2, %v3155_v63 }
 0xb07   : > { %v3216_v29 = vcvt.s32.f32 %v3158_v17 }
 0xb09   : > { %v3232_v41 = vsel %vm6169_vm11, %v5616_v54, %v3216_v29 }
 0xb0a   : > { %v3249_v61 = vsel %vm3236_vm15, %v3232_v41, 0.0  ;;  %v3169_v47 = vpop.xlane.xlu0 %3168 }
 0xb0b   : > { %3265 = vst [vmem:[%s5865_s27 + $0x60] sm:$0xff] %v3249_v61  ;;  %v3170_v53 = vcvt.f32.s32 %v3169_v47 }
 0xb0d   : > { %v3173_v45 = vadd.s32 %v3172_v42, %v3170_v53 }
 0xb0f   : > { %v3217_v27 = vcvt.s32.f32 %v3173_v45 }
 0xb11   : > { %v3233_v1 = vsel %vm6170_vm13, %v5621_v59, %v3217_v27 }
 0xb12   : > { %v3184_v25 = vpop.xlane.xlu1 %3183  ;;  %v3250_v54 = vsel %vm3236_vm15, %v3233_v1, 0.0 }
 0xb13   : > { %v3185_v0 = vcvt.f32.s32 %v3184_v25  ;;  %3266 = vst [vmem:[%s5865_s27 + $0x68] sm:$0xff] %v3250_v54 }
 0xb15   : > { %v3188_v5 = vadd.s32 %v3187_v48, %v3185_v0 }
 0xb17   : > { %v3218_v36 = vcvt.s32.f32 %v3188_v5 }
 0xb19   : > { %v3234_v57 = vsel %vm6171_vm4, %v5626_v8, %v3218_v36 }
 0xb1a   : > { %v3251_v49 = vsel %vm3236_vm15, %v3234_v57, 0.0 }
 0xb1b   : > { %3267 = vst [vmem:[%s5865_s27 + $0x70] sm:$0xff] %v3251_v49 }
 0xb20   : > { %v3199_v59 = vpop.xlane.xlu2 %3198 }
 0xb21   : > { %v3200_v60 = vcvt.f32.s32 %v3199_v59 }
 0xb23   : > { %v3203_v21 = vadd.s32 %v3202_v7, %v3200_v60 }
 0xb25   : > { %v3219_v8 = vcvt.s32.f32 %v3203_v21 }
 0xb27   : > { %v3235_v19 = vsel %vm6172_vm8, %v5632_v50, %v3219_v8 }
 0xb28   : > { %v3252_v43 = vsel %vm3236_vm15, %v3235_v19, 0.0 }
 0xb29   : > { %3268 = vst [vmem:[%s5865_s27 + $0x78] sm:$0xff] %v3252_v43 }
 0xb2a   : > { %3818 = shalt.err (!%p3815_p4)
}
 0xb2b   : > { %s3859_s22 = smov 128   ;;  %s3860_s23 = smov 8  }
 0xb2c   : > { %3498 = dma.vmem_to_hbm [thread:$0]  (%p3924_p5), %s3283_s7, 2048, %s3285_s8, %s3270_s19, %s3859_s22, %s3859_s22, %s3860_s23  }
 0xb2d PF: > { %p3504_p7 = scmp.ge.s32.totalorder %s3853_s18, 2  ;;  %s3299_s28 = sand.u32 1, %s3841_s15  }
 0xb2e   : > { %s3300_s27 = scalar_lea.sflag [#allocation3], %s3299_s28 }
 0xb2f   : > { %p3501_p8 = pnand %p3504_p7, %p3928_p6 }
 0xb31   : > { %p3502_p9 = pneg %p3501_p8 }
 0xb33   : > { %3836 = dma.done.wait (%p3502_p9), %s3300_s27, 2048  }
 0xb34   : > { %3838 = vsyncadd (%p3502_p9), %s3300_s27, 4294965248  ;;  %p14_p10 = scmp.ge.s32.totalorder %s3911_s21, 4   ;;  %s6173_s15 = smov %s3845_s16 }
 0xb35   : > { %s6174_s16 = smov %s3849_s17  ;;  %s6175_s17 = smov %s3922_s24 }
 0xb36   : > { %s6176_s18 = smov %s3911_s21  ;;  %16 = sbr.rel (!%p14_p10) target bundleno = 3 (0x3), region = 75 }
 0xb3b   :  { %3306 = vsyncpa [#allocation3], 1 }
 0xb3c   :  { %3308 = vsyncpa [#allocation3 + $0x1], 1 }

</bundles_post_ra>
